<compile_context>
chip_gen: v6e
topology: v6e:2x2x1
jax: 0.10.0
libtpu: 0.0.40
codegen_flags: <defaults>
</compile_context>

<pallas_src>
import math
import jax
import jax.numpy as jnp
from jax import lax
from jax.experimental import pallas as pl
from jax.experimental.pallas import tpu as pltpu

PI = math.pi

# ---- hyper-parameters (small, consistent with TransformerModel.__init__) ----
SYSTEM_SIZE = 13                                  # 1-D chain -> n_dim = 1, n = 13 spins
N_DIM = 1
PARAM_DIM = 2
PHYS_DIM = 2
EMB = 32                                          # embedding_size
N_HEAD = 2
DH = EMB // N_HEAD
N_HID = 64
N_LAYERS = 2
PREFIX_LEN = N_DIM + PARAM_DIM                    # 3
INPUT_DIM = PHYS_DIM + N_DIM + PARAM_DIM + 2      # 7
N_SPINS = SYSTEM_SIZE                             # 13
SEQ_LEN = PREFIX_LEN + N_SPINS                    # 16
PSI_LEN = N_SPINS + 1                             # 14  (output[seq_prefix_len-1:])
BATCH = 4
SQRT_E = math.sqrt(float(EMB))
LN_EPS = 1e-5
NEG = -1e9                                        # finite mask value (no inf-inf NaN hazard)


def _layer_norm(x, w, b):
    mu = jnp.mean(x, axis=-1, keepdims=True)
    xc = x - mu
    var = jnp.mean(xc * xc, axis=-1, keepdims=True)
    return xc * lax.rsqrt(var + LN_EPS) * w + b


def tqs_kernel(src_ref, pe_ref, mask_ref,
               w_enc_ref, b_enc_ref,
               w_qkv_ref, b_qkv_ref, w_oh_ref,
               vecs_ref, w_ff1_ref, b_ff1_ref, w_ff2_ref,
               w_hd_ref, b_hd_ref,
               out_ref):
    """Whole batch in one step.  Activations are (B*L, feature), feature on lanes."""
    bf16 = jnp.bfloat16

    # self.encoder(src) * sqrt(E)  +  TQS positional encoding (dropout = identity)
    x = jnp.dot(src_ref[...].astype(bf16), w_enc_ref[...],
                preferred_element_type=jnp.float32)
    x = (x + b_enc_ref[...]) * SQRT_E + pe_ref[...]                  # (B*L, EMB) f32

    mask = mask_ref[...]                                             # (B*L, B*L), 0 / -1e9
    scale = 1.0 / math.sqrt(DH)

    for l in range(N_LAYERS):
        # ---- multi-head self-attention (post-LN TransformerEncoderLayer) ----
        xb = x.astype(bf16)
        attn = None
        for h in range(N_HEAD):
            i_q = (l * 3 + 0) * N_HEAD + h
            i_k = (l * 3 + 1) * N_HEAD + h
            i_v = (l * 3 + 2) * N_HEAD + h
            q = jnp.dot(xb, w_qkv_ref[i_q], preferred_element_type=jnp.float32) + b_qkv_ref[i_q]
            k = jnp.dot(xb, w_qkv_ref[i_k], preferred_element_type=jnp.float32) + b_qkv_ref[i_k]
            v = jnp.dot(xb, w_qkv_ref[i_v], preferred_element_type=jnp.float32) + b_qkv_ref[i_v]
            s = lax.dot_general((q * scale).astype(bf16), k.astype(bf16),
                                (((1,), (1,)), ((), ())),
                                preferred_element_type=jnp.float32) + mask
            m = jnp.max(s, axis=-1, keepdims=True)
            p = jnp.exp(s - m)
            p = p * pl.reciprocal(jnp.sum(p, axis=-1, keepdims=True), approx=True)
            head = jnp.dot(p.astype(bf16), v.astype(bf16),
                           preferred_element_type=jnp.float32)       # (B*L, DH)
            # row-split out-projection: accumulate heads on the MXU, no lane concat
            contrib = jnp.dot(head.astype(bf16), w_oh_ref[l * N_HEAD + h],
                              preferred_element_type=jnp.float32)    # (B*L, EMB)
            attn = contrib if attn is None else attn + contrib
        attn = attn + vecs_ref[l * 6 + 0]                            # out-proj bias
        x = _layer_norm(x + attn, vecs_ref[l * 6 + 1], vecs_ref[l * 6 + 2])

        # ---- feed-forward (relu) ----
        h1 = jnp.maximum(
            jnp.dot(x.astype(bf16), w_ff1_ref[l], preferred_element_type=jnp.float32)
            + b_ff1_ref[l], 0.0)
        h2 = (jnp.dot(h1.astype(bf16), w_ff2_ref[l], preferred_element_type=jnp.float32)
              + vecs_ref[l * 6 + 3])
        x = _layer_norm(x + h2, vecs_ref[l * 6 + 4], vecs_ref[l * 6 + 5])

    # fused amp/phase heads: one (EMB, 2*phys) matmul on ALL rows (row slicing in wrapper)
    z = jnp.dot(x.astype(bf16), w_hd_ref[...],
                preferred_element_type=jnp.float32) + b_hd_ref[...]  # (B*L, 2*phys)
    za = z[:, :PHYS_DIM]
    za = za - jnp.max(za, axis=-1, keepdims=True)
    amp = za - jnp.log(jnp.sum(jnp.exp(za), axis=-1, keepdims=True)) # log_softmax
    zp = z[:, PHYS_DIM:]
    phase = 2.0 * PI * (1.0 + zp / (1.0 + jnp.abs(zp)))              # module's softsign

    # single lane-packed output slab: [ psi (EMB) | amp (phys) | phase (phys) ]
    out_ref[...] = jnp.concatenate([x, amp, phase], axis=-1)


def tqs_forward(spins, params):
    """spins: (N_SPINS, batch) int32 in [0, PHYS_DIM).
    Returns ([amp, phase], psi_output) in PyTorch layout (seq, batch, feature)."""
    n, batch = spins.shape
    BL = batch * SEQ_LEN
    bf = jnp.bfloat16
    p = params

    # ---- glue: wrap_spins -> src, flattened batch-major (B*L, INPUT_DIM) ----
    onehot = jax.nn.one_hot(spins, PHYS_DIM, dtype=jnp.float32)          # (n, B, phys)
    spin_rows = jnp.zeros((n, batch, INPUT_DIM), jnp.float32).at[:, :, :PHYS_DIM].set(onehot)
    prefix_b = jnp.broadcast_to(p["prefix"], (PREFIX_LEN, batch, INPUT_DIM))
    src = jnp.concatenate([prefix_b, spin_rows], axis=0)                  # (L, B, D_in)
    src_flat = jnp.transpose(src, (1, 0, 2)).reshape(BL, INPUT_DIM)       # (B*L, D_in)

    # block-diagonal causal mask over the folded batch (finite negative, not -inf)
    allowed = 1.0 - jnp.triu(jnp.ones((SEQ_LEN, SEQ_LEN), jnp.float32), k=1)
    mask = (1.0 - jnp.kron(jnp.eye(batch, dtype=jnp.float32), allowed)) * NEG   # (B*L, B*L)

    # sinusoidal PE on the spin rows only (prefix rows zero), tiled per batch block
    pos = jnp.arange(N_SPINS, dtype=jnp.float32)[:, None]
    div = jnp.exp(jnp.arange(0, EMB, 2, dtype=jnp.float32) * (-math.log(10000.0) / EMB))
    pe_spin = jnp.zeros((N_SPINS, EMB), jnp.float32)
    pe_spin = pe_spin.at[:, 0::2].set(jnp.sin(pos * div))
    pe_spin = pe_spin.at[:, 1::2].set(jnp.cos(pos * div))
    pe = jnp.concatenate([jnp.zeros((PREFIX_LEN, EMB), jnp.float32), pe_spin], axis=0)
    pe_flat = jnp.tile(pe, (batch, 1))                                    # (B*L, EMB)

    # ---- weight repacking: per-head splits, fused heads, packed bias/LN vectors ----
    w_in, b_in = p["w_in"], p["b_in"]                                     # (NL,3E,E), (NL,3E)
    wq_blocks, bq_blocks = [], []
    for l in range(N_LAYERS):
        for t in range(3):                                                # q, k, v
            for h in range(N_HEAD):
                r0 = t * EMB + h * DH
                wq_blocks.append(w_in[l, r0:r0 + DH, :].T)                # (E, DH)
                bq_blocks.append(b_in[l, r0:r0 + DH][None, :])            # (1, DH)
    w_qkv = jnp.stack(wq_blocks).astype(bf)                               # (NL*3*NH, E, DH)
    b_qkv = jnp.stack(bq_blocks)                                          # (NL*3*NH, 1, DH)

    w_oh = jnp.stack([p["w_out"][l][:, h * DH:(h + 1) * DH].T             # (DH, E)
                      for l in range(N_LAYERS) for h in range(N_HEAD)]).astype(bf)

    vecs = jnp.stack([jnp.stack([p["b_out"][l], p["ln1_w"][l], p["ln1_b"][l],
                                 p["b_ff2"][l], p["ln2_w"][l], p["ln2_b"][l]])
                      for l in range(N_LAYERS)]).reshape(N_LAYERS * 6, 1, EMB)

    w_ff1 = jnp.transpose(p["w_ff1"], (0, 2, 1)).astype(bf)               # (NL, E, H)
    b_ff1 = p["b_ff1"][:, None, :]                                        # (NL, 1, H)
    w_ff2 = jnp.transpose(p["w_ff2"], (0, 2, 1)).astype(bf)               # (NL, H, E)

    w_heads = jnp.concatenate([p["w_amp"].T, p["w_ph"].T], axis=1).astype(bf)  # (E, 2*phys)
    b_heads = jnp.concatenate([p["b_amp"], p["b_ph"]])[None, :]                # (1, 2*phys)

    inputs = (src_flat, pe_flat, mask,
              p["w_enc"].T.astype(bf), p["b_enc"][None, :],
              w_qkv, b_qkv, w_oh,
              vecs, w_ff1, b_ff1, w_ff2,
              w_heads, b_heads)

    # Whole problem in one kernel step (no grid): total working set < 0.2 MiB, the kernel
    # is latency-bound, so single-TC execution is the right trade even on v7x.
    out = pl.pallas_call(
        tqs_kernel,
        out_shape=jax.ShapeDtypeStruct((BL, EMB + 2 * PHYS_DIM), jnp.float32),
    )(*inputs)

    # slice rows seq_prefix_len-1: and unpack [psi | amp | phase]; back to (seq, batch, ·)
    out = out.reshape(batch, SEQ_LEN, EMB + 2 * PHYS_DIM)[:, PREFIX_LEN - 1:, :]
    psi = jnp.transpose(out[:, :, :EMB], (1, 0, 2))
    amp = jnp.transpose(out[:, :, EMB:EMB + PHYS_DIM], (1, 0, 2))
    phase = jnp.transpose(out[:, :, EMB + PHYS_DIM:], (1, 0, 2))
    return [amp, phase], psi


def init_params(key, param_values):
    """Deterministic synthetic init with the same parameter shapes as the PyTorch module."""
    initrange = 0.1
    ks = jax.random.split(key, 4 + N_LAYERS)

    def U(k, shape, a):
        return jax.random.uniform(k, shape, jnp.float32, -a, a)

    params = dict(
        w_enc=U(ks[0], (EMB, INPUT_DIM), initrange),       # encoder: uniform(-0.1, 0.1)
        b_enc=jnp.zeros((EMB,), jnp.float32),
        w_amp=U(ks[1], (PHYS_DIM, EMB), initrange),
        b_amp=jnp.zeros((PHYS_DIM,), jnp.float32),
        w_ph=U(ks[2], (PHYS_DIM, EMB), initrange),
        b_ph=jnp.zeros((PHYS_DIM,), jnp.float32),
    )

    w_in, w_out, w1, w2 = [], [], [], []
    for l in range(N_LAYERS):
        k0, k1, k2, k3 = jax.random.split(ks[4 + l], 4)
        w_in.append(U(k0, (3 * EMB, EMB), math.sqrt(6.0 / (4 * EMB))))   # xavier-like
        w_out.append(U(k1, (EMB, EMB), 1.0 / math.sqrt(EMB)))
        w1.append(U(k2, (N_HID, EMB), 1.0 / math.sqrt(EMB)))
        w2.append(U(k3, (EMB, N_HID), 1.0 / math.sqrt(N_HID)))
    params.update(
        w_in=jnp.stack(w_in), b_in=jnp.zeros((N_LAYERS, 3 * EMB), jnp.float32),
        w_out=jnp.stack(w_out), b_out=jnp.zeros((N_LAYERS, EMB), jnp.float32),
        ln1_w=jnp.ones((N_LAYERS, EMB), jnp.float32),
        ln1_b=jnp.zeros((N_LAYERS, EMB), jnp.float32),
        w_ff1=jnp.stack(w1), b_ff1=jnp.zeros((N_LAYERS, N_HID), jnp.float32),
        w_ff2=jnp.stack(w2), b_ff2=jnp.zeros((N_LAYERS, EMB), jnp.float32),
        ln2_w=jnp.ones((N_LAYERS, EMB), jnp.float32),
        ln2_b=jnp.zeros((N_LAYERS, EMB), jnp.float32),
    )

    # prefix (set_param + init_seq) with fixed system_size and fixed param values
    # TODO(synk): set_param's torch RNG draw is replaced by a fixed deterministic choice.
    prefix = jnp.zeros((PREFIX_LEN, 1, INPUT_DIM), jnp.float32)
    prefix = prefix.at[0, 0, PHYS_DIM].set(math.log(float(SYSTEM_SIZE)))     # diag(log N)
    prefix = prefix.at[0, 0, PHYS_DIM + N_DIM].set(float(SYSTEM_SIZE % 2))   # parity
    param_offset = PHYS_DIM + N_DIM + 2
    for i in range(PARAM_DIM):
        prefix = prefix.at[N_DIM + i, 0, param_offset + i].set(param_values[i])
    params["prefix"] = prefix
    return params


if __name__ == "__main__":
    key = jax.random.PRNGKey(0)
    kp, ksp = jax.random.split(key)
    params = init_params(kp, param_values=jnp.array([0.7, 1.3], jnp.float32))
    spins = jax.random.randint(ksp, (N_SPINS, BATCH), 0, PHYS_DIM, dtype=jnp.int32)

    (amp, phase), psi = jax.jit(tqs_forward)(spins, params)
    jax.block_until_ready((amp, phase, psi))

    assert amp.shape == (PSI_LEN, BATCH, PHYS_DIM)
    assert phase.shape == (PSI_LEN, BATCH, PHYS_DIM)
    assert psi.shape == (PSI_LEN, BATCH, EMB)
    # log_softmax rows must exponentiate to probability distributions
    assert bool(jnp.allclose(jnp.sum(jnp.exp(amp), axis=-1), 1.0, atol=1e-3))
    assert bool(jnp.all(jnp.isfinite(amp))) and bool(jnp.all(jnp.isfinite(phase)))
    assert bool(jnp.all(jnp.isfinite(psi)))
    print("KERNEL_OK")
</pallas_src>

<mosaic_0001>
module attributes {stable_mosaic.version = 11 : i64} {
  func.func @tqs_kernel(%arg0: memref<64x7xf32, #tpu.memory_space<vmem>>, %arg1: memref<64x32xf32, #tpu.memory_space<vmem>>, %arg2: memref<64x64xf32, #tpu.memory_space<vmem>>, %arg3: memref<7x32xbf16, #tpu.memory_space<vmem>>, %arg4: memref<1x32xf32, #tpu.memory_space<vmem>>, %arg5: memref<12x32x16xbf16, #tpu.memory_space<vmem>>, %arg6: memref<12x1x16xf32, #tpu.memory_space<vmem>>, %arg7: memref<4x16x32xbf16, #tpu.memory_space<vmem>>, %arg8: memref<12x1x32xf32, #tpu.memory_space<vmem>>, %arg9: memref<2x32x64xbf16, #tpu.memory_space<vmem>>, %arg10: memref<2x1x64xf32, #tpu.memory_space<vmem>>, %arg11: memref<2x64x32xbf16, #tpu.memory_space<vmem>>, %arg12: memref<32x4xbf16, #tpu.memory_space<vmem>>, %arg13: memref<1x4xf32, #tpu.memory_space<vmem>>, %arg14: memref<64x36xf32, #tpu.memory_space<vmem>>) attributes {dimension_semantics = [], scalar_prefetch = 0 : i64, scratch_operands = 0 : i64, tpu.core_type = #tpu.core_type<tc>} {
    %c0 = arith.constant 0 : index
    %c0_0 = arith.constant 0 : index
    %0 = vector.load %arg0[%c0, %c0_0] : memref<64x7xf32, #tpu.memory_space<vmem>>, vector<64x7xf32>
    %1 = arith.truncf %0 : vector<64x7xf32> to vector<64x7xbf16>
    %c0_1 = arith.constant 0 : index
    %c0_2 = arith.constant 0 : index
    %2 = vector.load %arg3[%c0_1, %c0_2] : memref<7x32xbf16, #tpu.memory_space<vmem>>, vector<7x32xbf16>
    %cst = arith.constant dense<0.000000e+00> : vector<64x32xf32>
    %3 = tpu.matmul %1, %2, %cst {dimension_numbers = #tpu.dot_dimension_numbers<[1], [0], [0], [1], [0, 0, 1, 1], [], []>} : vector<64x7xbf16>, vector<7x32xbf16>, vector<64x32xf32> -> vector<64x32xf32>
    %c0_3 = arith.constant 0 : index
    %c0_4 = arith.constant 0 : index
    %4 = vector.load %arg4[%c0_3, %c0_4] : memref<1x32xf32, #tpu.memory_space<vmem>>, vector<1x32xf32>
    %5 = vector.broadcast %4 : vector<1x32xf32> to vector<64x32xf32>
    %6 = arith.addf %3, %5 : vector<64x32xf32>
    %cst_5 = arith.constant 5.65685415 : f32
    %7 = vector.broadcast %cst_5 : f32 to vector<64x32xf32>
    %8 = arith.mulf %6, %7 : vector<64x32xf32>
    %c0_6 = arith.constant 0 : index
    %c0_7 = arith.constant 0 : index
    %9 = vector.load %arg1[%c0_6, %c0_7] : memref<64x32xf32, #tpu.memory_space<vmem>>, vector<64x32xf32>
    %10 = arith.addf %8, %9 : vector<64x32xf32>
    %c0_8 = arith.constant 0 : index
    %c0_9 = arith.constant 0 : index
    %11 = vector.load %arg2[%c0_8, %c0_9] : memref<64x64xf32, #tpu.memory_space<vmem>>, vector<64x64xf32>
    %12 = arith.truncf %10 : vector<64x32xf32> to vector<64x32xbf16>
    %c0_10 = arith.constant 0 : index
    %c0_11 = arith.constant 0 : index
    %c0_12 = arith.constant 0 : index
    %13 = vector.load %arg5[%c0_10, %c0_11, %c0_12] : memref<12x32x16xbf16, #tpu.memory_space<vmem>>, vector<1x32x16xbf16>
    %14 = vector.shape_cast %13 : vector<1x32x16xbf16> to vector<32x16xbf16>
    %cst_13 = arith.constant dense<0.000000e+00> : vector<64x16xf32>
    %15 = tpu.matmul %12, %14, %cst_13 {dimension_numbers = #tpu.dot_dimension_numbers<[1], [0], [0], [1], [0, 0, 1, 1], [], []>} : vector<64x32xbf16>, vector<32x16xbf16>, vector<64x16xf32> -> vector<64x16xf32>
    %c0_14 = arith.constant 0 : index
    %c0_15 = arith.constant 0 : index
    %c0_16 = arith.constant 0 : index
    %16 = vector.load %arg6[%c0_14, %c0_15, %c0_16] : memref<12x1x16xf32, #tpu.memory_space<vmem>>, vector<1x1x16xf32>
    %17 = vector.shape_cast %16 : vector<1x1x16xf32> to vector<1x16xf32>
    %18 = vector.broadcast %17 : vector<1x16xf32> to vector<64x16xf32>
    %19 = arith.addf %15, %18 : vector<64x16xf32>
    %c2 = arith.constant 2 : index
    %c0_17 = arith.constant 0 : index
    %c0_18 = arith.constant 0 : index
    %20 = vector.load %arg5[%c2, %c0_17, %c0_18] : memref<12x32x16xbf16, #tpu.memory_space<vmem>>, vector<1x32x16xbf16>
    %21 = vector.shape_cast %20 : vector<1x32x16xbf16> to vector<32x16xbf16>
    %cst_19 = arith.constant dense<0.000000e+00> : vector<64x16xf32>
    %22 = tpu.matmul %12, %21, %cst_19 {dimension_numbers = #tpu.dot_dimension_numbers<[1], [0], [0], [1], [0, 0, 1, 1], [], []>} : vector<64x32xbf16>, vector<32x16xbf16>, vector<64x16xf32> -> vector<64x16xf32>
    %c2_20 = arith.constant 2 : index
    %c0_21 = arith.constant 0 : index
    %c0_22 = arith.constant 0 : index
    %23 = vector.load %arg6[%c2_20, %c0_21, %c0_22] : memref<12x1x16xf32, #tpu.memory_space<vmem>>, vector<1x1x16xf32>
    %24 = vector.shape_cast %23 : vector<1x1x16xf32> to vector<1x16xf32>
    %25 = vector.broadcast %24 : vector<1x16xf32> to vector<64x16xf32>
    %26 = arith.addf %22, %25 : vector<64x16xf32>
    %c4 = arith.constant 4 : index
    %c0_23 = arith.constant 0 : index
    %c0_24 = arith.constant 0 : index
    %27 = vector.load %arg5[%c4, %c0_23, %c0_24] : memref<12x32x16xbf16, #tpu.memory_space<vmem>>, vector<1x32x16xbf16>
    %28 = vector.shape_cast %27 : vector<1x32x16xbf16> to vector<32x16xbf16>
    %cst_25 = arith.constant dense<0.000000e+00> : vector<64x16xf32>
    %29 = tpu.matmul %12, %28, %cst_25 {dimension_numbers = #tpu.dot_dimension_numbers<[1], [0], [0], [1], [0, 0, 1, 1], [], []>} : vector<64x32xbf16>, vector<32x16xbf16>, vector<64x16xf32> -> vector<64x16xf32>
    %c4_26 = arith.constant 4 : index
    %c0_27 = arith.constant 0 : index
    %c0_28 = arith.constant 0 : index
    %30 = vector.load %arg6[%c4_26, %c0_27, %c0_28] : memref<12x1x16xf32, #tpu.memory_space<vmem>>, vector<1x1x16xf32>
    %31 = vector.shape_cast %30 : vector<1x1x16xf32> to vector<1x16xf32>
    %32 = vector.broadcast %31 : vector<1x16xf32> to vector<64x16xf32>
    %33 = arith.addf %29, %32 : vector<64x16xf32>
    %cst_29 = arith.constant 2.500000e-01 : f32
    %34 = vector.broadcast %cst_29 : f32 to vector<64x16xf32>
    %35 = arith.mulf %19, %34 : vector<64x16xf32>
    %36 = arith.truncf %35 : vector<64x16xf32> to vector<64x16xbf16>
    %37 = arith.truncf %26 : vector<64x16xf32> to vector<64x16xbf16>
    %cst_30 = arith.constant dense<0.000000e+00> : vector<64x64xf32>
    %38 = tpu.matmul %36, %37, %cst_30 {dimension_numbers = #tpu.dot_dimension_numbers<[1], [1], [0], [0], [0, 0, 1, 0], [], []>} : vector<64x16xbf16>, vector<64x16xbf16>, vector<64x64xf32> -> vector<64x64xf32>
    %39 = arith.addf %38, %11 : vector<64x64xf32>
    %cst_31 = arith.constant dense<0xFF800000> : vector<64xf32>
    %40 = vector.multi_reduction <maximumf>, %39, %cst_31 [1] : vector<64x64xf32> to vector<64xf32>
    %41 = vector.shape_cast %40 : vector<64xf32> to vector<64x1xf32>
    %42 = vector.broadcast %41 : vector<64x1xf32> to vector<64x64xf32>
    %43 = arith.subf %39, %42 : vector<64x64xf32>
    %44 = math.exp %43 : vector<64x64xf32>
    %cst_32 = arith.constant dense<0.000000e+00> : vector<64xf32>
    %45 = vector.multi_reduction <add>, %44, %cst_32 [1] : vector<64x64xf32> to vector<64xf32>
    %46 = vector.shape_cast %45 : vector<64xf32> to vector<64x1xf32>
    %47 = tpu.reciprocal %46 {approx = true} : vector<64x1xf32> -> vector<64x1xf32>
    %48 = vector.broadcast %47 : vector<64x1xf32> to vector<64x64xf32>
    %49 = arith.mulf %44, %48 : vector<64x64xf32>
    %50 = arith.truncf %49 : vector<64x64xf32> to vector<64x64xbf16>
    %51 = arith.truncf %33 : vector<64x16xf32> to vector<64x16xbf16>
    %cst_33 = arith.constant dense<0.000000e+00> : vector<64x16xf32>
    %52 = tpu.matmul %50, %51, %cst_33 {dimension_numbers = #tpu.dot_dimension_numbers<[1], [0], [0], [1], [0, 0, 1, 1], [], []>} : vector<64x64xbf16>, vector<64x16xbf16>, vector<64x16xf32> -> vector<64x16xf32>
    %53 = arith.truncf %52 : vector<64x16xf32> to vector<64x16xbf16>
    %c0_34 = arith.constant 0 : index
    %c0_35 = arith.constant 0 : index
    %c0_36 = arith.constant 0 : index
    %54 = vector.load %arg7[%c0_34, %c0_35, %c0_36] : memref<4x16x32xbf16, #tpu.memory_space<vmem>>, vector<1x16x32xbf16>
    %55 = vector.shape_cast %54 : vector<1x16x32xbf16> to vector<16x32xbf16>
    %cst_37 = arith.constant dense<0.000000e+00> : vector<64x32xf32>
    %56 = tpu.matmul %53, %55, %cst_37 {dimension_numbers = #tpu.dot_dimension_numbers<[1], [0], [0], [1], [0, 0, 1, 1], [], []>} : vector<64x16xbf16>, vector<16x32xbf16>, vector<64x32xf32> -> vector<64x32xf32>
    %c1 = arith.constant 1 : index
    %c0_38 = arith.constant 0 : index
    %c0_39 = arith.constant 0 : index
    %57 = vector.load %arg5[%c1, %c0_38, %c0_39] : memref<12x32x16xbf16, #tpu.memory_space<vmem>>, vector<1x32x16xbf16>
    %58 = vector.shape_cast %57 : vector<1x32x16xbf16> to vector<32x16xbf16>
    %cst_40 = arith.constant dense<0.000000e+00> : vector<64x16xf32>
    %59 = tpu.matmul %12, %58, %cst_40 {dimension_numbers = #tpu.dot_dimension_numbers<[1], [0], [0], [1], [0, 0, 1, 1], [], []>} : vector<64x32xbf16>, vector<32x16xbf16>, vector<64x16xf32> -> vector<64x16xf32>
    %c1_41 = arith.constant 1 : index
    %c0_42 = arith.constant 0 : index
    %c0_43 = arith.constant 0 : index
    %60 = vector.load %arg6[%c1_41, %c0_42, %c0_43] : memref<12x1x16xf32, #tpu.memory_space<vmem>>, vector<1x1x16xf32>
    %61 = vector.shape_cast %60 : vector<1x1x16xf32> to vector<1x16xf32>
    %62 = vector.broadcast %61 : vector<1x16xf32> to vector<64x16xf32>
    %63 = arith.addf %59, %62 : vector<64x16xf32>
    %c3 = arith.constant 3 : index
    %c0_44 = arith.constant 0 : index
    %c0_45 = arith.constant 0 : index
    %64 = vector.load %arg5[%c3, %c0_44, %c0_45] : memref<12x32x16xbf16, #tpu.memory_space<vmem>>, vector<1x32x16xbf16>
    %65 = vector.shape_cast %64 : vector<1x32x16xbf16> to vector<32x16xbf16>
    %cst_46 = arith.constant dense<0.000000e+00> : vector<64x16xf32>
    %66 = tpu.matmul %12, %65, %cst_46 {dimension_numbers = #tpu.dot_dimension_numbers<[1], [0], [0], [1], [0, 0, 1, 1], [], []>} : vector<64x32xbf16>, vector<32x16xbf16>, vector<64x16xf32> -> vector<64x16xf32>
    %c3_47 = arith.constant 3 : index
    %c0_48 = arith.constant 0 : index
    %c0_49 = arith.constant 0 : index
    %67 = vector.load %arg6[%c3_47, %c0_48, %c0_49] : memref<12x1x16xf32, #tpu.memory_space<vmem>>, vector<1x1x16xf32>
    %68 = vector.shape_cast %67 : vector<1x1x16xf32> to vector<1x16xf32>
    %69 = vector.broadcast %68 : vector<1x16xf32> to vector<64x16xf32>
    %70 = arith.addf %66, %69 : vector<64x16xf32>
    %c5 = arith.constant 5 : index
    %c0_50 = arith.constant 0 : index
    %c0_51 = arith.constant 0 : index
    %71 = vector.load %arg5[%c5, %c0_50, %c0_51] : memref<12x32x16xbf16, #tpu.memory_space<vmem>>, vector<1x32x16xbf16>
    %72 = vector.shape_cast %71 : vector<1x32x16xbf16> to vector<32x16xbf16>
    %cst_52 = arith.constant dense<0.000000e+00> : vector<64x16xf32>
    %73 = tpu.matmul %12, %72, %cst_52 {dimension_numbers = #tpu.dot_dimension_numbers<[1], [0], [0], [1], [0, 0, 1, 1], [], []>} : vector<64x32xbf16>, vector<32x16xbf16>, vector<64x16xf32> -> vector<64x16xf32>
    %c5_53 = arith.constant 5 : index
    %c0_54 = arith.constant 0 : index
    %c0_55 = arith.constant 0 : index
    %74 = vector.load %arg6[%c5_53, %c0_54, %c0_55] : memref<12x1x16xf32, #tpu.memory_space<vmem>>, vector<1x1x16xf32>
    %75 = vector.shape_cast %74 : vector<1x1x16xf32> to vector<1x16xf32>
    %76 = vector.broadcast %75 : vector<1x16xf32> to vector<64x16xf32>
    %77 = arith.addf %73, %76 : vector<64x16xf32>
    %cst_56 = arith.constant 2.500000e-01 : f32
    %78 = vector.broadcast %cst_56 : f32 to vector<64x16xf32>
    %79 = arith.mulf %63, %78 : vector<64x16xf32>
    %80 = arith.truncf %79 : vector<64x16xf32> to vector<64x16xbf16>
    %81 = arith.truncf %70 : vector<64x16xf32> to vector<64x16xbf16>
    %cst_57 = arith.constant dense<0.000000e+00> : vector<64x64xf32>
    %82 = tpu.matmul %80, %81, %cst_57 {dimension_numbers = #tpu.dot_dimension_numbers<[1], [1], [0], [0], [0, 0, 1, 0], [], []>} : vector<64x16xbf16>, vector<64x16xbf16>, vector<64x64xf32> -> vector<64x64xf32>
    %83 = arith.addf %82, %11 : vector<64x64xf32>
    %cst_58 = arith.constant dense<0xFF800000> : vector<64xf32>
    %84 = vector.multi_reduction <maximumf>, %83, %cst_58 [1] : vector<64x64xf32> to vector<64xf32>
    %85 = vector.shape_cast %84 : vector<64xf32> to vector<64x1xf32>
    %86 = vector.broadcast %85 : vector<64x1xf32> to vector<64x64xf32>
    %87 = arith.subf %83, %86 : vector<64x64xf32>
    %88 = math.exp %87 : vector<64x64xf32>
    %cst_59 = arith.constant dense<0.000000e+00> : vector<64xf32>
    %89 = vector.multi_reduction <add>, %88, %cst_59 [1] : vector<64x64xf32> to vector<64xf32>
    %90 = vector.shape_cast %89 : vector<64xf32> to vector<64x1xf32>
    %91 = tpu.reciprocal %90 {approx = true} : vector<64x1xf32> -> vector<64x1xf32>
    %92 = vector.broadcast %91 : vector<64x1xf32> to vector<64x64xf32>
    %93 = arith.mulf %88, %92 : vector<64x64xf32>
    %94 = arith.truncf %93 : vector<64x64xf32> to vector<64x64xbf16>
    %95 = arith.truncf %77 : vector<64x16xf32> to vector<64x16xbf16>
    %cst_60 = arith.constant dense<0.000000e+00> : vector<64x16xf32>
    %96 = tpu.matmul %94, %95, %cst_60 {dimension_numbers = #tpu.dot_dimension_numbers<[1], [0], [0], [1], [0, 0, 1, 1], [], []>} : vector<64x64xbf16>, vector<64x16xbf16>, vector<64x16xf32> -> vector<64x16xf32>
    %97 = arith.truncf %96 : vector<64x16xf32> to vector<64x16xbf16>
    %c1_61 = arith.constant 1 : index
    %c0_62 = arith.constant 0 : index
    %c0_63 = arith.constant 0 : index
    %98 = vector.load %arg7[%c1_61, %c0_62, %c0_63] : memref<4x16x32xbf16, #tpu.memory_space<vmem>>, vector<1x16x32xbf16>
    %99 = vector.shape_cast %98 : vector<1x16x32xbf16> to vector<16x32xbf16>
    %cst_64 = arith.constant dense<0.000000e+00> : vector<64x32xf32>
    %100 = tpu.matmul %97, %99, %cst_64 {dimension_numbers = #tpu.dot_dimension_numbers<[1], [0], [0], [1], [0, 0, 1, 1], [], []>} : vector<64x16xbf16>, vector<16x32xbf16>, vector<64x32xf32> -> vector<64x32xf32>
    %101 = arith.addf %56, %100 : vector<64x32xf32>
    %c0_65 = arith.constant 0 : index
    %c0_66 = arith.constant 0 : index
    %c0_67 = arith.constant 0 : index
    %102 = vector.load %arg8[%c0_65, %c0_66, %c0_67] : memref<12x1x32xf32, #tpu.memory_space<vmem>>, vector<1x1x32xf32>
    %103 = vector.shape_cast %102 : vector<1x1x32xf32> to vector<1x32xf32>
    %104 = vector.broadcast %103 : vector<1x32xf32> to vector<64x32xf32>
    %105 = arith.addf %101, %104 : vector<64x32xf32>
    %106 = arith.addf %10, %105 : vector<64x32xf32>
    %c1_68 = arith.constant 1 : index
    %c0_69 = arith.constant 0 : index
    %c0_70 = arith.constant 0 : index
    %107 = vector.load %arg8[%c1_68, %c0_69, %c0_70] : memref<12x1x32xf32, #tpu.memory_space<vmem>>, vector<1x1x32xf32>
    %108 = vector.shape_cast %107 : vector<1x1x32xf32> to vector<1x32xf32>
    %c2_71 = arith.constant 2 : index
    %c0_72 = arith.constant 0 : index
    %c0_73 = arith.constant 0 : index
    %109 = vector.load %arg8[%c2_71, %c0_72, %c0_73] : memref<12x1x32xf32, #tpu.memory_space<vmem>>, vector<1x1x32xf32>
    %110 = vector.shape_cast %109 : vector<1x1x32xf32> to vector<1x32xf32>
    %cst_74 = arith.constant dense<0.000000e+00> : vector<64xf32>
    %111 = vector.multi_reduction <add>, %106, %cst_74 [1] : vector<64x32xf32> to vector<64xf32>
    %112 = vector.shape_cast %111 : vector<64xf32> to vector<64x1xf32>
    %cst_75 = arith.constant 3.200000e+01 : f32
    %113 = vector.broadcast %cst_75 : f32 to vector<64x1xf32>
    %114 = arith.divf %112, %113 : vector<64x1xf32>
    %115 = vector.broadcast %114 : vector<64x1xf32> to vector<64x32xf32>
    %116 = arith.subf %106, %115 : vector<64x32xf32>
    %117 = arith.mulf %116, %116 : vector<64x32xf32>
    %cst_76 = arith.constant dense<0.000000e+00> : vector<64xf32>
    %118 = vector.multi_reduction <add>, %117, %cst_76 [1] : vector<64x32xf32> to vector<64xf32>
    %119 = vector.shape_cast %118 : vector<64xf32> to vector<64x1xf32>
    %cst_77 = arith.constant 3.200000e+01 : f32
    %120 = vector.broadcast %cst_77 : f32 to vector<64x1xf32>
    %121 = arith.divf %119, %120 : vector<64x1xf32>
    %cst_78 = arith.constant 9.99999974E-6 : f32
    %122 = vector.broadcast %cst_78 : f32 to vector<64x1xf32>
    %123 = arith.addf %121, %122 : vector<64x1xf32>
    %124 = math.rsqrt %123 : vector<64x1xf32>
    %125 = vector.broadcast %124 : vector<64x1xf32> to vector<64x32xf32>
    %126 = arith.mulf %116, %125 : vector<64x32xf32>
    %127 = vector.broadcast %108 : vector<1x32xf32> to vector<64x32xf32>
    %128 = arith.mulf %126, %127 : vector<64x32xf32>
    %129 = vector.broadcast %110 : vector<1x32xf32> to vector<64x32xf32>
    %130 = arith.addf %128, %129 : vector<64x32xf32>
    %131 = arith.truncf %130 : vector<64x32xf32> to vector<64x32xbf16>
    %c0_79 = arith.constant 0 : index
    %c0_80 = arith.constant 0 : index
    %c0_81 = arith.constant 0 : index
    %132 = vector.load %arg9[%c0_79, %c0_80, %c0_81] : memref<2x32x64xbf16, #tpu.memory_space<vmem>>, vector<1x32x64xbf16>
    %133 = vector.shape_cast %132 : vector<1x32x64xbf16> to vector<32x64xbf16>
    %cst_82 = arith.constant dense<0.000000e+00> : vector<64x64xf32>
    %134 = tpu.matmul %131, %133, %cst_82 {dimension_numbers = #tpu.dot_dimension_numbers<[1], [0], [0], [1], [0, 0, 1, 1], [], []>} : vector<64x32xbf16>, vector<32x64xbf16>, vector<64x64xf32> -> vector<64x64xf32>
    %c0_83 = arith.constant 0 : index
    %c0_84 = arith.constant 0 : index
    %c0_85 = arith.constant 0 : index
    %135 = vector.load %arg10[%c0_83, %c0_84, %c0_85] : memref<2x1x64xf32, #tpu.memory_space<vmem>>, vector<1x1x64xf32>
    %136 = vector.shape_cast %135 : vector<1x1x64xf32> to vector<1x64xf32>
    %137 = vector.broadcast %136 : vector<1x64xf32> to vector<64x64xf32>
    %138 = arith.addf %134, %137 : vector<64x64xf32>
    %cst_86 = arith.constant 0.000000e+00 : f32
    %139 = vector.broadcast %cst_86 : f32 to vector<64x64xf32>
    %140 = arith.maximumf %138, %139 : vector<64x64xf32>
    %141 = arith.truncf %140 : vector<64x64xf32> to vector<64x64xbf16>
    %c0_87 = arith.constant 0 : index
    %c0_88 = arith.constant 0 : index
    %c0_89 = arith.constant 0 : index
    %142 = vector.load %arg11[%c0_87, %c0_88, %c0_89] : memref<2x64x32xbf16, #tpu.memory_space<vmem>>, vector<1x64x32xbf16>
    %143 = vector.shape_cast %142 : vector<1x64x32xbf16> to vector<64x32xbf16>
    %cst_90 = arith.constant dense<0.000000e+00> : vector<64x32xf32>
    %144 = tpu.matmul %141, %143, %cst_90 {dimension_numbers = #tpu.dot_dimension_numbers<[1], [0], [0], [1], [0, 0, 1, 1], [], []>} : vector<64x64xbf16>, vector<64x32xbf16>, vector<64x32xf32> -> vector<64x32xf32>
    %c3_91 = arith.constant 3 : index
    %c0_92 = arith.constant 0 : index
    %c0_93 = arith.constant 0 : index
    %145 = vector.load %arg8[%c3_91, %c0_92, %c0_93] : memref<12x1x32xf32, #tpu.memory_space<vmem>>, vector<1x1x32xf32>
    %146 = vector.shape_cast %145 : vector<1x1x32xf32> to vector<1x32xf32>
    %147 = vector.broadcast %146 : vector<1x32xf32> to vector<64x32xf32>
    %148 = arith.addf %144, %147 : vector<64x32xf32>
    %149 = arith.addf %130, %148 : vector<64x32xf32>
    %c4_94 = arith.constant 4 : index
    %c0_95 = arith.constant 0 : index
    %c0_96 = arith.constant 0 : index
    %150 = vector.load %arg8[%c4_94, %c0_95, %c0_96] : memref<12x1x32xf32, #tpu.memory_space<vmem>>, vector<1x1x32xf32>
    %151 = vector.shape_cast %150 : vector<1x1x32xf32> to vector<1x32xf32>
    %c5_97 = arith.constant 5 : index
    %c0_98 = arith.constant 0 : index
    %c0_99 = arith.constant 0 : index
    %152 = vector.load %arg8[%c5_97, %c0_98, %c0_99] : memref<12x1x32xf32, #tpu.memory_space<vmem>>, vector<1x1x32xf32>
    %153 = vector.shape_cast %152 : vector<1x1x32xf32> to vector<1x32xf32>
    %cst_100 = arith.constant dense<0.000000e+00> : vector<64xf32>
    %154 = vector.multi_reduction <add>, %149, %cst_100 [1] : vector<64x32xf32> to vector<64xf32>
    %155 = vector.shape_cast %154 : vector<64xf32> to vector<64x1xf32>
    %cst_101 = arith.constant 3.200000e+01 : f32
    %156 = vector.broadcast %cst_101 : f32 to vector<64x1xf32>
    %157 = arith.divf %155, %156 : vector<64x1xf32>
    %158 = vector.broadcast %157 : vector<64x1xf32> to vector<64x32xf32>
    %159 = arith.subf %149, %158 : vector<64x32xf32>
    %160 = arith.mulf %159, %159 : vector<64x32xf32>
    %cst_102 = arith.constant dense<0.000000e+00> : vector<64xf32>
    %161 = vector.multi_reduction <add>, %160, %cst_102 [1] : vector<64x32xf32> to vector<64xf32>
    %162 = vector.shape_cast %161 : vector<64xf32> to vector<64x1xf32>
    %cst_103 = arith.constant 3.200000e+01 : f32
    %163 = vector.broadcast %cst_103 : f32 to vector<64x1xf32>
    %164 = arith.divf %162, %163 : vector<64x1xf32>
    %cst_104 = arith.constant 9.99999974E-6 : f32
    %165 = vector.broadcast %cst_104 : f32 to vector<64x1xf32>
    %166 = arith.addf %164, %165 : vector<64x1xf32>
    %167 = math.rsqrt %166 : vector<64x1xf32>
    %168 = vector.broadcast %167 : vector<64x1xf32> to vector<64x32xf32>
    %169 = arith.mulf %159, %168 : vector<64x32xf32>
    %170 = vector.broadcast %151 : vector<1x32xf32> to vector<64x32xf32>
    %171 = arith.mulf %169, %170 : vector<64x32xf32>
    %172 = vector.broadcast %153 : vector<1x32xf32> to vector<64x32xf32>
    %173 = arith.addf %171, %172 : vector<64x32xf32>
    %174 = arith.truncf %173 : vector<64x32xf32> to vector<64x32xbf16>
    %c6 = arith.constant 6 : index
    %c0_105 = arith.constant 0 : index
    %c0_106 = arith.constant 0 : index
    %175 = vector.load %arg5[%c6, %c0_105, %c0_106] : memref<12x32x16xbf16, #tpu.memory_space<vmem>>, vector<1x32x16xbf16>
    %176 = vector.shape_cast %175 : vector<1x32x16xbf16> to vector<32x16xbf16>
    %cst_107 = arith.constant dense<0.000000e+00> : vector<64x16xf32>
    %177 = tpu.matmul %174, %176, %cst_107 {dimension_numbers = #tpu.dot_dimension_numbers<[1], [0], [0], [1], [0, 0, 1, 1], [], []>} : vector<64x32xbf16>, vector<32x16xbf16>, vector<64x16xf32> -> vector<64x16xf32>
    %c6_108 = arith.constant 6 : index
    %c0_109 = arith.constant 0 : index
    %c0_110 = arith.constant 0 : index
    %178 = vector.load %arg6[%c6_108, %c0_109, %c0_110] : memref<12x1x16xf32, #tpu.memory_space<vmem>>, vector<1x1x16xf32>
    %179 = vector.shape_cast %178 : vector<1x1x16xf32> to vector<1x16xf32>
    %180 = vector.broadcast %179 : vector<1x16xf32> to vector<64x16xf32>
    %181 = arith.addf %177, %180 : vector<64x16xf32>
    %c8 = arith.constant 8 : index
    %c0_111 = arith.constant 0 : index
    %c0_112 = arith.constant 0 : index
    %182 = vector.load %arg5[%c8, %c0_111, %c0_112] : memref<12x32x16xbf16, #tpu.memory_space<vmem>>, vector<1x32x16xbf16>
    %183 = vector.shape_cast %182 : vector<1x32x16xbf16> to vector<32x16xbf16>
    %cst_113 = arith.constant dense<0.000000e+00> : vector<64x16xf32>
    %184 = tpu.matmul %174, %183, %cst_113 {dimension_numbers = #tpu.dot_dimension_numbers<[1], [0], [0], [1], [0, 0, 1, 1], [], []>} : vector<64x32xbf16>, vector<32x16xbf16>, vector<64x16xf32> -> vector<64x16xf32>
    %c8_114 = arith.constant 8 : index
    %c0_115 = arith.constant 0 : index
    %c0_116 = arith.constant 0 : index
    %185 = vector.load %arg6[%c8_114, %c0_115, %c0_116] : memref<12x1x16xf32, #tpu.memory_space<vmem>>, vector<1x1x16xf32>
    %186 = vector.shape_cast %185 : vector<1x1x16xf32> to vector<1x16xf32>
    %187 = vector.broadcast %186 : vector<1x16xf32> to vector<64x16xf32>
    %188 = arith.addf %184, %187 : vector<64x16xf32>
    %c10 = arith.constant 10 : index
    %c0_117 = arith.constant 0 : index
    %c0_118 = arith.constant 0 : index
    %189 = vector.load %arg5[%c10, %c0_117, %c0_118] : memref<12x32x16xbf16, #tpu.memory_space<vmem>>, vector<1x32x16xbf16>
    %190 = vector.shape_cast %189 : vector<1x32x16xbf16> to vector<32x16xbf16>
    %cst_119 = arith.constant dense<0.000000e+00> : vector<64x16xf32>
    %191 = tpu.matmul %174, %190, %cst_119 {dimension_numbers = #tpu.dot_dimension_numbers<[1], [0], [0], [1], [0, 0, 1, 1], [], []>} : vector<64x32xbf16>, vector<32x16xbf16>, vector<64x16xf32> -> vector<64x16xf32>
    %c10_120 = arith.constant 10 : index
    %c0_121 = arith.constant 0 : index
    %c0_122 = arith.constant 0 : index
    %192 = vector.load %arg6[%c10_120, %c0_121, %c0_122] : memref<12x1x16xf32, #tpu.memory_space<vmem>>, vector<1x1x16xf32>
    %193 = vector.shape_cast %192 : vector<1x1x16xf32> to vector<1x16xf32>
    %194 = vector.broadcast %193 : vector<1x16xf32> to vector<64x16xf32>
    %195 = arith.addf %191, %194 : vector<64x16xf32>
    %cst_123 = arith.constant 2.500000e-01 : f32
    %196 = vector.broadcast %cst_123 : f32 to vector<64x16xf32>
    %197 = arith.mulf %181, %196 : vector<64x16xf32>
    %198 = arith.truncf %197 : vector<64x16xf32> to vector<64x16xbf16>
    %199 = arith.truncf %188 : vector<64x16xf32> to vector<64x16xbf16>
    %cst_124 = arith.constant dense<0.000000e+00> : vector<64x64xf32>
    %200 = tpu.matmul %198, %199, %cst_124 {dimension_numbers = #tpu.dot_dimension_numbers<[1], [1], [0], [0], [0, 0, 1, 0], [], []>} : vector<64x16xbf16>, vector<64x16xbf16>, vector<64x64xf32> -> vector<64x64xf32>
    %201 = arith.addf %200, %11 : vector<64x64xf32>
    %cst_125 = arith.constant dense<0xFF800000> : vector<64xf32>
    %202 = vector.multi_reduction <maximumf>, %201, %cst_125 [1] : vector<64x64xf32> to vector<64xf32>
    %203 = vector.shape_cast %202 : vector<64xf32> to vector<64x1xf32>
    %204 = vector.broadcast %203 : vector<64x1xf32> to vector<64x64xf32>
    %205 = arith.subf %201, %204 : vector<64x64xf32>
    %206 = math.exp %205 : vector<64x64xf32>
    %cst_126 = arith.constant dense<0.000000e+00> : vector<64xf32>
    %207 = vector.multi_reduction <add>, %206, %cst_126 [1] : vector<64x64xf32> to vector<64xf32>
    %208 = vector.shape_cast %207 : vector<64xf32> to vector<64x1xf32>
    %209 = tpu.reciprocal %208 {approx = true} : vector<64x1xf32> -> vector<64x1xf32>
    %210 = vector.broadcast %209 : vector<64x1xf32> to vector<64x64xf32>
    %211 = arith.mulf %206, %210 : vector<64x64xf32>
    %212 = arith.truncf %211 : vector<64x64xf32> to vector<64x64xbf16>
    %213 = arith.truncf %195 : vector<64x16xf32> to vector<64x16xbf16>
    %cst_127 = arith.constant dense<0.000000e+00> : vector<64x16xf32>
    %214 = tpu.matmul %212, %213, %cst_127 {dimension_numbers = #tpu.dot_dimension_numbers<[1], [0], [0], [1], [0, 0, 1, 1], [], []>} : vector<64x64xbf16>, vector<64x16xbf16>, vector<64x16xf32> -> vector<64x16xf32>
    %215 = arith.truncf %214 : vector<64x16xf32> to vector<64x16xbf16>
    %c2_128 = arith.constant 2 : index
    %c0_129 = arith.constant 0 : index
    %c0_130 = arith.constant 0 : index
    %216 = vector.load %arg7[%c2_128, %c0_129, %c0_130] : memref<4x16x32xbf16, #tpu.memory_space<vmem>>, vector<1x16x32xbf16>
    %217 = vector.shape_cast %216 : vector<1x16x32xbf16> to vector<16x32xbf16>
    %cst_131 = arith.constant dense<0.000000e+00> : vector<64x32xf32>
    %218 = tpu.matmul %215, %217, %cst_131 {dimension_numbers = #tpu.dot_dimension_numbers<[1], [0], [0], [1], [0, 0, 1, 1], [], []>} : vector<64x16xbf16>, vector<16x32xbf16>, vector<64x32xf32> -> vector<64x32xf32>
    %c7 = arith.constant 7 : index
    %c0_132 = arith.constant 0 : index
    %c0_133 = arith.constant 0 : index
    %219 = vector.load %arg5[%c7, %c0_132, %c0_133] : memref<12x32x16xbf16, #tpu.memory_space<vmem>>, vector<1x32x16xbf16>
    %220 = vector.shape_cast %219 : vector<1x32x16xbf16> to vector<32x16xbf16>
    %cst_134 = arith.constant dense<0.000000e+00> : vector<64x16xf32>
    %221 = tpu.matmul %174, %220, %cst_134 {dimension_numbers = #tpu.dot_dimension_numbers<[1], [0], [0], [1], [0, 0, 1, 1], [], []>} : vector<64x32xbf16>, vector<32x16xbf16>, vector<64x16xf32> -> vector<64x16xf32>
    %c7_135 = arith.constant 7 : index
    %c0_136 = arith.constant 0 : index
    %c0_137 = arith.constant 0 : index
    %222 = vector.load %arg6[%c7_135, %c0_136, %c0_137] : memref<12x1x16xf32, #tpu.memory_space<vmem>>, vector<1x1x16xf32>
    %223 = vector.shape_cast %222 : vector<1x1x16xf32> to vector<1x16xf32>
    %224 = vector.broadcast %223 : vector<1x16xf32> to vector<64x16xf32>
    %225 = arith.addf %221, %224 : vector<64x16xf32>
    %c9 = arith.constant 9 : index
    %c0_138 = arith.constant 0 : index
    %c0_139 = arith.constant 0 : index
    %226 = vector.load %arg5[%c9, %c0_138, %c0_139] : memref<12x32x16xbf16, #tpu.memory_space<vmem>>, vector<1x32x16xbf16>
    %227 = vector.shape_cast %226 : vector<1x32x16xbf16> to vector<32x16xbf16>
    %cst_140 = arith.constant dense<0.000000e+00> : vector<64x16xf32>
    %228 = tpu.matmul %174, %227, %cst_140 {dimension_numbers = #tpu.dot_dimension_numbers<[1], [0], [0], [1], [0, 0, 1, 1], [], []>} : vector<64x32xbf16>, vector<32x16xbf16>, vector<64x16xf32> -> vector<64x16xf32>
    %c9_141 = arith.constant 9 : index
    %c0_142 = arith.constant 0 : index
    %c0_143 = arith.constant 0 : index
    %229 = vector.load %arg6[%c9_141, %c0_142, %c0_143] : memref<12x1x16xf32, #tpu.memory_space<vmem>>, vector<1x1x16xf32>
    %230 = vector.shape_cast %229 : vector<1x1x16xf32> to vector<1x16xf32>
    %231 = vector.broadcast %230 : vector<1x16xf32> to vector<64x16xf32>
    %232 = arith.addf %228, %231 : vector<64x16xf32>
    %c11 = arith.constant 11 : index
    %c0_144 = arith.constant 0 : index
    %c0_145 = arith.constant 0 : index
    %233 = vector.load %arg5[%c11, %c0_144, %c0_145] : memref<12x32x16xbf16, #tpu.memory_space<vmem>>, vector<1x32x16xbf16>
    %234 = vector.shape_cast %233 : vector<1x32x16xbf16> to vector<32x16xbf16>
    %cst_146 = arith.constant dense<0.000000e+00> : vector<64x16xf32>
    %235 = tpu.matmul %174, %234, %cst_146 {dimension_numbers = #tpu.dot_dimension_numbers<[1], [0], [0], [1], [0, 0, 1, 1], [], []>} : vector<64x32xbf16>, vector<32x16xbf16>, vector<64x16xf32> -> vector<64x16xf32>
    %c11_147 = arith.constant 11 : index
    %c0_148 = arith.constant 0 : index
    %c0_149 = arith.constant 0 : index
    %236 = vector.load %arg6[%c11_147, %c0_148, %c0_149] : memref<12x1x16xf32, #tpu.memory_space<vmem>>, vector<1x1x16xf32>
    %237 = vector.shape_cast %236 : vector<1x1x16xf32> to vector<1x16xf32>
    %238 = vector.broadcast %237 : vector<1x16xf32> to vector<64x16xf32>
    %239 = arith.addf %235, %238 : vector<64x16xf32>
    %cst_150 = arith.constant 2.500000e-01 : f32
    %240 = vector.broadcast %cst_150 : f32 to vector<64x16xf32>
    %241 = arith.mulf %225, %240 : vector<64x16xf32>
    %242 = arith.truncf %241 : vector<64x16xf32> to vector<64x16xbf16>
    %243 = arith.truncf %232 : vector<64x16xf32> to vector<64x16xbf16>
    %cst_151 = arith.constant dense<0.000000e+00> : vector<64x64xf32>
    %244 = tpu.matmul %242, %243, %cst_151 {dimension_numbers = #tpu.dot_dimension_numbers<[1], [1], [0], [0], [0, 0, 1, 0], [], []>} : vector<64x16xbf16>, vector<64x16xbf16>, vector<64x64xf32> -> vector<64x64xf32>
    %245 = arith.addf %244, %11 : vector<64x64xf32>
    %cst_152 = arith.constant dense<0xFF800000> : vector<64xf32>
    %246 = vector.multi_reduction <maximumf>, %245, %cst_152 [1] : vector<64x64xf32> to vector<64xf32>
    %247 = vector.shape_cast %246 : vector<64xf32> to vector<64x1xf32>
    %248 = vector.broadcast %247 : vector<64x1xf32> to vector<64x64xf32>
    %249 = arith.subf %245, %248 : vector<64x64xf32>
    %250 = math.exp %249 : vector<64x64xf32>
    %cst_153 = arith.constant dense<0.000000e+00> : vector<64xf32>
    %251 = vector.multi_reduction <add>, %250, %cst_153 [1] : vector<64x64xf32> to vector<64xf32>
    %252 = vector.shape_cast %251 : vector<64xf32> to vector<64x1xf32>
    %253 = tpu.reciprocal %252 {approx = true} : vector<64x1xf32> -> vector<64x1xf32>
    %254 = vector.broadcast %253 : vector<64x1xf32> to vector<64x64xf32>
    %255 = arith.mulf %250, %254 : vector<64x64xf32>
    %256 = arith.truncf %255 : vector<64x64xf32> to vector<64x64xbf16>
    %257 = arith.truncf %239 : vector<64x16xf32> to vector<64x16xbf16>
    %cst_154 = arith.constant dense<0.000000e+00> : vector<64x16xf32>
    %258 = tpu.matmul %256, %257, %cst_154 {dimension_numbers = #tpu.dot_dimension_numbers<[1], [0], [0], [1], [0, 0, 1, 1], [], []>} : vector<64x64xbf16>, vector<64x16xbf16>, vector<64x16xf32> -> vector<64x16xf32>
    %259 = arith.truncf %258 : vector<64x16xf32> to vector<64x16xbf16>
    %c3_155 = arith.constant 3 : index
    %c0_156 = arith.constant 0 : index
    %c0_157 = arith.constant 0 : index
    %260 = vector.load %arg7[%c3_155, %c0_156, %c0_157] : memref<4x16x32xbf16, #tpu.memory_space<vmem>>, vector<1x16x32xbf16>
    %261 = vector.shape_cast %260 : vector<1x16x32xbf16> to vector<16x32xbf16>
    %cst_158 = arith.constant dense<0.000000e+00> : vector<64x32xf32>
    %262 = tpu.matmul %259, %261, %cst_158 {dimension_numbers = #tpu.dot_dimension_numbers<[1], [0], [0], [1], [0, 0, 1, 1], [], []>} : vector<64x16xbf16>, vector<16x32xbf16>, vector<64x32xf32> -> vector<64x32xf32>
    %263 = arith.addf %218, %262 : vector<64x32xf32>
    %c6_159 = arith.constant 6 : index
    %c0_160 = arith.constant 0 : index
    %c0_161 = arith.constant 0 : index
    %264 = vector.load %arg8[%c6_159, %c0_160, %c0_161] : memref<12x1x32xf32, #tpu.memory_space<vmem>>, vector<1x1x32xf32>
    %265 = vector.shape_cast %264 : vector<1x1x32xf32> to vector<1x32xf32>
    %266 = vector.broadcast %265 : vector<1x32xf32> to vector<64x32xf32>
    %267 = arith.addf %263, %266 : vector<64x32xf32>
    %268 = arith.addf %173, %267 : vector<64x32xf32>
    %c7_162 = arith.constant 7 : index
    %c0_163 = arith.constant 0 : index
    %c0_164 = arith.constant 0 : index
    %269 = vector.load %arg8[%c7_162, %c0_163, %c0_164] : memref<12x1x32xf32, #tpu.memory_space<vmem>>, vector<1x1x32xf32>
    %270 = vector.shape_cast %269 : vector<1x1x32xf32> to vector<1x32xf32>
    %c8_165 = arith.constant 8 : index
    %c0_166 = arith.constant 0 : index
    %c0_167 = arith.constant 0 : index
    %271 = vector.load %arg8[%c8_165, %c0_166, %c0_167] : memref<12x1x32xf32, #tpu.memory_space<vmem>>, vector<1x1x32xf32>
    %272 = vector.shape_cast %271 : vector<1x1x32xf32> to vector<1x32xf32>
    %cst_168 = arith.constant dense<0.000000e+00> : vector<64xf32>
    %273 = vector.multi_reduction <add>, %268, %cst_168 [1] : vector<64x32xf32> to vector<64xf32>
    %274 = vector.shape_cast %273 : vector<64xf32> to vector<64x1xf32>
    %cst_169 = arith.constant 3.200000e+01 : f32
    %275 = vector.broadcast %cst_169 : f32 to vector<64x1xf32>
    %276 = arith.divf %274, %275 : vector<64x1xf32>
    %277 = vector.broadcast %276 : vector<64x1xf32> to vector<64x32xf32>
    %278 = arith.subf %268, %277 : vector<64x32xf32>
    %279 = arith.mulf %278, %278 : vector<64x32xf32>
    %cst_170 = arith.constant dense<0.000000e+00> : vector<64xf32>
    %280 = vector.multi_reduction <add>, %279, %cst_170 [1] : vector<64x32xf32> to vector<64xf32>
    %281 = vector.shape_cast %280 : vector<64xf32> to vector<64x1xf32>
    %cst_171 = arith.constant 3.200000e+01 : f32
    %282 = vector.broadcast %cst_171 : f32 to vector<64x1xf32>
    %283 = arith.divf %281, %282 : vector<64x1xf32>
    %cst_172 = arith.constant 9.99999974E-6 : f32
    %284 = vector.broadcast %cst_172 : f32 to vector<64x1xf32>
    %285 = arith.addf %283, %284 : vector<64x1xf32>
    %286 = math.rsqrt %285 : vector<64x1xf32>
    %287 = vector.broadcast %286 : vector<64x1xf32> to vector<64x32xf32>
    %288 = arith.mulf %278, %287 : vector<64x32xf32>
    %289 = vector.broadcast %270 : vector<1x32xf32> to vector<64x32xf32>
    %290 = arith.mulf %288, %289 : vector<64x32xf32>
    %291 = vector.broadcast %272 : vector<1x32xf32> to vector<64x32xf32>
    %292 = arith.addf %290, %291 : vector<64x32xf32>
    %293 = arith.truncf %292 : vector<64x32xf32> to vector<64x32xbf16>
    %c1_173 = arith.constant 1 : index
    %c0_174 = arith.constant 0 : index
    %c0_175 = arith.constant 0 : index
    %294 = vector.load %arg9[%c1_173, %c0_174, %c0_175] : memref<2x32x64xbf16, #tpu.memory_space<vmem>>, vector<1x32x64xbf16>
    %295 = vector.shape_cast %294 : vector<1x32x64xbf16> to vector<32x64xbf16>
    %cst_176 = arith.constant dense<0.000000e+00> : vector<64x64xf32>
    %296 = tpu.matmul %293, %295, %cst_176 {dimension_numbers = #tpu.dot_dimension_numbers<[1], [0], [0], [1], [0, 0, 1, 1], [], []>} : vector<64x32xbf16>, vector<32x64xbf16>, vector<64x64xf32> -> vector<64x64xf32>
    %c1_177 = arith.constant 1 : index
    %c0_178 = arith.constant 0 : index
    %c0_179 = arith.constant 0 : index
    %297 = vector.load %arg10[%c1_177, %c0_178, %c0_179] : memref<2x1x64xf32, #tpu.memory_space<vmem>>, vector<1x1x64xf32>
    %298 = vector.shape_cast %297 : vector<1x1x64xf32> to vector<1x64xf32>
    %299 = vector.broadcast %298 : vector<1x64xf32> to vector<64x64xf32>
    %300 = arith.addf %296, %299 : vector<64x64xf32>
    %cst_180 = arith.constant 0.000000e+00 : f32
    %301 = vector.broadcast %cst_180 : f32 to vector<64x64xf32>
    %302 = arith.maximumf %300, %301 : vector<64x64xf32>
    %303 = arith.truncf %302 : vector<64x64xf32> to vector<64x64xbf16>
    %c1_181 = arith.constant 1 : index
    %c0_182 = arith.constant 0 : index
    %c0_183 = arith.constant 0 : index
    %304 = vector.load %arg11[%c1_181, %c0_182, %c0_183] : memref<2x64x32xbf16, #tpu.memory_space<vmem>>, vector<1x64x32xbf16>
    %305 = vector.shape_cast %304 : vector<1x64x32xbf16> to vector<64x32xbf16>
    %cst_184 = arith.constant dense<0.000000e+00> : vector<64x32xf32>
    %306 = tpu.matmul %303, %305, %cst_184 {dimension_numbers = #tpu.dot_dimension_numbers<[1], [0], [0], [1], [0, 0, 1, 1], [], []>} : vector<64x64xbf16>, vector<64x32xbf16>, vector<64x32xf32> -> vector<64x32xf32>
    %c9_185 = arith.constant 9 : index
    %c0_186 = arith.constant 0 : index
    %c0_187 = arith.constant 0 : index
    %307 = vector.load %arg8[%c9_185, %c0_186, %c0_187] : memref<12x1x32xf32, #tpu.memory_space<vmem>>, vector<1x1x32xf32>
    %308 = vector.shape_cast %307 : vector<1x1x32xf32> to vector<1x32xf32>
    %309 = vector.broadcast %308 : vector<1x32xf32> to vector<64x32xf32>
    %310 = arith.addf %306, %309 : vector<64x32xf32>
    %311 = arith.addf %292, %310 : vector<64x32xf32>
    %c10_188 = arith.constant 10 : index
    %c0_189 = arith.constant 0 : index
    %c0_190 = arith.constant 0 : index
    %312 = vector.load %arg8[%c10_188, %c0_189, %c0_190] : memref<12x1x32xf32, #tpu.memory_space<vmem>>, vector<1x1x32xf32>
    %313 = vector.shape_cast %312 : vector<1x1x32xf32> to vector<1x32xf32>
    %c11_191 = arith.constant 11 : index
    %c0_192 = arith.constant 0 : index
    %c0_193 = arith.constant 0 : index
    %314 = vector.load %arg8[%c11_191, %c0_192, %c0_193] : memref<12x1x32xf32, #tpu.memory_space<vmem>>, vector<1x1x32xf32>
    %315 = vector.shape_cast %314 : vector<1x1x32xf32> to vector<1x32xf32>
    %cst_194 = arith.constant dense<0.000000e+00> : vector<64xf32>
    %316 = vector.multi_reduction <add>, %311, %cst_194 [1] : vector<64x32xf32> to vector<64xf32>
    %317 = vector.shape_cast %316 : vector<64xf32> to vector<64x1xf32>
    %cst_195 = arith.constant 3.200000e+01 : f32
    %318 = vector.broadcast %cst_195 : f32 to vector<64x1xf32>
    %319 = arith.divf %317, %318 : vector<64x1xf32>
    %320 = vector.broadcast %319 : vector<64x1xf32> to vector<64x32xf32>
    %321 = arith.subf %311, %320 : vector<64x32xf32>
    %322 = arith.mulf %321, %321 : vector<64x32xf32>
    %cst_196 = arith.constant dense<0.000000e+00> : vector<64xf32>
    %323 = vector.multi_reduction <add>, %322, %cst_196 [1] : vector<64x32xf32> to vector<64xf32>
    %324 = vector.shape_cast %323 : vector<64xf32> to vector<64x1xf32>
    %cst_197 = arith.constant 3.200000e+01 : f32
    %325 = vector.broadcast %cst_197 : f32 to vector<64x1xf32>
    %326 = arith.divf %324, %325 : vector<64x1xf32>
    %cst_198 = arith.constant 9.99999974E-6 : f32
    %327 = vector.broadcast %cst_198 : f32 to vector<64x1xf32>
    %328 = arith.addf %326, %327 : vector<64x1xf32>
    %329 = math.rsqrt %328 : vector<64x1xf32>
    %330 = vector.broadcast %329 : vector<64x1xf32> to vector<64x32xf32>
    %331 = arith.mulf %321, %330 : vector<64x32xf32>
    %332 = vector.broadcast %313 : vector<1x32xf32> to vector<64x32xf32>
    %333 = arith.mulf %331, %332 : vector<64x32xf32>
    %334 = vector.broadcast %315 : vector<1x32xf32> to vector<64x32xf32>
    %335 = arith.addf %333, %334 : vector<64x32xf32>
    %336 = arith.truncf %335 : vector<64x32xf32> to vector<64x32xbf16>
    %c0_199 = arith.constant 0 : index
    %c0_200 = arith.constant 0 : index
    %337 = vector.load %arg12[%c0_199, %c0_200] : memref<32x4xbf16, #tpu.memory_space<vmem>>, vector<32x4xbf16>
    %cst_201 = arith.constant dense<0.000000e+00> : vector<64x4xf32>
    %338 = tpu.matmul %336, %337, %cst_201 {dimension_numbers = #tpu.dot_dimension_numbers<[1], [0], [0], [1], [0, 0, 1, 1], [], []>} : vector<64x32xbf16>, vector<32x4xbf16>, vector<64x4xf32> -> vector<64x4xf32>
    %c0_202 = arith.constant 0 : index
    %c0_203 = arith.constant 0 : index
    %339 = vector.load %arg13[%c0_202, %c0_203] : memref<1x4xf32, #tpu.memory_space<vmem>>, vector<1x4xf32>
    %340 = vector.broadcast %339 : vector<1x4xf32> to vector<64x4xf32>
    %341 = arith.addf %338, %340 : vector<64x4xf32>
    %342 = vector.extract_strided_slice %341 {offsets = [0, 0], sizes = [64, 2], strides = [1, 1]} : vector<64x4xf32> to vector<64x2xf32>
    %cst_204 = arith.constant dense<0xFF800000> : vector<64xf32>
    %343 = vector.multi_reduction <maximumf>, %342, %cst_204 [1] : vector<64x2xf32> to vector<64xf32>
    %344 = vector.shape_cast %343 : vector<64xf32> to vector<64x1xf32>
    %345 = vector.broadcast %344 : vector<64x1xf32> to vector<64x2xf32>
    %346 = arith.subf %342, %345 : vector<64x2xf32>
    %347 = math.exp %346 : vector<64x2xf32>
    %cst_205 = arith.constant dense<0.000000e+00> : vector<64xf32>
    %348 = vector.multi_reduction <add>, %347, %cst_205 [1] : vector<64x2xf32> to vector<64xf32>
    %349 = vector.shape_cast %348 : vector<64xf32> to vector<64x1xf32>
    %350 = math.log %349 : vector<64x1xf32>
    %351 = vector.broadcast %350 : vector<64x1xf32> to vector<64x2xf32>
    %352 = arith.subf %346, %351 : vector<64x2xf32>
    %353 = vector.extract_strided_slice %341 {offsets = [0, 2], sizes = [64, 2], strides = [1, 1]} : vector<64x4xf32> to vector<64x2xf32>
    %354 = math.absf %353 : vector<64x2xf32>
    %cst_206 = arith.constant 1.000000e+00 : f32
    %355 = vector.broadcast %cst_206 : f32 to vector<64x2xf32>
    %356 = arith.addf %355, %354 : vector<64x2xf32>
    %357 = arith.divf %353, %356 : vector<64x2xf32>
    %cst_207 = arith.constant 1.000000e+00 : f32
    %358 = vector.broadcast %cst_207 : f32 to vector<64x2xf32>
    %359 = arith.addf %358, %357 : vector<64x2xf32>
    %cst_208 = arith.constant 6.28318548 : f32
    %360 = vector.broadcast %cst_208 : f32 to vector<64x2xf32>
    %361 = arith.mulf %360, %359 : vector<64x2xf32>
    %362 = tpu.concatenate %335, %352, %361 in 1 : vector<64x32xf32>, vector<64x2xf32>, vector<64x2xf32> -> vector<64x36xf32>
    %c0_209 = arith.constant 0 : index
    %c0_210 = arith.constant 0 : index
    %363 = vector.load %arg14[%c0_209, %c0_210] : memref<64x36xf32, #tpu.memory_space<vmem>>, vector<64x36xf32>
    tpu.vector_store %arg14[%c0_209, %c0_210], %362 {strides = array<i32>} : memref<64x36xf32, #tpu.memory_space<vmem>>, vector<64x36xf32>,
    return
  }
}

</mosaic_0001>

<bundles_post_ra>
// kernel: tqs_forward.1
= control target key start
LH: loop header
LB: loop body
LE: loop exit
PB: predicated region body
PF: predicated region fallthrough
CT: control target
= control target key end

     0   :  { %vm81_vm0 = vcmask 1042432   ;;  %vm82_vm1 = vcmask 1043456   ;;  %v5357_v1 = vmov 65535   ;;  %vm68_vm2 = vcmask 56320   ;;  %s6761_s3 = inlined_call_operand.vmem [shape: bf16[7,32], index: 3, kind: input, shape index: {}]   ;;  %s6762_s0 = inlined_call_operand.vmem [shape: f32[64,7], index: 0, kind: input, shape index: {}]   ;;  %s6763_s5 = inlined_call_operand.vmem [shape: bf16[12,32,16], index: 5, kind: input, shape index: {}]   ;;  %s6764_s4 = inlined_call_operand.vmem [shape: f32[1,32], index: 4, kind: input, shape index: {}]   ;;  %s6765_s1 = inlined_call_operand.vmem [shape: f32[64,32], index: 1, kind: input, shape index: {}]   ;;  %s6766_s6 = inlined_call_operand.vmem [shape: f32[12,1,16], index: 6, kind: input, shape index: {}]   ;;  %s6767_s2 = inlined_call_operand.vmem [shape: f32[64,64], index: 2, kind: input, shape index: {}]   ;;  %s6768_s7 = inlined_call_operand.vmem [shape: bf16[4,16,32], index: 7, kind: input, shape index: {}]   ;;  %s6769_s8 = inlined_call_operand.vmem [shape: f32[12,1,32], index: 8, kind: input, shape index: {}]   ;;  %s6770_s9 = inlined_call_operand.vmem [shape: bf16[2,32,64], index: 9, kind: input, shape index: {}]   ;;  %s6771_s11 = inlined_call_operand.vmem [shape: bf16[2,64,32], index: 11, kind: input, shape index: {}]   ;;  %s6772_s10 = inlined_call_operand.vmem [shape: f32[2,1,64], index: 10, kind: input, shape index: {}]   ;;  %s6773_s12 = inlined_call_operand.vmem [shape: bf16[32,4], index: 12, kind: input, shape index: {}]   ;;  %s6774_s13 = inlined_call_operand.vmem [shape: f32[1,4], index: 13, kind: input, shape index: {}]   ;;  %s6775_s14 = inlined_call_operand.vmem [shape: f32[64,36], index: 14, kind: output, shape index: {}]  }
   0x1   :  { %v60_v0 = vld [vmem:[%s6761_s3] sm:$0xf]  ;;  %v83_v2 = vsel %vm81_vm0, 4294967295, %v5357_v1  ;;  %v49_v4 = vld [vmem:[%s6762_s0 + $0x8] sm:$0xff]  ;;  %v50_v7 = vld [vmem:[%s6762_s0 + $0x10] sm:$0xff]  ;;  %vm212_vm3 = vcmask 261120  }
   0x2   :  { %v48_v3 = vld [vmem:[%s6762_s0] sm:$0xff]  ;;  %v84_v5 = vsel %vm82_vm1, %v83_v2, 0  ;;  %v51_v8 = vld [vmem:[%s6762_s0 + $0x18] sm:$0xff]  ;;  %v53_v11 = vld [vmem:[%s6762_s0 + $0x28] sm:$0xff]  ;;  %vm486_vm4 = vcmask 130048   ;;  %vm576_vm5 = vcmask 523264  }
   0x3   :  { %v56_v6 = vpack.c.bf16 %v49_v4, %v48_v3  ;;  %v86_v9 = vand.u32 %v84_v5, %v60_v0  ;;  %v52_v10 = vld [vmem:[%s6762_s0 + $0x20] sm:$0xff]  ;;  %v5067_v12 = vld [vmem:[%s6763_s5 + $0x28] sm:$0xff]   ;;  %v57_v13 = vpack.c.bf16 %v51_v8, %v50_v7  ;;  %v54_v15 = vld [vmem:[%s6762_s0 + $0x30] sm:$0xff]  ;;  %vm3950_vm6 = vcmask 15360  }
   0x4   :  { %v58_v14 = vpack.c.bf16 %v53_v11, %v52_v10  ;;  %v55_v16 = vld [vmem:[%s6762_s0 + $0x38] sm:$0xff]  ;;  %v5069_v18 = vld [vmem:[%s6763_s5 + $0x8] sm:$0xff]   ;;  %v5068_v19 = vld [vmem:[%s6763_s5 + $0x20] sm:$0xff]   ;;  %vm4167_vm7 = vcmask 277504   ;;  %vm4176_vm8 = vcmask 293888  }
   0x5   :  { %4661 = vmatprep.mubr.msk.bf16.mxu0 %vm68_vm2, %v56_v6  ;;  %4659 = vmatprep.subr.bf16.mxu0 %v86_v9  ;;  %v59_v17 = vpack.c.bf16 %v55_v16, %v54_v15  ;;  %v5070_v20 = vld [vmem:[%s6763_s5] sm:$0xff]   ;;  %v5071_v21 = vld [vmem:[%s6763_s5 + $0x48] sm:$0xff]   ;;  %v164_v32 = vld [vmem:[%s6765_s1 + $0x18] sm:$0xff] }
   0x6   :  { %4660 = vmatpush3.bf16.msra.mxu0 %v86_v9  ;;  %4669 = vmatprep.subr.bf16.mxu1 %v5069_v18  ;;  %v4189_v23 = vld [vmem:[%s6764_s4] ss:$0 sm:$0xff]  ;;  %v162_v36 = vld [vmem:[%s6765_s1 + $0x8] sm:$0xff]  ;;  %v163_v38 = vld [vmem:[%s6765_s1 + $0x10] sm:$0xff] }
   0x7   :  { %4681 = vmatprep.subr.bf16.mxu0 %v5067_v12  ;;  %4670 = vmatpush3.bf16.msra.mxu1 %v5069_v18  ;;  %v161_v35 = vld [vmem:[%s6765_s1] sm:$0xff]  ;;  %v168_v55 = vld [vmem:[%s6765_s1 + $0x38] sm:$0xff]  ;;  %v166_v59 = vld [vmem:[%s6765_s1 + $0x28] sm:$0xff] }
   0x8   :  { %4671 = vmatprep.subr.bf16.mxu1 %v5070_v20  ;;  %v5072_v52 = vld [vmem:[%s6763_s5 + $0x40] sm:$0xff]   ;;  %v167_v60 = vld [vmem:[%s6765_s1 + $0x30] sm:$0xff] }
   0x9   :  { %4662 = vmatmul.mubr.msk.bf16.vlgmr.msra.gmra.mxu0 %vm68_vm2, %v57_v13  ;;  %v165_v58 = vld [vmem:[%s6765_s1 + $0x20] sm:$0xff] }
   0xa   :  { %4665 = vmatprep.mubr.msk.bf16.mxu0 %vm68_vm2, %v58_v14  ;;  %4682 = vmatpush3.bf16.msra.mxu0 %v5067_v12  ;;  %v5571_v8 = vld [vmem:[%s6766_s6] ss:$0 sm:$0xff] }
   0xb   :  { %4683 = vmatprep.subr.bf16.mxu0 %v5068_v19  ;;  %4672 = vmatpush3.bf16.msra.mxu1 %v5070_v20 }
   0xc   :  { %4693 = vmatprep.subr.bf16.mxu1 %v5071_v21 }
   0xe   :  { %4684 = vmatpush3.bf16.msra.mxu0 %v5068_v19 }
  0x11   :  { %4666 = vmatmul.mubr.msk.bf16.gmra.mxu0 %vm68_vm2, %v59_v17 }
  0xc9   :  { %v4663_v22 = vpop.f32.mrf.mxu0 }
  0xca   :  { %v131_v26 = vadd.f32 %v4663_v22, %v4189_v23  ;;  %v4206_v22 = vld [vmem:[%s6766_s6 + $0x2] ss:$0 sm:$0xff] }
  0xcb   :  { %v122_v24 = vpop.f32.mrf.mxu0 }
  0xcc   :  { %v123_v25 = vadd.f32 %v4189_v23, %v122_v24  ;;  %v155_v34 = vmul.f32 5.656854, %v131_v26 }
  0xcd   :  { %v4664_v27 = vpop.f32.mrf.mxu0 }
  0xce   :  { %v134_v28 = vadd.f32 %v4664_v27, %v4189_v23  ;;  %v153_v30 = vmul.f32 5.656854, %v123_v25  ;;  %v5501_v45 = vadd.f32 %v163_v38, %v155_v34 }
  0xcf   :  { %v125_v29 = vpop.f32.mrf.mxu0 }
  0xd0   :  { %v156_v31 = vmul.f32 5.656854, %v134_v28  ;;  %v126_v33 = vadd.f32 %v4189_v23, %v125_v29  ;;  %v5497_v42 = vadd.f32 %v161_v35, %v153_v30 }
  0xd1   :  { %v4667_v37 = vpop.f32.mrf.mxu0 }
  0xd2   :  { %v154_v39 = vmul.f32 5.656854, %v126_v33  ;;  %v5495_v40 = vadd.f32 %v164_v32, %v156_v31  ;;  %v147_v46 = vadd.f32 %v4667_v37, %v4189_v23 }
  0xd3   :  { %v138_v41 = vpop.f32.mrf.mxu0 }
  0xd4   :  { %v5499_v43 = vadd.f32 %v162_v36, %v154_v39  ;;  %v139_v44 = vadd.f32 %v4189_v23, %v138_v41  ;;  %v5509_v50 = vpack.c.bf16 %v5495_v40, %v5501_v45  ;;  %v159_v57 = vmul.f32 5.656854, %v147_v46 }
  0xd5   :  { %v4668_v47 = vpop.f32.mrf.mxu0 }
  0xd6   :  { %v5505_v48 = vpack.c.bf16 %v5499_v43, %v5497_v42  ;;  %v150_v49 = vadd.f32 %v4668_v47, %v4189_v23  ;;  %v157_v53 = vmul.f32 5.656854, %v139_v44  ;;  %v5540_v1 = vadd.f32 %v167_v60, %v159_v57 }
  0xd7   :  { %v141_v51 = vpop.f32.mrf.mxu0 }
  0xd8   :  { %v160_v54 = vmul.f32 5.656854, %v150_v49  ;;  %v142_v56 = vadd.f32 %v4189_v23, %v141_v51  ;;  %4673 = vmatprep.mubr.msk.bf16.mxu1 %vm212_vm3, %v5505_v48  ;;  %4685 = vmatprep.mubr.msk.bf16.mxu0 %vm212_vm3, %v5505_v48  ;;  %v5536_v63 = vadd.f32 %v165_v58, %v157_v53  ;;  %v4218_v49 = vld [vmem:[%s6766_s6 + $0x4] ss:$0 sm:$0xff] }
  0xd9   :  { %4674 = vmatmul.mubr.msk.bf16.vlgmr.msra.gmra.mxu1 %vm212_vm3, %v5509_v50  ;;  %4686 = vmatmul.mubr.msk.bf16.vlgmr.msra.gmra.mxu0 %vm212_vm3, %v5509_v50 }
  0xda   :  { %v158_v61 = vmul.f32 5.656854, %v142_v56  ;;  %4694 = vmatpush3.bf16.msra.mxu1 %v5071_v21  ;;  %v5534_v62 = vadd.f32 %v168_v55, %v160_v54 }
  0xdb   :  { %4695 = vmatprep.subr.bf16.mxu1 %v5072_v52 }
  0xdc   :  { %v5538_v0 = vadd.f32 %v166_v59, %v158_v61  ;;  %v5548_v3 = vpack.c.bf16 %v5534_v62, %v5540_v1 }
  0xde   :  { %v5544_v2 = vpack.c.bf16 %v5538_v0, %v5536_v63  ;;  %4696 = vmatpush3.bf16.msra.mxu1 %v5072_v52 }
  0xe0   :  { %4677 = vmatprep.mubr.msk.bf16.mxu1 %vm212_vm3, %v5544_v2  ;;  %4689 = vmatprep.mubr.msk.bf16.mxu0 %vm212_vm3, %v5544_v2 }
  0xe1   :  { %4678 = vmatmul.mubr.msk.bf16.gmra.mxu1 %vm212_vm3, %v5548_v3  ;;  %4690 = vmatmul.mubr.msk.bf16.gmra.mxu0 %vm212_vm3, %v5548_v3 }
  0xe2   :  { %4697 = vmatprep.mubr.msk.bf16.mxu1 %vm212_vm3, %v5505_v48 }
  0xe9   :  { %4698 = vmatmul.mubr.msk.bf16.vlgmr.msra.gmra.mxu1 %vm212_vm3, %v5509_v50 }
  0xea   :  { %4701 = vmatprep.mubr.msk.bf16.mxu1 %vm212_vm3, %v5544_v2 }
  0xf1   :  { %4702 = vmatmul.mubr.msk.bf16.gmra.mxu1 %vm212_vm3, %v5548_v3 }
 0x199   :  { %v5566_v4 = vpop.f32.mrf.mxu1  ;;  %v4687_v5 = vpop.f32.mrf.mxu0 }
 0x19a   :  { %v358_v39 = vadd.f32 %v4687_v5, %v4206_v22 }
 0x19b   :  { %v259_v6 = vpop.f32.mrf.mxu1  ;;  %v349_v7 = vpop.f32.mrf.mxu0 }
 0x19c   :  { %v260_v11 = vadd.f32 %v5571_v8, %v259_v6  ;;  %v350_v59 = vadd.f32 %v4206_v22, %v349_v7 }
 0x19d   :  { %v5573_v9 = vpop.f32.mrf.mxu1  ;;  %v4688_v10 = vpop.f32.mrf.mxu0 }
 0x19e   :  { %v470_v17 = vmul.f32 0.25, %v260_v11  ;;  %v361_v37 = vadd.f32 %v4688_v10, %v4206_v22  ;;  %v271_v7 = vadd.f32 %v5573_v9, %v5571_v8 }
 0x19f   :  { %v262_v12 = vpop.f32.mrf.mxu1  ;;  %v352_v13 = vpop.f32.mrf.mxu0 }
 0x1a0   :  { %v263_v14 = vadd.f32 %v5571_v8, %v262_v12  ;;  %v483_v44 = vpack.c.bf16 %v361_v37, %v358_v39  ;;  %v353_v54 = vadd.f32 %v4206_v22, %v352_v13 }
 0x1a1   :  { %v5577_v15 = vpop.f32.mrf.mxu1  ;;  %v4691_v16 = vpop.f32.mrf.mxu0 }
 0x1a2   :  { %v471_v18 = vmul.f32 0.25, %v263_v14  ;;  %v374_v25 = vadd.f32 %v4691_v16, %v4206_v22  ;;  %v482_v5 = vpack.c.bf16 %v353_v54, %v350_v59  ;;  %v503_v6 = vsel %vm486_vm4, %v483_v44, 0  ;;  %v5073_v14 = vld [vmem:[%s6763_s5 + $0x38] sm:$0xff]  }
 0x1a3   :  { %v5579_v19 = vpop.f32.mrf.mxu1  ;;  %v365_v20 = vpop.f32.mrf.mxu0 }
 0x1a4   :  { %v478_v21 = vpack.c.bf16 %v471_v18, %v470_v17  ;;  %v366_v29 = vadd.f32 %v4206_v22, %v365_v20  ;;  %v268_v18 = vadd.f32 %v5566_v4, %v5571_v8  ;;  %v500_v20 = vsel %vm486_vm4, %v482_v5, 0  ;;  %v5074_v4 = vld [vmem:[%s6763_s5 + $0x30] sm:$0xff]  }
 0x1a5   :  { %v5584_v23 = vpop.f32.mrf.mxu1  ;;  %v4692_v24 = vpop.f32.mrf.mxu0 }
 0x1a6   :  { %v377_v26 = vadd.f32 %v4692_v24, %v4206_v22  ;;  %4713 = vmatprep.mubr.msk.bf16.mxu0 %vm486_vm4, %v478_v21  ;;  %v276_v21 = vadd.f32 %v5571_v8, %v5579_v19  ;;  %v472_v24 = vmul.f32 0.25, %v268_v18  ;;  %v284_v19 = vadd.f32 %v5577_v15, %v5571_v8 }
 0x1a7   :  { %v278_v27 = vpop.f32.mrf.mxu1  ;;  %v368_v28 = vpop.f32.mrf.mxu0 }
 0x1a8   :  { %v485_v30 = vpack.c.bf16 %v377_v26, %v374_v25  ;;  %v369_v31 = vadd.f32 %v4206_v22, %v368_v28  ;;  %v279_v16 = vadd.f32 %v5571_v8, %v278_v27  ;;  %v473_v22 = vmul.f32 0.25, %v271_v7 }
 0x1a9   :  { %v4699_v32 = vpop.f32.mrf.mxu1  ;;  %v474_v25 = vmul.f32 0.25, %v276_v21  ;;  %v287_v27 = vadd.f32 %v5584_v23, %v5571_v8  ;;  %v5629_v8 = vld [vmem:[%s6767_s2 + $0x10] sm:$0xff]  ;;  %v5634_v23 = vld [vmem:[%s6767_s2] sm:$0xff] }
 0x1aa   :  { %v484_v33 = vpack.c.bf16 %v369_v31, %v366_v29  ;;  %5049 = vmatprep.subr.msk.bf16.mxu0 %vm486_vm4, %v485_v30  ;;  %v509_v35 = vsel %vm486_vm4, %v485_v30, 0  ;;  %v448_v10 = vadd.f32 %v4699_v32, %v4218_v49  ;;  %v475_v9 = vmul.f32 0.25, %v279_v16 }
 0x1ab   :  { %v439_v34 = vpop.f32.mrf.mxu1  ;;  %4706 = vmatpush3.bf16.xpose.msra.mxu0 %v509_v35  ;;  %v479_v26 = vpack.c.bf16 %v473_v22, %v472_v24  ;;  %v477_v29 = vmul.f32 0.25, %v287_v27  ;;  %v476_v30 = vmul.f32 0.25, %v284_v19 }
 0x1ac   :  { %5050 = vmatprep.subr.msk.bf16.mxu0 %vm486_vm4, %v484_v33  ;;  %v506_v47 = vsel %vm486_vm4, %v484_v33, 0  ;;  %v440_v13 = vadd.f32 %v4218_v49, %v439_v34  ;;  %v480_v28 = vpack.c.bf16 %v475_v9, %v474_v25  ;;  %v5642_v34 = vld [vmem:[%s6767_s2 + $0x18] sm:$0xff] }
 0x1ad   :  { %v4700_v36 = vpop.f32.mrf.mxu1  ;;  %v481_v31 = vpack.c.bf16 %v477_v29, %v476_v30 }
 0x1ae   :  { %v451_v60 = vadd.f32 %v4700_v36, %v4218_v49 }
 0x1af   :  { %v442_v38 = vpop.f32.mrf.mxu1 }
 0x1b0   :  { %v670_v11 = vpack.c.bf16 %v451_v60, %v448_v10  ;;  %v443_v12 = vadd.f32 %v4218_v49, %v442_v38  ;;  %v5652_v38 = vld [vmem:[%s6767_s2 + $0x8] sm:$0xff]  ;;  %v5692_v60 = vld [vmem:[%s6767_s2 + $0x38] sm:$0xff] }
 0x1b1   :  { %v4703_v41 = vpop.f32.mrf.mxu1 }
 0x1b2   :  { %v464_v52 = vadd.f32 %v4703_v41, %v4218_v49  ;;  %v669_v17 = vpack.c.bf16 %v443_v12, %v440_v13 }
 0x1b3   :  { %v455_v46 = vpop.f32.mrf.mxu1  ;;  %4708 = vmatpush3.bf16.xpose.msra.mxu0 %v506_v47 }
 0x1b4   :  { %5051 = vmatprep.subr.msk.bf16.mxu0 %vm486_vm4, %v483_v44  ;;  %v456_v56 = vadd.f32 %v4218_v49, %v455_v46 }
 0x1b5   :  { %v4704_v51 = vpop.f32.mrf.mxu1 }
 0x1b6   :  { %v467_v53 = vadd.f32 %v4704_v51, %v4218_v49  ;;  %v5667_v51 = vld [vmem:[%s6767_s2 + $0x20] sm:$0xff] }
 0x1b7   :  { %v458_v55 = vpop.f32.mrf.mxu1 }
 0x1b8   :  { %v672_v57 = vpack.c.bf16 %v467_v53, %v464_v52  ;;  %v459_v58 = vadd.f32 %v4218_v49, %v458_v55  ;;  %v5674_v53 = vld [vmem:[%s6767_s2 + $0x30] sm:$0xff] }
 0x1ba   :  { %v671_v61 = vpack.c.bf16 %v459_v58, %v456_v56  ;;  %4721 = vmatprep.subr.bf16.mxu1 %v672_v57 }
 0x1bb   :  { %4722 = vmatpush3.bf16.msra.mxu1 %v672_v57  ;;  %4710 = vmatpush3.bf16.xpose.msra.mxu0 %v503_v6  ;;  %v5682_v57 = vld [vmem:[%s6767_s2 + $0x28] sm:$0xff] }
 0x1bc   :  { %4723 = vmatprep.subr.bf16.mxu1 %v671_v61  ;;  %5052 = vmatprep.subr.msk.bf16.mxu0 %vm486_vm4, %v482_v5 }
 0x1bf   :  { %4724 = vmatpush3.bf16.msra.mxu1 %v671_v61 }
 0x1c0   :  { %4725 = vmatprep.subr.bf16.mxu1 %v670_v11 }
 0x1c3   :  { %4726 = vmatpush3.bf16.msra.mxu1 %v670_v11  ;;  %4712 = vmatpush3.bf16.xpose.msra.mxu0 %v500_v20  ;;  %v4250_v20 = vld [vmem:[%s6766_s6 + $0x3] ss:$0 sm:$0xff] }
 0x1c4   :  { %4727 = vmatprep.subr.bf16.mxu1 %v669_v17  ;;  %4749 = vmatprep.subr.bf16.mxu0 %v5073_v14 }
 0x1c7   :  { %4728 = vmatpush3.bf16.msra.mxu1 %v669_v17 }
 0x1ca   :  { %4714 = vmatmul.mubr.msk.bf16.vlgmr.msra.gmra.mxu0 %vm486_vm4, %v479_v26 }
 0x1cb   :  { %4717 = vmatprep.mubr.msk.bf16.mxu0 %vm486_vm4, %v480_v28  ;;  %4750 = vmatpush3.bf16.msra.mxu0 %v5073_v14 }
 0x1cc   :  { %4751 = vmatprep.subr.bf16.mxu0 %v5074_v4 }
 0x1cf   :  { %4752 = vmatpush3.bf16.msra.mxu0 %v5074_v4 }
 0x1d2   :  { %4718 = vmatmul.mubr.msk.bf16.gmra.mxu0 %vm486_vm4, %v481_v31 }
 0x1d3   :  { %4753 = vmatprep.mubr.msk.bf16.mxu0 %vm212_vm3, %v5505_v48 }
 0x1da   :  { %4754 = vmatmul.mubr.msk.bf16.vlgmr.msra.gmra.mxu0 %vm212_vm3, %v5509_v50 }
 0x1db   :  { %4757 = vmatprep.mubr.msk.bf16.mxu0 %vm212_vm3, %v5544_v2 }
 0x1e2   :  { %4758 = vmatmul.mubr.msk.bf16.gmra.mxu0 %vm212_vm3, %v5548_v3 }
 0x28a   :  { %v4715_v15 = vpop.f32.mrf.mxu0 }
 0x28b   :  { %v5637_v32 = vadd.f32 %v4715_v15, %v5629_v8 }
 0x28c   :  { %v545_v33 = vpop.f32.mrf.mxu0 }
 0x28d   :  { %v5645_v35 = vadd.f32 %v545_v33, %v5634_v23  ;;  %v583_v36 = vsel %vm576_vm5, %v5637_v32, -inf }
 0x28e   :  { %584 = vmax.xlane.f32.xlu1 %v583_v36  ;;  %v4716_v37 = vpop.f32.mrf.mxu0 }
 0x28f   :  { %v5655_v39 = vadd.f32 %v4716_v37, %v5642_v34  ;;  %v577_v41 = vsel %vm576_vm5, %v5645_v35, -inf }
 0x290   :  { %v548_v44 = vpop.f32.mrf.mxu0  ;;  %578 = vmax.xlane.f32.xlu0 %v577_v41 }
 0x291   :  { %v5660_v46 = vadd.f32 %v548_v44, %v5652_v38  ;;  %v586_v47 = vsel %vm576_vm5, %v5655_v39, -inf }
 0x292   :  { %587 = vmax.xlane.f32.xlu1 %v586_v47  ;;  %v4719_v49 = vpop.f32.mrf.mxu0 }
 0x293   :  { %v580_v52 = vsel %vm576_vm5, %v5660_v46, -inf  ;;  %v5685_v58 = vadd.f32 %v4719_v49, %v5674_v53 }
 0x294   :  { %v561_v54 = vpop.f32.mrf.mxu0  ;;  %581 = vmax.xlane.f32.xlu0 %v580_v52 }
 0x295   :  { %v5677_v55 = vadd.f32 %v561_v54, %v5667_v51  ;;  %v595_v12 = vsel %vm576_vm5, %v5685_v58, -inf }
 0x296   :  { %v4720_v56 = vpop.f32.mrf.mxu0 }
 0x297   :  { %v589_v59 = vsel %vm576_vm5, %v5677_v55, -inf  ;;  %v5698_v10 = vadd.f32 %v4720_v56, %v5692_v60 }
 0x298   :  { %v564_v61 = vpop.f32.mrf.mxu0  ;;  %590 = vmax.xlane.f32.xlu0 %v589_v59 }
 0x299   :  { %v5695_v5 = vadd.f32 %v564_v61, %v5682_v57  ;;  %v598_v14 = vsel %vm576_vm5, %v5698_v10, -inf }
 0x29a   :  { %v4755_v6 = vpop.f32.mrf.mxu0 }
 0x29b   :  { %v592_v11 = vsel %vm576_vm5, %v5695_v5, -inf  ;;  %v914_v29 = vadd.f32 %v4755_v6, %v4250_v20 }
 0x29c   :  { %v905_v13 = vpop.f32.mrf.mxu0  ;;  %593 = vmax.xlane.f32.xlu1 %v592_v11  ;;  %596 = vmax.xlane.f32.xlu0 %v595_v12 }
 0x29d   :  { %v906_v33 = vadd.f32 %v4250_v20, %v905_v13 }
 0x29e   :  { %v4756_v7 = vpop.f32.mrf.mxu0 }
 0x29f   :  { %v917_v19 = vadd.f32 %v4756_v7, %v4250_v20 }
 0x2a0   :  { %v908_v16 = vpop.f32.mrf.mxu0  ;;  %599 = vmax.xlane.f32.xlu1 %v598_v14 }
 0x2a1   :  { %v1039_v30 = vpack.c.bf16 %v917_v19, %v914_v29  ;;  %v909_v15 = vadd.f32 %v4250_v20, %v908_v16 }
 0x2a2   :  { %v4759_v17 = vpop.f32.mrf.mxu0 }
 0x2a3   :  { %v930_v22 = vadd.f32 %v4759_v17, %v4250_v20  ;;  %v1038_v36 = vpack.c.bf16 %v909_v15, %v906_v33  ;;  %v1058_v37 = vsel %vm486_vm4, %v1039_v30, 0  ;;  %v5075_v33 = vld [vmem:[%s6763_s5 + $0x18] sm:$0xff]  }
 0x2a4   :  { %v921_v18 = vpop.f32.mrf.mxu0  ;;  %4737 = vmatprep.subr.bf16.mxu1 %v5075_v33 }
 0x2a5   :  { %v922_v25 = vadd.f32 %v4250_v20, %v921_v18  ;;  %v1055_v41 = vsel %vm486_vm4, %v1038_v36, 0 }
 0x2a6   :  { %v4760_v21 = vpop.f32.mrf.mxu0 }
 0x2a7   :  { %v933_v9 = vadd.f32 %v4760_v21, %v4250_v20 }
 0x2a8   :  { %v924_v24 = vpop.f32.mrf.mxu0 }
 0x2a9   :  { %v1041_v26 = vpack.c.bf16 %v933_v9, %v930_v22  ;;  %v925_v27 = vadd.f32 %v4250_v20, %v924_v24 }
 0x2ab   :  { %v1040_v4 = vpack.c.bf16 %v925_v27, %v922_v25  ;;  %5053 = vmatprep.subr.msk.bf16.mxu0 %vm486_vm4, %v1041_v26  ;;  %v1064_v28 = vsel %vm486_vm4, %v1041_v26, 0 }
 0x2ac   :  { %4774 = vmatpush3.bf16.xpose.msra.mxu0 %v1064_v28 }
 0x2ad   :  { %5054 = vmatprep.subr.msk.bf16.mxu0 %vm486_vm4, %v1040_v4  ;;  %v1061_v31 = vsel %vm486_vm4, %v1040_v4, 0 }
 0x2b4   :  { %4776 = vmatpush3.bf16.xpose.msra.mxu0 %v1061_v31 }
 0x2b5   :  { %5055 = vmatprep.subr.msk.bf16.mxu0 %vm486_vm4, %v1039_v30 }
 0x2bc   :  { %4778 = vmatpush3.bf16.xpose.msra.mxu0 %v1058_v37 }
 0x2bd   :  { %5056 = vmatprep.subr.msk.bf16.mxu0 %vm486_vm4, %v1038_v36 }
 0x2c4   :  { %4780 = vmatpush3.bf16.xpose.msra.mxu0 %v1055_v41 }
 0x317   :  { %v585_v44 = vpop.xlane.xlu1 %584 }
 0x318   :  { %v603_v47 = vsub.f32 %v5637_v32, %v585_v44 }
 0x319   :  { %v579_v49 = vpop.xlane.xlu0 %578 }
 0x31a   :  { %v601_v52 = vsub.f32 %v5645_v35, %v579_v49  ;;  %v613_v56 = vmul.f32 1.442695, %v603_v47 }
 0x31b   :  { %v588_v54 = vpop.xlane.xlu1 %587 }
 0x31c   :  { %v609_v59 = vmul.f32 1.442695, %v601_v52  ;;  %v604_v61 = vsub.f32 %v5655_v39, %v588_v54 }
 0x31d   :  { %v582_v6 = vpop.xlane.xlu0 %581 }
 0x31e   :  { %5109 = vpow2.f32 %v609_v59  ;;  %v602_v11 = vsub.f32 %v5660_v46, %v582_v6  ;;  %v615_v12 = vmul.f32 1.442695, %v604_v61 }
 0x31f   :  { %5111 = vpow2.f32 %v613_v56 }
 0x320   :  { %v611_v13 = vmul.f32 1.442695, %v602_v11 }
 0x321   :  { %v591_v7 = vpop.xlane.xlu0 %590 }
 0x322   :  { %5113 = vpow2.f32 %v611_v13  ;;  %v605_v14 = vsub.f32 %v5677_v55, %v591_v7 }
 0x323   :  { %5115 = vpow2.f32 %v615_v12 }
 0x324   :  { %v617_v32 = vmul.f32 1.442695, %v605_v14 }
 0x325   :  { %v594_v16 = vpop.xlane.xlu1 %593  ;;  %v597_v35 = vpop.xlane.xlu0 %596 }
 0x326   :  { %5117 = vpow2.f32 %v617_v32  ;;  %v606_v17 = vsub.f32 %v5695_v5, %v594_v16  ;;  %v607_v39 = vsub.f32 %v5685_v58, %v597_v35  ;;  %v5076_v35 = vld [vmem:[%s6763_s5 + $0x10] sm:$0xff]  }
 0x328   :  { %v619_v18 = vmul.f32 1.442695, %v606_v17  ;;  %v621_v20 = vmul.f32 1.442695, %v607_v39 }
 0x329   :  { %v600_v21 = vpop.xlane.xlu1 %599 }
 0x32a   :  { %5119 = vpow2.f32 %v619_v18  ;;  %v608_v46 = vsub.f32 %v5698_v10, %v600_v21 }
 0x32b   :  { %v5110_v22 = vpop.eup %5109  ;;  %5121 = vpow2.f32 %v621_v20 }
 0x32c   :  { %v623_v9 = vmul.f32 1.442695, %v608_v46  ;;  %v625_v55 = vsel %vm576_vm5, %v5110_v22, 0.0  ;;  %v5112_v24 = vpop.eup %5111  ;;  %v5077_v46 = vld [vmem:[%s6763_s5 + $0x58] sm:$0xff]  }
 0x32d   :  { %626 = vadd.xlane.f32.xlu0 %v625_v55  ;;  %v631_v26 = vsel %vm576_vm5, %v5112_v24, 0.0 }
 0x32e   :  { %5123 = vpow2.f32 %v623_v9 }
 0x32f   :  { %v5114_v25 = vpop.eup %5113 }
 0x330   :  { %v628_v5 = vsel %vm576_vm5, %v5114_v25, 0.0  ;;  %v5116_v58 = vpop.eup %5115 }
 0x331   :  { %632 = vadd.xlane.f32.xlu0 %v631_v26  ;;  %629 = vadd.xlane.f32.xlu1 %v628_v5  ;;  %v634_v4 = vsel %vm576_vm5, %v5116_v58, 0.0  ;;  %v5079_v26 = vld [vmem:[%s6768_s7] sm:$0xff]  }
 0x332   :  { %4815 = vmatprep.subr.bf16.mxu0 %v5079_v26 }
 0x333   :  { %v5118_v27 = vpop.eup %5117 }
 0x334   :  { %v637_v10 = vsel %vm576_vm5, %v5118_v27, 0.0 }
 0x335   :  { %635 = vadd.xlane.f32.xlu1 %v634_v4  ;;  %638 = vadd.xlane.f32.xlu0 %v637_v10 }
 0x337   :  { %v5120_v28 = vpop.eup %5119 }
 0x338   :  { %v5122_v19 = vpop.eup %5121  ;;  %v640_v29 = vsel %vm576_vm5, %v5120_v28, 0.0 }
 0x339   :  { %641 = vadd.xlane.f32.xlu1 %v640_v29  ;;  %v643_v30 = vsel %vm576_vm5, %v5122_v19, 0.0 }
 0x33a   :  { %644 = vadd.xlane.f32.xlu0 %v643_v30 }
 0x33b   :  { %v5124_v31 = vpop.eup %5123 }
 0x33c   :  { %v646_v15 = vsel %vm576_vm5, %v5124_v31, 0.0 }
 0x33d   :  { %647 = vadd.xlane.f32.xlu1 %v646_v15 }
 0x3b6   :  { %v627_v36 = vpop.xlane.xlu0 %626 }
 0x3b7   :  { %5125 = vrcp.f32 %v627_v36 }
 0x3ba   :  { %v630_v37 = vpop.xlane.xlu1 %629  ;;  %v633_v41 = vpop.xlane.xlu0 %632 }
 0x3bb   :  { %5127 = vrcp.f32 %v630_v37 }
 0x3bc   :  { %5129 = vrcp.f32 %v633_v41 }
 0x3be   :  { %v636_v44 = vpop.xlane.xlu1 %635  ;;  %v639_v47 = vpop.xlane.xlu0 %638 }
 0x3bf   :  { %5131 = vrcp.f32 %v636_v44 }
 0x3c0   :  { %5133 = vrcp.f32 %v639_v47 }
 0x3c2   :  { %v642_v49 = vpop.xlane.xlu1 %641 }
 0x3c3   :  { %5135 = vrcp.f32 %v642_v49  ;;  %v645_v52 = vpop.xlane.xlu0 %644 }
 0x3c4   :  { %5137 = vrcp.f32 %v645_v52  ;;  %v5126_v54 = vpop.eup %5125 }
 0x3c5   :  { %v657_v61 = vmul.f32 %v5126_v54, %v5110_v22 }
 0x3c6   :  { %v648_v56 = vpop.xlane.xlu1 %647 }
 0x3c7   :  { %5139 = vrcp.f32 %v648_v56 }
 0x3c8   :  { %v5128_v59 = vpop.eup %5127 }
 0x3c9   :  { %v658_v6 = vmul.f32 %v5128_v59, %v5114_v25  ;;  %v5130_v11 = vpop.eup %5129  ;;  %v5078_v25 = vld [vmem:[%s6763_s5 + $0x50] sm:$0xff]  }
 0x3ca   :  { %v659_v7 = vmul.f32 %v5130_v11, %v5112_v24 }
 0x3cb   :  { %v665_v12 = vpack.c.bf16 %v658_v6, %v657_v61 }
 0x3cc   :  { %v5132_v13 = vpop.eup %5131 }
 0x3cd   :  { %v660_v14 = vmul.f32 %v5132_v13, %v5116_v58  ;;  %4729 = vmatprep.mubr.msk.bf16.mxu1 %vm576_vm5, %v665_v12  ;;  %v5134_v32 = vpop.eup %5133 }
 0x3ce   :  { %v661_v39 = vmul.f32 %v5134_v32, %v5118_v27 }
 0x3cf   :  { %v666_v16 = vpack.c.bf16 %v660_v14, %v659_v7 }
 0x3d0   :  { %v5136_v17 = vpop.eup %5135 }
 0x3d1   :  { %4730 = vmatmul.mubr.msk.bf16.vlgmr.msra.gmra.mxu1 %vm576_vm5, %v666_v16  ;;  %v662_v18 = vmul.f32 %v5136_v17, %v5120_v28  ;;  %v5138_v20 = vpop.eup %5137 }
 0x3d2   :  { %4738 = vmatpush3.bf16.msra.mxu1 %v5075_v33  ;;  %v663_v9 = vmul.f32 %v5138_v20, %v5122_v19 }
 0x3d3   :  { %v667_v21 = vpack.c.bf16 %v662_v18, %v661_v39  ;;  %4739 = vmatprep.subr.bf16.mxu1 %v5076_v35 }
 0x3d4   :  { %v5140_v22 = vpop.eup %5139 }
 0x3d5   :  { %4733 = vmatprep.mubr.msk.bf16.mxu1 %vm576_vm5, %v667_v21  ;;  %v664_v55 = vmul.f32 %v5140_v22, %v5124_v31 }
 0x3d6   :  { %4740 = vmatpush3.bf16.msra.mxu1 %v5076_v35 }
 0x3d7   :  { %v668_v24 = vpack.c.bf16 %v664_v55, %v663_v9  ;;  %4761 = vmatprep.subr.bf16.mxu1 %v5077_v46 }
 0x3d9   :  { %4734 = vmatmul.mubr.msk.bf16.gmra.mxu1 %vm576_vm5, %v668_v24  ;;  %v4262_v24 = vld [vmem:[%s6766_s6 + $0x5] ss:$0 sm:$0xff] }
 0x3da   :  { %4741 = vmatprep.mubr.msk.bf16.mxu1 %vm212_vm3, %v5505_v48 }
 0x3e1   :  { %4742 = vmatmul.mubr.msk.bf16.vlgmr.msra.gmra.mxu1 %vm212_vm3, %v5509_v50 }
 0x3e2   :  { %4745 = vmatprep.mubr.msk.bf16.mxu1 %vm212_vm3, %v5544_v2  ;;  %4762 = vmatpush3.bf16.msra.mxu1 %v5077_v46 }
 0x3e3   :  { %4763 = vmatprep.subr.bf16.mxu1 %v5078_v25 }
 0x3e6   :  { %4764 = vmatpush3.bf16.msra.mxu1 %v5078_v25 }
 0x3e9   :  { %4746 = vmatmul.mubr.msk.bf16.gmra.mxu1 %vm212_vm3, %v5548_v3 }
 0x3ea   :  { %4765 = vmatprep.mubr.msk.bf16.mxu1 %vm212_vm3, %v5505_v48 }
 0x3f1   :  { %4766 = vmatmul.mubr.msk.bf16.vlgmr.msra.gmra.mxu1 %vm212_vm3, %v5509_v50 }
 0x3f2   :  { %4769 = vmatprep.mubr.msk.bf16.mxu1 %vm212_vm3, %v5544_v2 }
 0x3f9   :  { %4770 = vmatmul.mubr.msk.bf16.gmra.mxu1 %vm212_vm3, %v5548_v3  ;;  %v4238_v3 = vld [vmem:[%s6766_s6 + $0x1] ss:$0 sm:$0xff] }
 0x491   :  { %v4731_v5 = vpop.f32.mrf.mxu1 }
 0x493   :  { %v719_v58 = vpop.f32.mrf.mxu1 }
 0x495   :  { %v4732_v27 = vpop.f32.mrf.mxu1 }
 0x496   :  { %v751_v55 = vpack.c.bf16 %v4732_v27, %v4731_v5 }
 0x497   :  { %v722_v4 = vpop.f32.mrf.mxu1 }
 0x498   :  { %v750_v21 = vpack.c.bf16 %v722_v4, %v719_v58 }
 0x499   :  { %v5768_v10 = vpop.f32.mrf.mxu1 }
 0x49b   :  { %v735_v48 = vpop.f32.mrf.mxu1 }
 0x49d   :  { %v5770_v28 = vpop.f32.mrf.mxu1 }
 0x49e   :  { %v753_v27 = vpack.c.bf16 %v5770_v28, %v5768_v10 }
 0x49f   :  { %v738_v50 = vpop.f32.mrf.mxu1 }
 0x4a1   :  { %v4743_v19 = vpop.f32.mrf.mxu1 }
 0x4a2   :  { %v824_v15 = vadd.f32 %v4743_v19, %v4238_v3 }
 0x4a3   :  { %v815_v2 = vpop.f32.mrf.mxu1 }
 0x4a4   :  { %v816_v30 = vadd.f32 %v4238_v3, %v815_v2  ;;  %v1028_v49 = vmul.f32 0.25, %v824_v15 }
 0x4a5   :  { %v4744_v29 = vpop.f32.mrf.mxu1 }
 0x4a6   :  { %v827_v31 = vadd.f32 %v4744_v29, %v4238_v3  ;;  %v1026_v44 = vmul.f32 0.25, %v816_v30 }
 0x4a7   :  { %v818_v33 = vpop.f32.mrf.mxu1 }
 0x4a8   :  { %v819_v36 = vadd.f32 %v4238_v3, %v818_v33  ;;  %v1029_v37 = vmul.f32 0.25, %v827_v31 }
 0x4a9   :  { %v4747_v41 = vpop.f32.mrf.mxu1 }
 0x4aa   :  { %v1027_v47 = vmul.f32 0.25, %v819_v36  ;;  %v1035_v56 = vpack.c.bf16 %v1029_v37, %v1028_v49  ;;  %v840_v11 = vadd.f32 %v4747_v41, %v4238_v3 }
 0x4ab   :  { %v831_v52 = vpop.f32.mrf.mxu1 }
 0x4ac   :  { %v1034_v54 = vpack.c.bf16 %v1027_v47, %v1026_v44  ;;  %v832_v61 = vadd.f32 %v4238_v3, %v831_v52  ;;  %v1032_v35 = vmul.f32 0.25, %v840_v11 }
 0x4ad   :  { %v4748_v59 = vpop.f32.mrf.mxu1 }
 0x4ae   :  { %v843_v6 = vadd.f32 %v4748_v59, %v4238_v3  ;;  %4781 = vmatprep.mubr.msk.bf16.mxu0 %vm486_vm4, %v1034_v54  ;;  %v1030_v32 = vmul.f32 0.25, %v832_v61 }
 0x4af   :  { %v834_v12 = vpop.f32.mrf.mxu1  ;;  %4782 = vmatmul.mubr.msk.bf16.vlgmr.msra.gmra.mxu0 %vm486_vm4, %v1035_v56 }
 0x4b0   :  { %v835_v13 = vadd.f32 %v4238_v3, %v834_v12  ;;  %4816 = vmatpush3.bf16.msra.mxu0 %v5079_v26  ;;  %v1033_v7 = vmul.f32 0.25, %v843_v6  ;;  %v752_v26 = vpack.c.bf16 %v738_v50, %v735_v48 }
 0x4b1   :  { %v4767_v14 = vpop.f32.mrf.mxu1 }
 0x4b2   :  { %v1031_v16 = vmul.f32 0.25, %v835_v13  ;;  %v1037_v18 = vpack.c.bf16 %v1033_v7, %v1032_v35  ;;  %v1004_v5 = vadd.f32 %v4767_v14, %v4262_v24 }
 0x4b3   :  { %v995_v17 = vpop.f32.mrf.mxu1 }
 0x4b4   :  { %v1036_v39 = vpack.c.bf16 %v1031_v16, %v1030_v32  ;;  %v996_v15 = vadd.f32 %v4262_v24, %v995_v17 }
 0x4b5   :  { %v4768_v20 = vpop.f32.mrf.mxu1 }
 0x4b6   :  { %4785 = vmatprep.mubr.msk.bf16.mxu0 %vm486_vm4, %v1036_v39  ;;  %v1007_v30 = vadd.f32 %v4768_v20, %v4262_v24 }
 0x4b7   :  { %v998_v46 = vpop.f32.mrf.mxu1  ;;  %4786 = vmatmul.mubr.msk.bf16.gmra.mxu0 %vm486_vm4, %v1037_v18 }
 0x4b8   :  { %4817 = vmatprep.mubr.msk.bf16.mxu0 %vm486_vm4, %v750_v21  ;;  %v1224_v48 = vpack.c.bf16 %v1007_v30, %v1004_v5  ;;  %v999_v50 = vadd.f32 %v4262_v24, %v998_v46 }
 0x4b9   :  { %v4771_v22 = vpop.f32.mrf.mxu1 }
 0x4ba   :  { %v1020_v19 = vadd.f32 %v4771_v22, %v4262_v24  ;;  %v1223_v33 = vpack.c.bf16 %v999_v50, %v996_v15 }
 0x4bb   :  { %v1011_v9 = vpop.f32.mrf.mxu1 }
 0x4bc   :  { %v1012_v58 = vadd.f32 %v4262_v24, %v1011_v9 }
 0x4bd   :  { %v4772_v25 = vpop.f32.mrf.mxu1 }
 0x4be   :  { %v1023_v2 = vadd.f32 %v4772_v25, %v4262_v24 }
 0x4bf   :  { %v1014_v3 = vpop.f32.mrf.mxu1  ;;  %4818 = vmatmul.mubr.msk.bf16.vlgmr.msra.gmra.mxu0 %vm486_vm4, %v751_v55 }
 0x4c0   :  { %v1226_v4 = vpack.c.bf16 %v1023_v2, %v1020_v19  ;;  %v1015_v29 = vadd.f32 %v4262_v24, %v1014_v3  ;;  %4821 = vmatprep.mubr.msk.bf16.mxu0 %vm486_vm4, %v752_v26 }
 0x4c2   :  { %v1225_v31 = vpack.c.bf16 %v1015_v29, %v1012_v58  ;;  %4789 = vmatprep.subr.bf16.mxu1 %v1226_v4 }
 0x4c3   :  { %4790 = vmatpush3.bf16.msra.mxu1 %v1226_v4 }
 0x4c4   :  { %4791 = vmatprep.subr.bf16.mxu1 %v1225_v31 }
 0x4c7   :  { %4792 = vmatpush3.bf16.msra.mxu1 %v1225_v31  ;;  %4822 = vmatmul.mubr.msk.bf16.gmra.mxu0 %vm486_vm4, %v753_v27 }
 0x4c8   :  { %4793 = vmatprep.subr.bf16.mxu1 %v1224_v48 }
 0x4cb   :  { %4794 = vmatpush3.bf16.msra.mxu1 %v1224_v48 }
 0x4cc   :  { %4795 = vmatprep.subr.bf16.mxu1 %v1223_v33 }
 0x4cf   :  { %4796 = vmatpush3.bf16.msra.mxu1 %v1223_v33 }
 0x56f   :  { %v4783_v36 = vpop.f32.mrf.mxu0 }
 0x570   :  { %v1109_v47 = vadd.f32 %v4783_v36, %v5629_v8 }
 0x571   :  { %v1100_v37 = vpop.f32.mrf.mxu0 }
 0x572   :  { %v1101_v41 = vadd.f32 %v1100_v37, %v5634_v23  ;;  %v1137_v59 = vsel %vm576_vm5, %v1109_v47, -inf }
 0x573   :  { %v4784_v44 = vpop.f32.mrf.mxu0 }
 0x574   :  { %v1131_v10 = vsel %vm576_vm5, %v1101_v41, -inf  ;;  %v1112_v54 = vadd.f32 %v4784_v44, %v5642_v34 }
 0x575   :  { %v1103_v28 = vpop.f32.mrf.mxu0  ;;  %1132 = vmax.xlane.f32.xlu0 %v1131_v10 }
 0x576   :  { %v1104_v49 = vadd.f32 %v1103_v28, %v5652_v38  ;;  %v1140_v11 = vsel %vm576_vm5, %v1112_v54, -inf }
 0x577   :  { %v4787_v52 = vpop.f32.mrf.mxu0 }
 0x578   :  { %v1134_v56 = vsel %vm576_vm5, %v1104_v49, -inf  ;;  %v1125_v8 = vadd.f32 %v4787_v52, %v5674_v53  ;;  %v5080_v52 = vld [vmem:[%s6768_s7 + $0x8] sm:$0xff]  }
 0x579   :  { %v1116_v61 = vpop.f32.mrf.mxu0  ;;  %1135 = vmax.xlane.f32.xlu1 %v1134_v56  ;;  %1138 = vmax.xlane.f32.xlu0 %v1137_v59 }
 0x57a   :  { %v1117_v23 = vadd.f32 %v1116_v61, %v5667_v51  ;;  %v1149_v14 = vsel %vm576_vm5, %v1125_v8, -inf  ;;  %4805 = vmatprep.subr.bf16.mxu1 %v5080_v52 }
 0x57b   :  { %v4788_v6 = vpop.f32.mrf.mxu0 }
 0x57c   :  { %v1143_v12 = vsel %vm576_vm5, %v1117_v23, -inf  ;;  %v1128_v13 = vadd.f32 %v4788_v6, %v5692_v60 }
 0x57d   :  { %v1119_v38 = vpop.f32.mrf.mxu0  ;;  %1141 = vmax.xlane.f32.xlu1 %v1140_v11  ;;  %1144 = vmax.xlane.f32.xlu0 %v1143_v12 }
 0x57e   :  { %v1120_v34 = vadd.f32 %v1119_v38, %v5682_v57  ;;  %v1152_v51 = vsel %vm576_vm5, %v1128_v13, -inf }
 0x580   :  { %v1146_v7 = vsel %vm576_vm5, %v1120_v34, -inf }
 0x581   :  { %1147 = vmax.xlane.f32.xlu1 %v1146_v7  ;;  %1150 = vmax.xlane.f32.xlu0 %v1149_v14 }
 0x585   :  { %1153 = vmax.xlane.f32.xlu1 %v1152_v51 }
 0x5fe   :  { %v1133_v53 = vpop.xlane.xlu0 %1132 }
 0x5ff   :  { %v1155_v32 = vsub.f32 %v1101_v41, %v1133_v53 }
 0x601   :  { %v1163_v16 = vmul.f32 1.442695, %v1155_v32 }
 0x602   :  { %v1136_v35 = vpop.xlane.xlu1 %1135  ;;  %v1139_v17 = vpop.xlane.xlu0 %1138 }
 0x603   :  { %5141 = vpow2.f32 %v1163_v16  ;;  %v1156_v39 = vsub.f32 %v1104_v49, %v1136_v35  ;;  %v1157_v18 = vsub.f32 %v1109_v47, %v1139_v17 }
 0x605   :  { %v1165_v57 = vmul.f32 1.442695, %v1156_v39  ;;  %v1167_v20 = vmul.f32 1.442695, %v1157_v18 }
 0x606   :  { %v1142_v60 = vpop.xlane.xlu1 %1141  ;;  %v1145_v21 = vpop.xlane.xlu0 %1144 }
 0x607   :  { %5143 = vpow2.f32 %v1165_v57  ;;  %v1158_v46 = vsub.f32 %v1112_v54, %v1142_v60  ;;  %v1159_v22 = vsub.f32 %v1117_v23, %v1145_v21 }
 0x608   :  { %5145 = vpow2.f32 %v1167_v20 }
 0x609   :  { %v1169_v9 = vmul.f32 1.442695, %v1158_v46  ;;  %v1171_v55 = vmul.f32 1.442695, %v1159_v22 }
 0x60a   :  { %v1148_v24 = vpop.xlane.xlu1 %1147  ;;  %v1151_v25 = vpop.xlane.xlu0 %1150 }
 0x60b   :  { %5147 = vpow2.f32 %v1169_v9  ;;  %v1160_v26 = vsub.f32 %v1120_v34, %v1148_v24  ;;  %v1161_v19 = vsub.f32 %v1125_v8, %v1151_v25 }
 0x60c   :  { %5149 = vpow2.f32 %v1171_v55 }
 0x60d   :  { %v1173_v2 = vmul.f32 1.442695, %v1160_v26  ;;  %v1175_v3 = vmul.f32 1.442695, %v1161_v19 }
 0x60e   :  { %v1154_v58 = vpop.xlane.xlu1 %1153 }
 0x60f   :  { %5151 = vpow2.f32 %v1173_v2  ;;  %v1162_v4 = vsub.f32 %v1128_v13, %v1154_v58 }
 0x610   :  { %v5142_v29 = vpop.eup %5141  ;;  %5153 = vpow2.f32 %v1175_v3 }
 0x611   :  { %v1177_v30 = vmul.f32 1.442695, %v1162_v4  ;;  %v1179_v31 = vsel %vm576_vm5, %v5142_v29, 0.0 }
 0x612   :  { %1180 = vadd.xlane.f32.xlu0 %v1179_v31  ;;  %v4819_v31 = vpop.f32.mrf.mxu0 }
 0x613   :  { %5155 = vpow2.f32 %v1177_v30 }
 0x614   :  { %v5144_v5 = vpop.eup %5143 }
 0x615   :  { %v5146_v27 = vpop.eup %5145  ;;  %v1182_v48 = vsel %vm576_vm5, %v5144_v5, 0.0 }
 0x616   :  { %1183 = vadd.xlane.f32.xlu1 %v1182_v48  ;;  %v1185_v50 = vsel %vm576_vm5, %v5146_v27, 0.0 }
 0x617   :  { %1186 = vadd.xlane.f32.xlu0 %v1185_v50 }
 0x618   :  { %v5148_v15 = vpop.eup %5147 }
 0x619   :  { %v5150_v33 = vpop.eup %5149  ;;  %v1188_v36 = vsel %vm576_vm5, %v5148_v15, 0.0 }
 0x61a   :  { %1189 = vadd.xlane.f32.xlu1 %v1188_v36  ;;  %v1191_v37 = vsel %vm576_vm5, %v5150_v33, 0.0 }
 0x61b   :  { %1192 = vadd.xlane.f32.xlu0 %v1191_v37 }
 0x61c   :  { %v5152_v41 = vpop.eup %5151 }
 0x61d   :  { %v5154_v44 = vpop.eup %5153  ;;  %v1194_v47 = vsel %vm576_vm5, %v5152_v41, 0.0 }
 0x61e   :  { %1195 = vadd.xlane.f32.xlu1 %v1194_v47  ;;  %v1197_v10 = vsel %vm576_vm5, %v5154_v44, 0.0 }
 0x61f   :  { %1198 = vadd.xlane.f32.xlu0 %v1197_v10 }
 0x620   :  { %v5156_v28 = vpop.eup %5155 }
 0x621   :  { %v1200_v49 = vsel %vm576_vm5, %v5156_v28, 0.0 }
 0x622   :  { %1201 = vadd.xlane.f32.xlu1 %v1200_v49 }
 0x69b   :  { %v1181_v54 = vpop.xlane.xlu0 %1180 }
 0x69c   :  { %5157 = vrcp.f32 %v1181_v54 }
 0x69f   :  { %v1184_v56 = vpop.xlane.xlu1 %1183 }
 0x6a0   :  { %5159 = vrcp.f32 %v1184_v56  ;;  %v1187_v59 = vpop.xlane.xlu0 %1186 }
 0x6a1   :  { %5161 = vrcp.f32 %v1187_v59 }
 0x6a3   :  { %v1190_v61 = vpop.xlane.xlu1 %1189 }
 0x6a4   :  { %5163 = vrcp.f32 %v1190_v61  ;;  %v1193_v23 = vpop.xlane.xlu0 %1192 }
 0x6a5   :  { %5165 = vrcp.f32 %v1193_v23 }
 0x6a7   :  { %v1196_v6 = vpop.xlane.xlu1 %1195 }
 0x6a8   :  { %5167 = vrcp.f32 %v1196_v6  ;;  %v1199_v8 = vpop.xlane.xlu0 %1198 }
 0x6a9   :  { %5169 = vrcp.f32 %v1199_v8  ;;  %v5158_v11 = vpop.eup %5157 }
 0x6aa   :  { %v1211_v34 = vmul.f32 %v5158_v11, %v5142_v29 }
 0x6ab   :  { %v1202_v12 = vpop.xlane.xlu1 %1201 }
 0x6ac   :  { %5171 = vrcp.f32 %v1202_v12 }
 0x6ad   :  { %v5160_v38 = vpop.eup %5159 }
 0x6ae   :  { %v1212_v13 = vmul.f32 %v5160_v38, %v5144_v5  ;;  %v5162_v7 = vpop.eup %5161  ;;  %v1446_v5 = vpop.f32.mrf.mxu0 }
 0x6af   :  { %v1213_v53 = vmul.f32 %v5162_v7, %v5146_v27 }
 0x6b0   :  { %v1219_v14 = vpack.c.bf16 %v1212_v13, %v1211_v34  ;;  %v4820_v27 = vpop.f32.mrf.mxu0 }
 0x6b1   :  { %v5164_v51 = vpop.eup %5163 }
 0x6b2   :  { %v1214_v32 = vmul.f32 %v5164_v51, %v5148_v15  ;;  %4797 = vmatprep.mubr.msk.bf16.mxu1 %vm576_vm5, %v1219_v14  ;;  %v5166_v16 = vpop.eup %5165  ;;  %v1449_v48 = vpop.f32.mrf.mxu0 }
 0x6b3   :  { %v1215_v39 = vmul.f32 %v5166_v16, %v5150_v33  ;;  %v4289_v33 = vld [vmem:[%s6769_s8] ss:$0 sm:$0xff] }
 0x6b4   :  { %v1220_v35 = vpack.c.bf16 %v1214_v32, %v1213_v53  ;;  %v4823_v36 = vpop.f32.mrf.mxu0 }
 0x6b5   :  { %v5168_v17 = vpop.eup %5167 }
 0x6b6   :  { %4798 = vmatmul.mubr.msk.bf16.vlgmr.msra.gmra.mxu1 %vm576_vm5, %v1220_v35  ;;  %v1216_v18 = vmul.f32 %v5168_v17, %v5152_v41  ;;  %v5170_v57 = vpop.eup %5169  ;;  %v1462_v49 = vpop.f32.mrf.mxu0 }
 0x6b7   :  { %4806 = vmatpush3.bf16.msra.mxu1 %v5080_v52  ;;  %v1217_v21 = vmul.f32 %v5170_v57, %v5154_v44 }
 0x6b8   :  { %v1221_v20 = vpack.c.bf16 %v1216_v18, %v1215_v39  ;;  %v4824_v12 = vpop.f32.mrf.mxu0 }
 0x6b9   :  { %v5172_v60 = vpop.eup %5171 }
 0x6ba   :  { %4801 = vmatprep.mubr.msk.bf16.mxu1 %vm576_vm5, %v1221_v20  ;;  %v1218_v46 = vmul.f32 %v5172_v60, %v5156_v28  ;;  %v1465_v16 = vpop.f32.mrf.mxu0 }
 0x6bc   :  { %v1222_v22 = vpack.c.bf16 %v1218_v46, %v1217_v21 }
 0x6be   :  { %4802 = vmatmul.mubr.msk.bf16.gmra.mxu1 %vm576_vm5, %v1222_v22 }
 0x776   :  { %v4799_v9 = vpop.f32.mrf.mxu1 }
 0x778   :  { %v1273_v55 = vpop.f32.mrf.mxu1 }
 0x77a   :  { %v4800_v24 = vpop.f32.mrf.mxu1 }
 0x77b   :  { %v1305_v19 = vpack.c.bf16 %v4800_v24, %v4799_v9 }
 0x77c   :  { %v1276_v25 = vpop.f32.mrf.mxu1 }
 0x77d   :  { %v1304_v26 = vpack.c.bf16 %v1276_v25, %v1273_v55 }
 0x77e   :  { %v4803_v2 = vpop.f32.mrf.mxu1 }
 0x77f   :  { %4807 = vmatprep.mubr.msk.bf16.mxu1 %vm486_vm4, %v1304_v26 }
 0x780   :  { %v1289_v3 = vpop.f32.mrf.mxu1  ;;  %4808 = vmatmul.mubr.msk.bf16.vlgmr.msra.gmra.mxu1 %vm486_vm4, %v1305_v19 }
 0x782   :  { %v4804_v58 = vpop.f32.mrf.mxu1 }
 0x783   :  { %v1307_v30 = vpack.c.bf16 %v4804_v58, %v4803_v2 }
 0x784   :  { %v1292_v4 = vpop.f32.mrf.mxu1 }
 0x785   :  { %v1306_v29 = vpack.c.bf16 %v1292_v4, %v1289_v3 }
 0x787   :  { %4811 = vmatprep.mubr.msk.bf16.mxu1 %vm486_vm4, %v1306_v29 }
 0x788   :  { %4812 = vmatmul.mubr.msk.bf16.gmra.mxu1 %vm486_vm4, %v1307_v30 }
 0x840   :  { %v4809_v50 = vpop.f32.mrf.mxu1 }
 0x841   :  { %v1455_v15 = vadd.f32 %v4819_v31, %v4809_v50 }
 0x842   :  { %v1363_v37 = vpop.f32.mrf.mxu1 }
 0x843   :  { %v1447_v41 = vadd.f32 %v1446_v5, %v1363_v37  ;;  %v1486_v44 = vadd.f32 %v4289_v33, %v1455_v15 }
 0x844   :  { %v4810_v47 = vpop.f32.mrf.mxu1 }
 0x845   :  { %v1484_v10 = vadd.f32 %v4289_v33, %v1447_v41  ;;  %v1458_v28 = vadd.f32 %v4820_v27, %v4810_v47  ;;  %v1494_v23 = vadd.f32 %v1486_v44, %v5501_v45 }
 0x846   :  { %v1366_v52 = vpop.f32.mrf.mxu1 }
 0x847   :  { %v1450_v54 = vadd.f32 %v1449_v48, %v1366_v52  ;;  %v1492_v56 = vadd.f32 %v1484_v10, %v5497_v42  ;;  %v1487_v59 = vadd.f32 %v4289_v33, %v1458_v28  ;;  %v1510_v14 = vsel %vm212_vm3, %v1494_v23, 0.0 }
 0x848   :  { %v4813_v61 = vpop.f32.mrf.mxu1 }
 0x849   :  { %v1485_v6 = vadd.f32 %v4289_v33, %v1450_v54  ;;  %v1471_v8 = vadd.f32 %v4823_v36, %v4813_v61  ;;  %v1504_v11 = vsel %vm212_vm3, %v1492_v56, 0.0  ;;  %v1495_v51 = vadd.f32 %v1487_v59, %v5495_v40 }
 0x84a   :  { %1505 = vadd.xlane.f32.xlu0 %v1504_v11  ;;  %v1379_v38 = vpop.f32.mrf.mxu1 }
 0x84b   :  { %v1463_v34 = vadd.f32 %v1462_v49, %v1379_v38  ;;  %v1493_v13 = vadd.f32 %v1485_v6, %v5499_v43  ;;  %v1490_v42 = vadd.f32 %v4289_v33, %v1471_v8  ;;  %v1513_v18 = vsel %vm212_vm3, %v1495_v51, 0.0  ;;  %v5081_v38 = vld [vmem:[%s6770_s9 + $0x8] sm:$0xff]  }
 0x84c   :  { %v4814_v7 = vpop.f32.mrf.mxu1  ;;  %4825 = vmatprep.subr.bf16.mxu1 %v5081_v38 }
 0x84d   :  { %v1488_v53 = vadd.f32 %v4289_v33, %v1463_v34  ;;  %v1474_v32 = vadd.f32 %v4824_v12, %v4814_v7  ;;  %v1507_v45 = vsel %vm212_vm3, %v1493_v13, 0.0  ;;  %v1498_v40 = vadd.f32 %v1490_v42, %v5540_v1  ;;  %4826 = vmatpush3.bf16.msra.mxu1 %v5081_v38  ;;  %v5082_v34 = vld [vmem:[%s6770_s9] sm:$0xff]  }
 0x84e   :  { %1511 = vadd.xlane.f32.xlu0 %v1510_v14  ;;  %1508 = vadd.xlane.f32.xlu1 %v1507_v45  ;;  %v1382_v35 = vpop.f32.mrf.mxu1 }
 0x84f   :  { %v1466_v17 = vadd.f32 %v1465_v16, %v1382_v35  ;;  %v1496_v39 = vadd.f32 %v1488_v53, %v5536_v63  ;;  %v1491_v43 = vadd.f32 %v4289_v33, %v1474_v32  ;;  %v1522_v46 = vsel %vm212_vm3, %v1498_v40, 0.0  ;;  %4827 = vmatprep.subr.bf16.mxu1 %v5082_v34 }
 0x851   :  { %v1489_v57 = vadd.f32 %v4289_v33, %v1466_v17  ;;  %v1516_v20 = vsel %vm212_vm3, %v1496_v39, 0.0  ;;  %v1499_v22 = vadd.f32 %v1491_v43, %v5534_v62  ;;  %4828 = vmatpush3.bf16.msra.mxu1 %v5082_v34 }
 0x852   :  { %1514 = vadd.xlane.f32.xlu1 %v1513_v18  ;;  %1517 = vadd.xlane.f32.xlu0 %v1516_v20 }
 0x853   :  { %v1497_v60 = vadd.f32 %v1489_v57, %v5538_v0  ;;  %v1525_v63 = vsel %vm212_vm3, %v1499_v22, 0.0 }
 0x855   :  { %v1519_v21 = vsel %vm212_vm3, %v1497_v60, 0.0 }
 0x856   :  { %1520 = vadd.xlane.f32.xlu1 %v1519_v21  ;;  %1523 = vadd.xlane.f32.xlu0 %v1522_v46 }
 0x85a   :  { %1526 = vadd.xlane.f32.xlu1 %v1525_v63 }
 0x8d3   :  { %v1506_v9 = vpop.xlane.xlu0 %1505 }
 0x8d4   :  { %v1529_v55 = vmul.f32 0.03125, %v1506_v9 }
 0x8d6   :  { %v5842_v24 = vsub.f32 %v1492_v56, %v1529_v55 }
 0x8d7   :  { %v1512_v1 = vpop.xlane.xlu0 %1511  ;;  %v1509_v25 = vpop.xlane.xlu1 %1508 }
 0x8d8   :  { %v1531_v26 = vmul.f32 0.03125, %v1512_v1  ;;  %v1530_v19 = vmul.f32 0.03125, %v1509_v25  ;;  %v1545_v0 = vmul.f32 %v5842_v24, %v5842_v24 }
 0x8da   :  { %v5846_v2 = vsub.f32 %v1494_v23, %v1531_v26  ;;  %v5848_v3 = vsub.f32 %v1493_v13, %v1530_v19  ;;  %v1553_v62 = vsel %vm212_vm3, %v1545_v0, 0.0  ;;  %v5083_v13 = vld [vmem:[%s6771_s11 + $0x18] sm:$0xff]   ;;  %v4292_v19 = vld [vmem:[%s6769_s8 + $0x1] ss:$0 sm:$0xff] }
 0x8db   :  { %v1515_v58 = vpop.xlane.xlu1 %1514  ;;  %1554 = vadd.xlane.f32.xlu0 %v1553_v62  ;;  %v1518_v4 = vpop.xlane.xlu0 %1517  ;;  %4837 = vmatprep.subr.bf16.mxu0 %v5083_v13 }
 0x8dc   :  { %v1532_v29 = vmul.f32 0.03125, %v1515_v58  ;;  %v1533_v30 = vmul.f32 0.03125, %v1518_v4  ;;  %v1546_v31 = vmul.f32 %v5848_v3, %v5848_v3  ;;  %v1547_v5 = vmul.f32 %v5846_v2, %v5846_v2  ;;  %4838 = vmatpush3.bf16.msra.mxu0 %v5083_v13  ;;  %v5085_v13 = vld [vmem:[%s6771_s11 + $0x8] sm:$0xff]  }
 0x8de   :  { %v5855_v27 = vsub.f32 %v1495_v51, %v1532_v29  ;;  %v5857_v48 = vsub.f32 %v1496_v39, %v1533_v30  ;;  %v1556_v50 = vsel %vm212_vm3, %v1546_v31, 0.0  ;;  %v1559_v15 = vsel %vm212_vm3, %v1547_v5, 0.0  ;;  %v4293_v30 = vld [vmem:[%s6769_s8 + $0x2] ss:$0 sm:$0xff] }
 0x8df   :  { %1557 = vadd.xlane.f32.xlu1 %v1556_v50  ;;  %v1521_v33 = vpop.xlane.xlu1 %1520  ;;  %1560 = vadd.xlane.f32.xlu0 %v1559_v15  ;;  %v1524_v36 = vpop.xlane.xlu0 %1523 }
 0x8e0   :  { %v1534_v37 = vmul.f32 0.03125, %v1521_v33  ;;  %v1535_v41 = vmul.f32 0.03125, %v1524_v36  ;;  %v1548_v44 = vmul.f32 %v5855_v27, %v5855_v27  ;;  %v1549_v47 = vmul.f32 %v5857_v48, %v5857_v48 }
 0x8e2   :  { %v5865_v10 = vsub.f32 %v1497_v60, %v1534_v37  ;;  %v5867_v28 = vsub.f32 %v1498_v40, %v1535_v41  ;;  %v1562_v49 = vsel %vm212_vm3, %v1548_v44, 0.0  ;;  %v1565_v52 = vsel %vm212_vm3, %v1549_v47, 0.0 }
 0x8e3   :  { %1563 = vadd.xlane.f32.xlu1 %v1562_v49  ;;  %v1527_v54 = vpop.xlane.xlu1 %1526  ;;  %1566 = vadd.xlane.f32.xlu0 %v1565_v52 }
 0x8e4   :  { %v1536_v56 = vmul.f32 0.03125, %v1527_v54  ;;  %v1550_v59 = vmul.f32 %v5865_v10, %v5865_v10  ;;  %v1551_v61 = vmul.f32 %v5867_v28, %v5867_v28 }
 0x8e6   :  { %v5875_v23 = vsub.f32 %v1499_v22, %v1536_v56  ;;  %v1568_v6 = vsel %vm212_vm3, %v1550_v59, 0.0  ;;  %v1571_v8 = vsel %vm212_vm3, %v1551_v61, 0.0 }
 0x8e7   :  { %1569 = vadd.xlane.f32.xlu1 %v1568_v6  ;;  %1572 = vadd.xlane.f32.xlu0 %v1571_v8 }
 0x8e8   :  { %v1552_v11 = vmul.f32 %v5875_v23, %v5875_v23 }
 0x8ea   :  { %v1574_v12 = vsel %vm212_vm3, %v1552_v11, 0.0 }
 0x8eb   :  { %1575 = vadd.xlane.f32.xlu1 %v1574_v12 }
 0x964   :  { %v1555_v7 = vpop.xlane.xlu0 %1554 }
 0x965   :  { %v1577_v14 = vmul.f32 0.03125, %v1555_v7  ;;  %v5086_v7 = vld [vmem:[%s6771_s11] sm:$0xff]  }
 0x967   :  { %v1585_v51 = vadd.f32 1e-05, %v1577_v14 }
 0x968   :  { %v1558_v42 = vpop.xlane.xlu1 %1557  ;;  %v1561_v53 = vpop.xlane.xlu0 %1560 }
 0x969   :  { %5173 = vrsqrt.f32 %v1585_v51  ;;  %v1578_v32 = vmul.f32 0.03125, %v1558_v42  ;;  %v1579_v45 = vmul.f32 0.03125, %v1561_v53  ;;  %v4294_v42 = vld [vmem:[%s6772_s10] ss:$0 sm:$0xff] }
 0x96b   :  { %v1586_v16 = vadd.f32 1e-05, %v1578_v32  ;;  %v1587_v35 = vadd.f32 1e-05, %v1579_v45 }
 0x96c   :  { %v1564_v17 = vpop.xlane.xlu1 %1563  ;;  %v1567_v39 = vpop.xlane.xlu0 %1566 }
 0x96d   :  { %5175 = vrsqrt.f32 %v1586_v16  ;;  %v1580_v18 = vmul.f32 0.03125, %v1564_v17  ;;  %v1581_v43 = vmul.f32 0.03125, %v1567_v39 }
 0x96e   :  { %5177 = vrsqrt.f32 %v1587_v35 }
 0x96f   :  { %v1588_v57 = vadd.f32 1e-05, %v1580_v18  ;;  %v1589_v20 = vadd.f32 1e-05, %v1581_v43 }
 0x970   :  { %v1570_v40 = vpop.xlane.xlu1 %1569  ;;  %v1573_v60 = vpop.xlane.xlu0 %1572 }
 0x971   :  { %5179 = vrsqrt.f32 %v1588_v57  ;;  %v1582_v21 = vmul.f32 0.03125, %v1570_v40  ;;  %v1583_v46 = vmul.f32 0.03125, %v1573_v60 }
 0x972   :  { %5181 = vrsqrt.f32 %v1589_v20 }
 0x973   :  { %v1590_v22 = vadd.f32 1e-05, %v1582_v21  ;;  %v1591_v63 = vadd.f32 1e-05, %v1583_v46 }
 0x974   :  { %v1576_v9 = vpop.xlane.xlu1 %1575 }
 0x975   :  { %5183 = vrsqrt.f32 %v1590_v22  ;;  %v1584_v55 = vmul.f32 0.03125, %v1576_v9 }
 0x976   :  { %v5174_v1 = vpop.eup %5173  ;;  %5185 = vrsqrt.f32 %v1591_v63 }
 0x977   :  { %v1592_v25 = vadd.f32 1e-05, %v1584_v55  ;;  %v1601_v26 = vmul.f32 %v5174_v1, %v5842_v24 }
 0x979   :  { %5187 = vrsqrt.f32 %v1592_v25  ;;  %v1615_v4 = vmul.f32 %v4292_v19, %v1601_v26 }
 0x97a   :  { %v5176_v0 = vpop.eup %5175 }
 0x97b   :  { %v5178_v62 = vpop.eup %5177  ;;  %v1602_v58 = vmul.f32 %v5176_v0, %v5848_v3  ;;  %v5901_v33 = vadd.f32 %v4293_v30, %v1615_v4 }
 0x97c   :  { %v1603_v29 = vmul.f32 %v5178_v62, %v5846_v2 }
 0x97d   :  { %v1616_v31 = vmul.f32 %v4292_v19, %v1602_v58 }
 0x97e   :  { %v5180_v5 = vpop.eup %5179  ;;  %v1617_v24 = vmul.f32 %v4292_v19, %v1603_v29  ;;  %v4302_v29 = vld [vmem:[%s6769_s8 + $0x3] ss:$0 sm:$0xff] }
 0x97f   :  { %v5182_v50 = vpop.eup %5181  ;;  %v1604_v15 = vmul.f32 %v5180_v5, %v5855_v27  ;;  %v5903_v36 = vadd.f32 %v4293_v30, %v1616_v31 }
 0x980   :  { %v1605_v37 = vmul.f32 %v5182_v50, %v5857_v48  ;;  %v5909_v47 = vadd.f32 %v4293_v30, %v1617_v24 }
 0x981   :  { %v1618_v3 = vmul.f32 %v4292_v19, %v1604_v15  ;;  %v1637_v2 = vpack.c.bf16 %v5903_v36, %v5901_v33 }
 0x982   :  { %v5184_v41 = vpop.eup %5183  ;;  %v1619_v52 = vmul.f32 %v4292_v19, %v1605_v37 }
 0x983   :  { %v5186_v44 = vpop.eup %5185  ;;  %4829 = vmatprep.mubr.msk.bf16.mxu1 %vm212_vm3, %v1637_v2  ;;  %v5911_v49 = vadd.f32 %v4293_v30, %v1618_v3  ;;  %v1606_v27 = vmul.f32 %v5184_v41, %v5865_v10 }
 0x984   :  { %v1607_v54 = vmul.f32 %v5186_v44, %v5867_v28  ;;  %v5918_v61 = vadd.f32 %v4293_v30, %v1619_v52 }
 0x985   :  { %v1638_v48 = vpack.c.bf16 %v5911_v49, %v5909_v47  ;;  %v1620_v56 = vmul.f32 %v4292_v19, %v1606_v27 }
 0x986   :  { %v5188_v59 = vpop.eup %5187  ;;  %v1621_v11 = vmul.f32 %v4292_v19, %v1607_v54 }
 0x987   :  { %4830 = vmatmul.mubr.msk.bf16.vlgmr.msra.gmra.mxu1 %vm212_vm3, %v1638_v48  ;;  %v5920_v6 = vadd.f32 %v4293_v30, %v1620_v56  ;;  %v1608_v8 = vmul.f32 %v5188_v59, %v5875_v23  ;;  %v5084_v23 = vld [vmem:[%s6771_s11 + $0x10] sm:$0xff]  }
 0x988   :  { %v5926_v28 = vadd.f32 %v4293_v30, %v1621_v11  ;;  %4839 = vmatprep.subr.bf16.mxu0 %v5084_v23 }
 0x989   :  { %v1639_v10 = vpack.c.bf16 %v5920_v6, %v5918_v61  ;;  %v1622_v12 = vmul.f32 %v4292_v19, %v1608_v8  ;;  %4840 = vmatpush3.bf16.msra.mxu0 %v5084_v23 }
 0x98a   :  { %4841 = vmatprep.subr.bf16.mxu0 %v5085_v13 }
 0x98b   :  { %4833 = vmatprep.mubr.msk.bf16.mxu1 %vm212_vm3, %v1639_v10  ;;  %v5928_v38 = vadd.f32 %v4293_v30, %v1622_v12 }
 0x98d   :  { %v1640_v34 = vpack.c.bf16 %v5928_v38, %v5926_v28  ;;  %4842 = vmatpush3.bf16.msra.mxu0 %v5085_v13 }
 0x98e   :  { %4843 = vmatprep.subr.bf16.mxu0 %v5086_v7 }
 0x98f   :  { %4834 = vmatmul.mubr.msk.bf16.gmra.mxu1 %vm212_vm3, %v1640_v34 }
 0x991   :  { %4844 = vmatpush3.bf16.msra.mxu0 %v5086_v7 }
 0xa47   :  { %v4831_v14 = vpop.f32.mrf.mxu1 }
 0xa48   :  { %v1719_v16 = vadd.f32 %v4831_v14, %v4294_v42 }
 0xa49   :  { %v1710_v51 = vpop.f32.mrf.mxu1 }
 0xa4a   :  { %v1711_v32 = vadd.f32 %v4294_v42, %v1710_v51  ;;  %v1743_v20 = vmax.f32 %v1719_v16, 0.0 }
 0xa4b   :  { %v4832_v53 = vpop.f32.mrf.mxu1 }
 0xa4c   :  { %v1722_v45 = vadd.f32 %v4832_v53, %v4294_v42  ;;  %v1741_v43 = vmax.f32 %v1711_v32, 0.0 }
 0xa4d   :  { %v1713_v35 = vpop.f32.mrf.mxu1 }
 0xa4e   :  { %v1714_v17 = vadd.f32 %v4294_v42, %v1713_v35  ;;  %v1744_v39 = vmax.f32 %v1722_v45, 0.0 }
 0xa4f   :  { %v4835_v18 = vpop.f32.mrf.mxu1 }
 0xa50   :  { %v1742_v57 = vmax.f32 %v1714_v17, 0.0  ;;  %v1750_v21 = vpack.c.bf16 %v1744_v39, %v1743_v20  ;;  %v1735_v9 = vadd.f32 %v4835_v18, %v4294_v42 }
 0xa51   :  { %v1726_v40 = vpop.f32.mrf.mxu1 }
 0xa52   :  { %v1749_v60 = vpack.c.bf16 %v1742_v57, %v1741_v43  ;;  %v1727_v22 = vadd.f32 %v4294_v42, %v1726_v40  ;;  %v1747_v0 = vmax.f32 %v1735_v9, 0.0 }
 0xa53   :  { %v4836_v46 = vpop.f32.mrf.mxu1 }
 0xa54   :  { %v1738_v63 = vadd.f32 %v4836_v46, %v4294_v42  ;;  %4845 = vmatprep.mubr.msk.bf16.mxu0 %vm576_vm5, %v1749_v60  ;;  %v1745_v26 = vmax.f32 %v1727_v22, 0.0 }
 0xa55   :  { %v1729_v55 = vpop.f32.mrf.mxu1  ;;  %4846 = vmatmul.mubr.msk.bf16.vlgmr.msra.gmra.mxu0 %vm576_vm5, %v1750_v21 }
 0xa56   :  { %v1730_v1 = vadd.f32 %v4294_v42, %v1729_v55  ;;  %v1748_v25 = vmax.f32 %v1738_v63, 0.0 }
 0xa58   :  { %v1746_v19 = vmax.f32 %v1730_v1, 0.0  ;;  %v1752_v58 = vpack.c.bf16 %v1748_v25, %v1747_v0 }
 0xa5a   :  { %v1751_v62 = vpack.c.bf16 %v1746_v19, %v1745_v26 }
 0xa5c   :  { %4849 = vmatprep.mubr.msk.bf16.mxu0 %vm576_vm5, %v1751_v62 }
 0xa5d   :  { %4850 = vmatmul.mubr.msk.bf16.gmra.mxu0 %vm576_vm5, %v1752_v58 }
 0xb15   :  { %v4847_v4 = vpop.f32.mrf.mxu0 }
 0xb16   :  { %v1848_v31 = vadd.f32 %v4847_v4, %v4302_v29 }
 0xb17   :  { %v1839_v30 = vpop.f32.mrf.mxu0 }
 0xb18   :  { %v1840_v5 = vadd.f32 %v4302_v29, %v1839_v30  ;;  %v1872_v41 = vadd.f32 %v1848_v31, %v5909_v47 }
 0xb19   :  { %v4848_v50 = vpop.f32.mrf.mxu0 }
 0xb1a   :  { %v1870_v24 = vadd.f32 %v1840_v5, %v5901_v33  ;;  %v1851_v15 = vadd.f32 %v4848_v50, %v4302_v29  ;;  %v1888_v33 = vsel %vm212_vm3, %v1872_v41, 0.0 }
 0xb1b   :  { %v1842_v37 = vpop.f32.mrf.mxu0 }
 0xb1c   :  { %v1843_v3 = vadd.f32 %v4302_v29, %v1842_v37  ;;  %v1882_v2 = vsel %vm212_vm3, %v1870_v24, 0.0  ;;  %v1873_v54 = vadd.f32 %v1851_v15, %v5911_v49 }
 0xb1d   :  { %1883 = vadd.xlane.f32.xlu0 %v1882_v2  ;;  %v4851_v44 = vpop.f32.mrf.mxu0  ;;  %v5089_v2 = vld [vmem:[%s6763_s5 + $0x68] sm:$0xff]  }
 0xb1e   :  { %v1871_v27 = vadd.f32 %v1843_v3, %v5903_v36  ;;  %v1864_v48 = vadd.f32 %v4851_v44, %v4302_v29  ;;  %v1891_v47 = vsel %vm212_vm3, %v1873_v54, 0.0  ;;  %v5087_v3 = vld [vmem:[%s6763_s5 + $0x88] sm:$0xff]   ;;  %4853 = vmatprep.subr.bf16.mxu1 %v5089_v2  ;;  %v5090_v44 = vld [vmem:[%s6763_s5 + $0x60] sm:$0xff]  }
 0xb1f   :  { %v1855_v52 = vpop.f32.mrf.mxu0  ;;  %4865 = vmatprep.subr.bf16.mxu0 %v5087_v3  ;;  %4854 = vmatpush3.bf16.msra.mxu1 %v5089_v2 }
 0xb20   :  { %v1856_v56 = vadd.f32 %v4302_v29, %v1855_v52  ;;  %v1885_v59 = vsel %vm212_vm3, %v1871_v27, 0.0  ;;  %v1876_v49 = vadd.f32 %v1864_v48, %v5926_v28  ;;  %4866 = vmatpush3.bf16.msra.mxu0 %v5087_v3  ;;  %4855 = vmatprep.subr.bf16.mxu1 %v5090_v44 }
 0xb21   :  { %1886 = vadd.xlane.f32.xlu1 %v1885_v59  ;;  %1889 = vadd.xlane.f32.xlu0 %v1888_v33  ;;  %v4852_v8 = vpop.f32.mrf.mxu0 }
 0xb22   :  { %v1874_v11 = vadd.f32 %v1856_v56, %v5918_v61  ;;  %v1867_v12 = vadd.f32 %v4852_v8, %v4302_v29  ;;  %v1900_v7 = vsel %vm212_vm3, %v1876_v49, 0.0 }
 0xb23   :  { %v1858_v10 = vpop.f32.mrf.mxu0  ;;  %4856 = vmatpush3.bf16.msra.mxu1 %v5090_v44 }
 0xb24   :  { %v1859_v34 = vadd.f32 %v4302_v29, %v1858_v10  ;;  %v1894_v36 = vsel %vm212_vm3, %v1874_v11, 0.0  ;;  %v1877_v14 = vadd.f32 %v1867_v12, %v5928_v38 }
 0xb25   :  { %1892 = vadd.xlane.f32.xlu1 %v1891_v47  ;;  %1895 = vadd.xlane.f32.xlu0 %v1894_v36 }
 0xb26   :  { %v1875_v23 = vadd.f32 %v1859_v34, %v5920_v6  ;;  %v1903_v61 = vsel %vm212_vm3, %v1877_v14, 0.0 }
 0xb28   :  { %v1897_v13 = vsel %vm212_vm3, %v1875_v23, 0.0 }
 0xb29   :  { %1898 = vadd.xlane.f32.xlu1 %v1897_v13  ;;  %1901 = vadd.xlane.f32.xlu0 %v1900_v7 }
 0xb2d   :  { %1904 = vadd.xlane.f32.xlu1 %v1903_v61 }
 0xba6   :  { %v1884_v51 = vpop.xlane.xlu0 %1883 }
 0xba7   :  { %v1906_v42 = vmul.f32 0.03125, %v1884_v51 }
 0xba9   :  { %v5968_v53 = vsub.f32 %v1870_v24, %v1906_v42 }
 0xbaa   :  { %v1887_v28 = vpop.xlane.xlu1 %1886  ;;  %v1890_v32 = vpop.xlane.xlu0 %1889 }
 0xbab   :  { %v1907_v45 = vmul.f32 0.03125, %v1887_v28  ;;  %v1908_v16 = vmul.f32 0.03125, %v1890_v32  ;;  %v1922_v6 = vmul.f32 %v5968_v53, %v5968_v53 }
 0xbad   :  { %v5972_v35 = vsub.f32 %v1871_v27, %v1907_v45  ;;  %v5974_v17 = vsub.f32 %v1872_v41, %v1908_v16  ;;  %v1930_v38 = vsel %vm212_vm3, %v1922_v6, 0.0  ;;  %v5088_v41 = vld [vmem:[%s6763_s5 + $0x80] sm:$0xff]   ;;  %v6023_v27 = vld [vmem:[%s6763_s5 + $0xa8] sm:$0xff]  }
 0xbae   :  { %v1893_v39 = vpop.xlane.xlu1 %1892  ;;  %1931 = vadd.xlane.f32.xlu0 %v1930_v38  ;;  %v1896_v18 = vpop.xlane.xlu0 %1895  ;;  %4867 = vmatprep.subr.bf16.mxu0 %v5088_v41  ;;  %v4313_v38 = vld [vmem:[%s6769_s8 + $0x4] ss:$0 sm:$0xff] }
 0xbaf   :  { %v1909_v43 = vmul.f32 0.03125, %v1893_v39  ;;  %v1910_v57 = vmul.f32 0.03125, %v1896_v18  ;;  %v1923_v20 = vmul.f32 %v5972_v35, %v5972_v35  ;;  %v1924_v40 = vmul.f32 %v5974_v17, %v5974_v17  ;;  %4868 = vmatpush3.bf16.msra.mxu0 %v5088_v41  ;;  %4877 = vmatprep.subr.bf16.mxu1 %v6023_v27 }
 0xbb1   :  { %v5981_v60 = vsub.f32 %v1873_v54, %v1909_v43  ;;  %v5983_v21 = vsub.f32 %v1874_v11, %v1910_v57  ;;  %v1933_v46 = vsel %vm212_vm3, %v1923_v20, 0.0  ;;  %v1936_v22 = vsel %vm212_vm3, %v1924_v40, 0.0  ;;  %v4314_v40 = vld [vmem:[%s6769_s8 + $0x5] ss:$0 sm:$0xff] }
 0xbb2   :  { %1934 = vadd.xlane.f32.xlu1 %v1933_v46  ;;  %v1899_v63 = vpop.xlane.xlu1 %1898  ;;  %1937 = vadd.xlane.f32.xlu0 %v1936_v22  ;;  %v1902_v9 = vpop.xlane.xlu0 %1901 }
 0xbb3   :  { %v1911_v55 = vmul.f32 0.03125, %v1899_v63  ;;  %v1912_v1 = vmul.f32 0.03125, %v1902_v9  ;;  %v1925_v25 = vmul.f32 %v5981_v60, %v5981_v60  ;;  %v1926_v26 = vmul.f32 %v5983_v21, %v5983_v21 }
 0xbb5   :  { %v5991_v19 = vsub.f32 %v1875_v23, %v1911_v55  ;;  %v5993_v0 = vsub.f32 %v1876_v49, %v1912_v1  ;;  %v1939_v62 = vsel %vm212_vm3, %v1925_v25, 0.0  ;;  %v1942_v58 = vsel %vm212_vm3, %v1926_v26, 0.0 }
 0xbb6   :  { %1940 = vadd.xlane.f32.xlu1 %v1939_v62  ;;  %v1905_v4 = vpop.xlane.xlu1 %1904  ;;  %1943 = vadd.xlane.f32.xlu0 %v1942_v58 }
 0xbb7   :  { %v1913_v29 = vmul.f32 0.03125, %v1905_v4  ;;  %v1927_v30 = vmul.f32 %v5991_v19, %v5991_v19  ;;  %v1928_v31 = vmul.f32 %v5993_v0, %v5993_v0 }
 0xbb9   :  { %v6001_v5 = vsub.f32 %v1877_v14, %v1913_v29  ;;  %v1945_v50 = vsel %vm212_vm3, %v1927_v30, 0.0  ;;  %v1948_v24 = vsel %vm212_vm3, %v1928_v31, 0.0 }
 0xbba   :  { %1946 = vadd.xlane.f32.xlu1 %v1945_v50  ;;  %1949 = vadd.xlane.f32.xlu0 %v1948_v24 }
 0xbbb   :  { %v1929_v15 = vmul.f32 %v6001_v5, %v6001_v5 }
 0xbbd   :  { %v1951_v37 = vsel %vm212_vm3, %v1929_v15, 0.0 }
 0xbbe   :  { %1952 = vadd.xlane.f32.xlu1 %v1951_v37 }
 0xc37   :  { %v1932_v52 = vpop.xlane.xlu0 %1931 }
 0xc38   :  { %v1954_v54 = vmul.f32 0.03125, %v1932_v52 }
 0xc3a   :  { %v1962_v48 = vadd.f32 1e-05, %v1954_v54 }
 0xc3b   :  { %v1935_v56 = vpop.xlane.xlu1 %1934  ;;  %v1938_v59 = vpop.xlane.xlu0 %1937 }
 0xc3c   :  { %5189 = vrsqrt.f32 %v1962_v48  ;;  %v1955_v33 = vmul.f32 0.03125, %v1935_v56  ;;  %v1956_v8 = vmul.f32 0.03125, %v1938_v59  ;;  %v6105_v56 = vld [vmem:[%s6766_s6 + $0x6] ss:$0 sm:$0xff] }
 0xc3e   :  { %v1963_v11 = vadd.f32 1e-05, %v1955_v33  ;;  %v1964_v10 = vadd.f32 1e-05, %v1956_v8 }
 0xc3f   :  { %v1941_v47 = vpop.xlane.xlu1 %1940  ;;  %v1944_v12 = vpop.xlane.xlu0 %1943 }
 0xc40   :  { %5191 = vrsqrt.f32 %v1963_v11  ;;  %v1957_v34 = vmul.f32 0.03125, %v1941_v47  ;;  %v1958_v36 = vmul.f32 0.03125, %v1944_v12 }
 0xc41   :  { %5193 = vrsqrt.f32 %v1964_v10 }
 0xc42   :  { %v1965_v49 = vadd.f32 1e-05, %v1957_v34  ;;  %v1966_v23 = vadd.f32 1e-05, %v1958_v36 }
 0xc43   :  { %v1947_v13 = vpop.xlane.xlu1 %1946  ;;  %v1950_v7 = vpop.xlane.xlu0 %1949 }
 0xc44   :  { %5195 = vrsqrt.f32 %v1965_v49  ;;  %v1959_v14 = vmul.f32 0.03125, %v1947_v13  ;;  %v1960_v61 = vmul.f32 0.03125, %v1950_v7 }
 0xc45   :  { %5197 = vrsqrt.f32 %v1966_v23 }
 0xc46   :  { %v1967_v51 = vadd.f32 1e-05, %v1959_v14  ;;  %v1968_v42 = vadd.f32 1e-05, %v1960_v61  ;;  %v4332_v14 = vld [vmem:[%s6766_s6 + $0x8] ss:$0 sm:$0xff] }
 0xc47   :  { %v1953_v28 = vpop.xlane.xlu1 %1952 }
 0xc48   :  { %5199 = vrsqrt.f32 %v1967_v51  ;;  %v1961_v32 = vmul.f32 0.03125, %v1953_v28 }
 0xc49   :  { %v5190_v45 = vpop.eup %5189  ;;  %5201 = vrsqrt.f32 %v1968_v42 }
 0xc4a   :  { %v1978_v16 = vmul.f32 %v5190_v45, %v5968_v53  ;;  %v1969_v6 = vadd.f32 1e-05, %v1961_v32 }
 0xc4c   :  { %5203 = vrsqrt.f32 %v1969_v6  ;;  %v1992_v43 = vmul.f32 %v4313_v38, %v1978_v16 }
 0xc4d   :  { %v5192_v39 = vpop.eup %5191 }
 0xc4e   :  { %v5194_v18 = vpop.eup %5193  ;;  %v1979_v57 = vmul.f32 %v5192_v39, %v5972_v35  ;;  %v6036_v55 = vadd.f32 %v4314_v40, %v1992_v43 }
 0xc4f   :  { %v1980_v20 = vmul.f32 %v5194_v18, %v5974_v17 }
 0xc50   :  { %v1993_v46 = vmul.f32 %v4313_v38, %v1979_v57 }
 0xc51   :  { %v5196_v22 = vpop.eup %5195  ;;  %v1994_v63 = vmul.f32 %v4313_v38, %v1980_v20 }
 0xc52   :  { %v5198_v53 = vpop.eup %5197  ;;  %v1981_v9 = vmul.f32 %v5196_v22, %v5981_v60  ;;  %v6038_v1 = vadd.f32 %v4314_v40, %v1993_v46 }
 0xc53   :  { %v1982_v25 = vmul.f32 %v5198_v53, %v5983_v21  ;;  %v6050_v60 = vadd.f32 %v4314_v40, %v1994_v63 }
 0xc54   :  { %v1995_v26 = vmul.f32 %v4313_v38, %v1981_v9  ;;  %v6043_v35 = vpack.c.bf16 %v6038_v1, %v6036_v55 }
 0xc55   :  { %v5200_v17 = vpop.eup %5199  ;;  %v1996_v62 = vmul.f32 %v4313_v38, %v1982_v25 }
 0xc56   :  { %v5202_v58 = vpop.eup %5201  ;;  %v1983_v4 = vmul.f32 %v5200_v17, %v5991_v19  ;;  %4857 = vmatprep.mubr.msk.bf16.mxu1 %vm212_vm3, %v6043_v35  ;;  %4869 = vmatprep.mubr.msk.bf16.mxu0 %vm212_vm3, %v6043_v35  ;;  %v6052_v29 = vadd.f32 %v4314_v40, %v1995_v26  ;;  %v5092_v19 = vld [vmem:[%s6763_s5 + $0xa0] sm:$0xff]   ;;  %v4344_v26 = vld [vmem:[%s6766_s6 + $0xa] ss:$0 sm:$0xff] }
 0xc57   :  { %v1984_v21 = vmul.f32 %v5202_v58, %v5993_v0  ;;  %v6062_v24 = vadd.f32 %v4314_v40, %v1996_v62 }
 0xc58   :  { %v1997_v30 = vmul.f32 %v4313_v38, %v1983_v4  ;;  %v6057_v31 = vpack.c.bf16 %v6052_v29, %v6050_v60 }
 0xc59   :  { %v5204_v50 = vpop.eup %5203  ;;  %v1998_v15 = vmul.f32 %v4313_v38, %v1984_v21 }
 0xc5a   :  { %v1985_v37 = vmul.f32 %v5204_v50, %v6001_v5  ;;  %4858 = vmatmul.mubr.msk.bf16.vlgmr.msra.gmra.mxu1 %vm212_vm3, %v6057_v31  ;;  %4870 = vmatmul.mubr.msk.bf16.vlgmr.msra.gmra.mxu0 %vm212_vm3, %v6057_v31  ;;  %v6069_v0 = vadd.f32 %v4314_v40, %v1997_v30 }
 0xc5b   :  { %4878 = vmatpush3.bf16.msra.mxu1 %v6023_v27  ;;  %v6080_v5 = vadd.f32 %v4314_v40, %v1998_v15 }
 0xc5c   :  { %v1999_v3 = vmul.f32 %v4313_v38, %v1985_v37  ;;  %v6074_v2 = vpack.c.bf16 %v6069_v0, %v6062_v24  ;;  %4879 = vmatprep.subr.bf16.mxu1 %v5092_v19 }
 0xc5e   :  { %4861 = vmatprep.mubr.msk.bf16.mxu1 %vm212_vm3, %v6074_v2  ;;  %4873 = vmatprep.mubr.msk.bf16.mxu0 %vm212_vm3, %v6074_v2  ;;  %v6082_v41 = vadd.f32 %v4314_v40, %v1999_v3 }
 0xc5f   :  { %4880 = vmatpush3.bf16.msra.mxu1 %v5092_v19 }
 0xc60   :  { %v6086_v44 = vpack.c.bf16 %v6082_v41, %v6080_v5 }
 0xc62   :  { %4862 = vmatmul.mubr.msk.bf16.gmra.mxu1 %vm212_vm3, %v6086_v44  ;;  %4874 = vmatmul.mubr.msk.bf16.gmra.mxu0 %vm212_vm3, %v6086_v44 }
 0xc63   :  { %4881 = vmatprep.mubr.msk.bf16.mxu1 %vm212_vm3, %v6043_v35 }
 0xc6a   :  { %4882 = vmatmul.mubr.msk.bf16.vlgmr.msra.gmra.mxu1 %vm212_vm3, %v6057_v31 }
 0xc6b   :  { %4885 = vmatprep.mubr.msk.bf16.mxu1 %vm212_vm3, %v6074_v2 }
 0xc72   :  { %4886 = vmatmul.mubr.msk.bf16.gmra.mxu1 %vm212_vm3, %v6086_v44 }
 0xd1a   :  { %v6100_v27 = vpop.f32.mrf.mxu1  ;;  %v4871_v52 = vpop.f32.mrf.mxu0 }
 0xd1b   :  { %v2188_v22 = vadd.f32 %v4871_v52, %v4332_v14 }
 0xd1c   :  { %v2089_v54 = vpop.f32.mrf.mxu1  ;;  %v2179_v48 = vpop.f32.mrf.mxu0 }
 0xd1d   :  { %v2090_v8 = vadd.f32 %v6105_v56, %v2089_v54  ;;  %v2180_v15 = vadd.f32 %v4332_v14, %v2179_v48 }
 0xd1e   :  { %v6107_v59 = vpop.f32.mrf.mxu1  ;;  %v4872_v33 = vpop.f32.mrf.mxu0 }
 0xd1f   :  { %v2300_v36 = vmul.f32 0.25, %v2090_v8  ;;  %v2191_v40 = vadd.f32 %v4872_v33, %v4332_v14  ;;  %v2101_v48 = vadd.f32 %v6107_v59, %v6105_v56 }
 0xd20   :  { %v2092_v11 = vpop.f32.mrf.mxu1  ;;  %v2182_v10 = vpop.f32.mrf.mxu0 }
 0xd21   :  { %v2093_v47 = vadd.f32 %v6105_v56, %v2092_v11  ;;  %v2313_v63 = vpack.c.bf16 %v2191_v40, %v2188_v22  ;;  %v2183_v4 = vadd.f32 %v4332_v14, %v2182_v10 }
 0xd22   :  { %v6111_v12 = vpop.f32.mrf.mxu1  ;;  %v4875_v34 = vpop.f32.mrf.mxu0 }
 0xd23   :  { %v2301_v49 = vmul.f32 0.25, %v2093_v47  ;;  %v2204_v42 = vadd.f32 %v4875_v34, %v4332_v14  ;;  %v2312_v52 = vpack.c.bf16 %v2183_v4, %v2180_v15  ;;  %v2332_v54 = vsel %vm486_vm4, %v2313_v63, 0  ;;  %v5093_v47 = vld [vmem:[%s6763_s5 + $0x98] sm:$0xff]  }
 0xd24   :  { %v6113_v23 = vpop.f32.mrf.mxu1  ;;  %v2195_v13 = vpop.f32.mrf.mxu0 }
 0xd25   :  { %v2308_v7 = vpack.c.bf16 %v2301_v49, %v2300_v36  ;;  %v2196_v16 = vadd.f32 %v4332_v14, %v2195_v13  ;;  %v2098_v49 = vadd.f32 %v6100_v27, %v6105_v56  ;;  %v2329_v13 = vsel %vm486_vm4, %v2312_v52, 0  ;;  %v5094_v27 = vld [vmem:[%s6763_s5 + $0x90] sm:$0xff]  }
 0xd26   :  { %v6118_v61 = vpop.f32.mrf.mxu1  ;;  %v4876_v51 = vpop.f32.mrf.mxu0 }
 0xd27   :  { %v2207_v28 = vadd.f32 %v4876_v51, %v4332_v14  ;;  %4897 = vmatprep.mubr.msk.bf16.mxu0 %vm486_vm4, %v2308_v7  ;;  %v2106_v7 = vadd.f32 %v6105_v56, %v6113_v23  ;;  %v2302_v51 = vmul.f32 0.25, %v2098_v49  ;;  %v2114_v23 = vadd.f32 %v6111_v12, %v6105_v56 }
 0xd28   :  { %v2108_v32 = vpop.f32.mrf.mxu1  ;;  %v2198_v45 = vpop.f32.mrf.mxu0 }
 0xd29   :  { %v2315_v6 = vpack.c.bf16 %v2207_v28, %v2204_v42  ;;  %v2199_v38 = vadd.f32 %v4332_v14, %v2198_v45  ;;  %v2109_v34 = vadd.f32 %v6105_v56, %v2108_v32  ;;  %v2303_v14 = vmul.f32 0.25, %v2101_v48 }
 0xd2a   :  { %v4883_v39 = vpop.f32.mrf.mxu1  ;;  %v2304_v42 = vmul.f32 0.25, %v2106_v7  ;;  %v2117_v32 = vadd.f32 %v6118_v61, %v6105_v56  ;;  %v6163_v61 = vld [vmem:[%s6767_s2] sm:$0xff] }
 0xd2b   :  { %v2314_v18 = vpack.c.bf16 %v2199_v38, %v2196_v16  ;;  %5057 = vmatprep.subr.msk.bf16.mxu0 %vm486_vm4, %v2315_v6  ;;  %v2338_v57 = vsel %vm486_vm4, %v2315_v6, 0  ;;  %v2278_v33 = vadd.f32 %v4883_v39, %v4344_v26  ;;  %v2305_v59 = vmul.f32 0.25, %v2109_v34 }
 0xd2c   :  { %v2269_v43 = vpop.f32.mrf.mxu1  ;;  %4890 = vmatpush3.bf16.xpose.msra.mxu0 %v2338_v57  ;;  %v2309_v28 = vpack.c.bf16 %v2303_v14, %v2302_v51  ;;  %v2307_v16 = vmul.f32 0.25, %v2117_v32  ;;  %v2306_v6 = vmul.f32 0.25, %v2114_v23 }
 0xd2d   :  { %5058 = vmatprep.subr.msk.bf16.mxu0 %vm486_vm4, %v2314_v18  ;;  %v2335_v25 = vsel %vm486_vm4, %v2314_v18, 0  ;;  %v2270_v10 = vadd.f32 %v4344_v26, %v2269_v43  ;;  %v2310_v45 = vpack.c.bf16 %v2305_v59, %v2304_v42  ;;  %v6171_v43 = vld [vmem:[%s6767_s2 + $0x10] sm:$0xff] }
 0xd2e   :  { %v4884_v20 = vpop.f32.mrf.mxu1  ;;  %v2311_v38 = vpack.c.bf16 %v2307_v16, %v2306_v6 }
 0xd2f   :  { %v2281_v37 = vadd.f32 %v4884_v20, %v4344_v26 }
 0xd30   :  { %v2272_v46 = vpop.f32.mrf.mxu1 }
 0xd31   :  { %v2498_v8 = vpack.c.bf16 %v2281_v37, %v2278_v33  ;;  %v2273_v11 = vadd.f32 %v4344_v26, %v2272_v46  ;;  %v6181_v46 = vld [vmem:[%s6767_s2 + $0x8] sm:$0xff] }
 0xd32   :  { %v4887_v53 = vpop.f32.mrf.mxu1  ;;  %v6221_v37 = vld [vmem:[%s6767_s2 + $0x28] sm:$0xff] }
 0xd33   :  { %v2294_v62 = vadd.f32 %v4887_v53, %v4344_v26  ;;  %v2497_v36 = vpack.c.bf16 %v2273_v11, %v2270_v10 }
 0xd34   :  { %v2285_v9 = vpop.f32.mrf.mxu1  ;;  %4892 = vmatpush3.bf16.xpose.msra.mxu0 %v2335_v25 }
 0xd35   :  { %5059 = vmatprep.subr.msk.bf16.mxu0 %vm486_vm4, %v2313_v63  ;;  %v2286_v30 = vadd.f32 %v4344_v26, %v2285_v9  ;;  %v6189_v63 = vld [vmem:[%s6767_s2 + $0x18] sm:$0xff] }
 0xd36   :  { %v4888_v17 = vpop.f32.mrf.mxu1 }
 0xd37   :  { %v2297_v58 = vadd.f32 %v4888_v17, %v4344_v26 }
 0xd38   :  { %v2288_v21 = vpop.f32.mrf.mxu1 }
 0xd39   :  { %v2500_v19 = vpack.c.bf16 %v2297_v58, %v2294_v62  ;;  %v2289_v50 = vadd.f32 %v4344_v26, %v2288_v21  ;;  %v6201_v62 = vld [vmem:[%s6767_s2 + $0x20] sm:$0xff]  ;;  %v6209_v21 = vld [vmem:[%s6767_s2 + $0x30] sm:$0xff] }
 0xd3b   :  { %v2499_v3 = vpack.c.bf16 %v2289_v50, %v2286_v30  ;;  %4905 = vmatprep.subr.bf16.mxu1 %v2500_v19 }
 0xd3c   :  { %4906 = vmatpush3.bf16.msra.mxu1 %v2500_v19  ;;  %4894 = vmatpush3.bf16.xpose.msra.mxu0 %v2332_v54  ;;  %v6229_v54 = vld [vmem:[%s6767_s2 + $0x38] sm:$0xff] }
 0xd3d   :  { %4907 = vmatprep.subr.bf16.mxu1 %v2499_v3  ;;  %5060 = vmatprep.subr.msk.bf16.mxu0 %vm486_vm4, %v2312_v52 }
 0xd40   :  { %4908 = vmatpush3.bf16.msra.mxu1 %v2499_v3 }
 0xd41   :  { %4909 = vmatprep.subr.bf16.mxu1 %v2498_v8 }
 0xd44   :  { %4910 = vmatpush3.bf16.msra.mxu1 %v2498_v8  ;;  %4896 = vmatpush3.bf16.xpose.msra.mxu0 %v2329_v13  ;;  %v4378_v13 = vld [vmem:[%s6766_s6 + $0x9] ss:$0 sm:$0xff] }
 0xd45   :  { %4911 = vmatprep.subr.bf16.mxu1 %v2497_v36  ;;  %4933 = vmatprep.subr.bf16.mxu0 %v5093_v47 }
 0xd48   :  { %4912 = vmatpush3.bf16.msra.mxu1 %v2497_v36 }
 0xd4b   :  { %4898 = vmatmul.mubr.msk.bf16.vlgmr.msra.gmra.mxu0 %vm486_vm4, %v2309_v28 }
 0xd4c   :  { %4901 = vmatprep.mubr.msk.bf16.mxu0 %vm486_vm4, %v2310_v45  ;;  %4934 = vmatpush3.bf16.msra.mxu0 %v5093_v47 }
 0xd4d   :  { %4935 = vmatprep.subr.bf16.mxu0 %v5094_v27 }
 0xd50   :  { %4936 = vmatpush3.bf16.msra.mxu0 %v5094_v27 }
 0xd53   :  { %4902 = vmatmul.mubr.msk.bf16.gmra.mxu0 %vm486_vm4, %v2311_v38 }
 0xd54   :  { %4937 = vmatprep.mubr.msk.bf16.mxu0 %vm212_vm3, %v6043_v35 }
 0xd5b   :  { %4938 = vmatmul.mubr.msk.bf16.vlgmr.msra.gmra.mxu0 %vm212_vm3, %v6057_v31 }
 0xd5c   :  { %4941 = vmatprep.mubr.msk.bf16.mxu0 %vm212_vm3, %v6074_v2 }
 0xd63   :  { %4942 = vmatmul.mubr.msk.bf16.gmra.mxu0 %vm212_vm3, %v6086_v44 }
 0xe0b   :  { %v4899_v56 = vpop.f32.mrf.mxu0 }
 0xe0c   :  { %v6174_v57 = vadd.f32 %v6171_v43, %v4899_v56 }
 0xe0d   :  { %v2374_v12 = vpop.f32.mrf.mxu0 }
 0xe0e   :  { %v6166_v39 = vadd.f32 %v6163_v61, %v2374_v12  ;;  %v2411_v26 = vsel %vm576_vm5, %v6174_v57, -inf }
 0xe0f   :  { %v4900_v18 = vpop.f32.mrf.mxu0 }
 0xe10   :  { %v2405_v20 = vsel %vm576_vm5, %v6166_v39, -inf  ;;  %v6192_v9 = vadd.f32 %v6189_v63, %v4900_v18 }
 0xe11   :  { %v2377_v40 = vpop.f32.mrf.mxu0  ;;  %2406 = vmax.xlane.f32.xlu0 %v2405_v20 }
 0xe12   :  { %v6184_v22 = vadd.f32 %v6181_v46, %v2377_v40  ;;  %v2414_v19 = vsel %vm576_vm5, %v6192_v9, -inf }
 0xe13   :  { %v4903_v53 = vpop.f32.mrf.mxu0 }
 0xe14   :  { %v2408_v25 = vsel %vm576_vm5, %v6184_v22, -inf  ;;  %v6212_v30 = vadd.f32 %v6209_v21, %v4903_v53 }
 0xe15   :  { %2409 = vmax.xlane.f32.xlu1 %v2408_v25  ;;  %2412 = vmax.xlane.f32.xlu0 %v2411_v26  ;;  %v2390_v17 = vpop.f32.mrf.mxu0 }
 0xe16   :  { %v6204_v58 = vadd.f32 %v6201_v62, %v2390_v17  ;;  %v2423_v11 = vsel %vm576_vm5, %v6212_v30, -inf }
 0xe17   :  { %v4904_v4 = vpop.f32.mrf.mxu0 }
 0xe18   :  { %v2417_v50 = vsel %vm576_vm5, %v6204_v58, -inf  ;;  %v6232_v33 = vadd.f32 %v6229_v54, %v4904_v4 }
 0xe19   :  { %2415 = vmax.xlane.f32.xlu1 %v2414_v19  ;;  %v2393_v15 = vpop.f32.mrf.mxu0  ;;  %2418 = vmax.xlane.f32.xlu0 %v2417_v50 }
 0xe1a   :  { %v6224_v3 = vadd.f32 %v6221_v37, %v2393_v15  ;;  %v2426_v47 = vsel %vm576_vm5, %v6232_v33, -inf }
 0xe1b   :  { %v4939_v52 = vpop.f32.mrf.mxu0 }
 0xe1c   :  { %v2420_v8 = vsel %vm576_vm5, %v6224_v3, -inf  ;;  %v2743_v16 = vadd.f32 %v4939_v52, %v4378_v13 }
 0xe1d   :  { %v2734_v10 = vpop.f32.mrf.mxu0  ;;  %2421 = vmax.xlane.f32.xlu1 %v2420_v8  ;;  %2424 = vmax.xlane.f32.xlu0 %v2423_v11 }
 0xe1e   :  { %v2735_v12 = vadd.f32 %v4378_v13, %v2734_v10 }
 0xe1f   :  { %v4940_v48 = vpop.f32.mrf.mxu0 }
 0xe20   :  { %v2746_v23 = vadd.f32 %v4940_v48, %v4378_v13 }
 0xe21   :  { %v2737_v34 = vpop.f32.mrf.mxu0  ;;  %2427 = vmax.xlane.f32.xlu1 %v2426_v47 }
 0xe22   :  { %v2868_v6 = vpack.c.bf16 %v2746_v23, %v2743_v16  ;;  %v2738_v56 = vadd.f32 %v4378_v13, %v2737_v34 }
 0xe23   :  { %v4943_v36 = vpop.f32.mrf.mxu0 }
 0xe24   :  { %v2759_v14 = vadd.f32 %v4943_v36, %v4378_v13  ;;  %v2867_v18 = vpack.c.bf16 %v2738_v56, %v2735_v12  ;;  %v2887_v20 = vsel %vm486_vm4, %v2868_v6, 0  ;;  %v5095_v12 = vld [vmem:[%s6763_s5 + $0x78] sm:$0xff]  }
 0xe25   :  { %v2750_v49 = vpop.f32.mrf.mxu0  ;;  %4921 = vmatprep.subr.bf16.mxu1 %v5095_v12 }
 0xe26   :  { %v2751_v42 = vadd.f32 %v4378_v13, %v2750_v49  ;;  %v2884_v40 = vsel %vm486_vm4, %v2867_v18, 0 }
 0xe27   :  { %v4944_v7 = vpop.f32.mrf.mxu0 }
 0xe28   :  { %v2762_v59 = vadd.f32 %v4944_v7, %v4378_v13 }
 0xe29   :  { %v2753_v51 = vpop.f32.mrf.mxu0 }
 0xe2a   :  { %v2870_v28 = vpack.c.bf16 %v2762_v59, %v2759_v14  ;;  %v2754_v32 = vadd.f32 %v4378_v13, %v2753_v51 }
 0xe2c   :  { %v2869_v27 = vpack.c.bf16 %v2754_v32, %v2751_v42  ;;  %5061 = vmatprep.subr.msk.bf16.mxu0 %vm486_vm4, %v2870_v28  ;;  %v2893_v45 = vsel %vm486_vm4, %v2870_v28, 0 }
 0xe2d   :  { %4958 = vmatpush3.bf16.xpose.msra.mxu0 %v2893_v45 }
 0xe2e   :  { %5062 = vmatprep.subr.msk.bf16.mxu0 %vm486_vm4, %v2869_v27  ;;  %v2890_v38 = vsel %vm486_vm4, %v2869_v27, 0 }
 0xe35   :  { %4960 = vmatpush3.bf16.xpose.msra.mxu0 %v2890_v38 }
 0xe36   :  { %5063 = vmatprep.subr.msk.bf16.mxu0 %vm486_vm4, %v2868_v6 }
 0xe3d   :  { %4962 = vmatpush3.bf16.xpose.msra.mxu0 %v2887_v20 }
 0xe3e   :  { %5064 = vmatprep.subr.msk.bf16.mxu0 %vm486_vm4, %v2867_v18 }
 0xe45   :  { %4964 = vmatpush3.bf16.xpose.msra.mxu0 %v2884_v40 }
 0xe9a   :  { %v2407_v53 = vpop.xlane.xlu0 %2406 }
 0xe9b   :  { %v2429_v25 = vsub.f32 %v6166_v39, %v2407_v53 }
 0xe9d   :  { %v2437_v26 = vmul.f32 1.442695, %v2429_v25 }
 0xe9e   :  { %v2410_v17 = vpop.xlane.xlu1 %2409  ;;  %v2413_v4 = vpop.xlane.xlu0 %2412 }
 0xe9f   :  { %5205 = vpow2.f32 %v2437_v26  ;;  %v2430_v19 = vsub.f32 %v6184_v22, %v2410_v17  ;;  %v2431_v50 = vsub.f32 %v6174_v57, %v2413_v4 }
 0xea1   :  { %v2439_v15 = vmul.f32 1.442695, %v2430_v19  ;;  %v2441_v52 = vmul.f32 1.442695, %v2431_v50 }
 0xea2   :  { %v2416_v8 = vpop.xlane.xlu1 %2415  ;;  %v2419_v11 = vpop.xlane.xlu0 %2418 }
 0xea3   :  { %5207 = vpow2.f32 %v2439_v15  ;;  %v2432_v10 = vsub.f32 %v6192_v9, %v2416_v8  ;;  %v2433_v48 = vsub.f32 %v6204_v58, %v2419_v11 }
 0xea4   :  { %5209 = vpow2.f32 %v2441_v52 }
 0xea5   :  { %v2443_v47 = vmul.f32 1.442695, %v2432_v10  ;;  %v2445_v39 = vmul.f32 1.442695, %v2433_v48 }
 0xea6   :  { %v2422_v34 = vpop.xlane.xlu1 %2421  ;;  %v2425_v36 = vpop.xlane.xlu0 %2424 }
 0xea7   :  { %5211 = vpow2.f32 %v2443_v47  ;;  %v2434_v49 = vsub.f32 %v6224_v3, %v2422_v34  ;;  %v2435_v22 = vsub.f32 %v6212_v30, %v2425_v36  ;;  %v5096_v36 = vld [vmem:[%s6763_s5 + $0x70] sm:$0xff]  }
 0xea8   :  { %5213 = vpow2.f32 %v2445_v39 }
 0xea9   :  { %v2447_v57 = vmul.f32 1.442695, %v2434_v49  ;;  %v2449_v13 = vmul.f32 1.442695, %v2435_v22 }
 0xeaa   :  { %v2428_v7 = vpop.xlane.xlu1 %2427 }
 0xeab   :  { %5215 = vpow2.f32 %v2447_v57  ;;  %v2436_v14 = vsub.f32 %v6232_v33, %v2428_v7 }
 0xeac   :  { %v5206_v9 = vpop.eup %5205  ;;  %5217 = vpow2.f32 %v2449_v13 }
 0xead   :  { %v2451_v58 = vmul.f32 1.442695, %v2436_v14  ;;  %v2453_v59 = vsel %vm576_vm5, %v5206_v9, 0.0  ;;  %v5097_v14 = vld [vmem:[%s6763_s5 + $0xb8] sm:$0xff]  }
 0xeae   :  { %2454 = vadd.xlane.f32.xlu0 %v2453_v59 }
 0xeaf   :  { %5219 = vpow2.f32 %v2451_v58 }
 0xeb0   :  { %v5208_v51 = vpop.eup %5207 }
 0xeb1   :  { %v5210_v42 = vpop.eup %5209  ;;  %v2456_v3 = vsel %vm576_vm5, %v5208_v51, 0.0 }
 0xeb2   :  { %2457 = vadd.xlane.f32.xlu1 %v2456_v3  ;;  %v2459_v30 = vsel %vm576_vm5, %v5210_v42, 0.0  ;;  %v5099_v3 = vld [vmem:[%s6768_s7 + $0x10] sm:$0xff]  }
 0xeb3   :  { %2460 = vadd.xlane.f32.xlu0 %v2459_v30  ;;  %4999 = vmatprep.subr.bf16.mxu0 %v5099_v3 }
 0xeb4   :  { %v5212_v28 = vpop.eup %5211 }
 0xeb5   :  { %v5214_v32 = vpop.eup %5213  ;;  %v2462_v27 = vsel %vm576_vm5, %v5212_v28, 0.0 }
 0xeb6   :  { %2463 = vadd.xlane.f32.xlu1 %v2462_v27  ;;  %v2465_v33 = vsel %vm576_vm5, %v5214_v32, 0.0 }
 0xeb7   :  { %2466 = vadd.xlane.f32.xlu0 %v2465_v33 }
 0xeb8   :  { %v5216_v45 = vpop.eup %5215 }
 0xeb9   :  { %v5218_v23 = vpop.eup %5217  ;;  %v2468_v16 = vsel %vm576_vm5, %v5216_v45, 0.0 }
 0xeba   :  { %2469 = vadd.xlane.f32.xlu1 %v2468_v16  ;;  %v2471_v6 = vsel %vm576_vm5, %v5218_v23, 0.0 }
 0xebb   :  { %2472 = vadd.xlane.f32.xlu0 %v2471_v6 }
 0xebc   :  { %v5220_v38 = vpop.eup %5219 }
 0xebd   :  { %v2474_v56 = vsel %vm576_vm5, %v5220_v38, 0.0 }
 0xebe   :  { %2475 = vadd.xlane.f32.xlu1 %v2474_v56 }
 0xf37   :  { %v2455_v18 = vpop.xlane.xlu0 %2454 }
 0xf38   :  { %5221 = vrcp.f32 %v2455_v18 }
 0xf3b   :  { %v2458_v20 = vpop.xlane.xlu1 %2457 }
 0xf3c   :  { %5223 = vrcp.f32 %v2458_v20  ;;  %v2461_v40 = vpop.xlane.xlu0 %2460 }
 0xf3d   :  { %5225 = vrcp.f32 %v2461_v40 }
 0xf3f   :  { %v2464_v53 = vpop.xlane.xlu1 %2463 }
 0xf40   :  { %5227 = vrcp.f32 %v2464_v53  ;;  %v2467_v25 = vpop.xlane.xlu0 %2466 }
 0xf41   :  { %5229 = vrcp.f32 %v2467_v25 }
 0xf43   :  { %v2470_v26 = vpop.xlane.xlu1 %2469 }
 0xf44   :  { %5231 = vrcp.f32 %v2470_v26  ;;  %v2473_v17 = vpop.xlane.xlu0 %2472 }
 0xf45   :  { %5233 = vrcp.f32 %v2473_v17  ;;  %v5222_v4 = vpop.eup %5221 }
 0xf46   :  { %v2485_v15 = vmul.f32 %v5222_v4, %v5206_v9 }
 0xf47   :  { %v2476_v19 = vpop.xlane.xlu1 %2475 }
 0xf48   :  { %5235 = vrcp.f32 %v2476_v19 }
 0xf49   :  { %v5224_v50 = vpop.eup %5223 }
 0xf4a   :  { %v2486_v52 = vmul.f32 %v5224_v50, %v5208_v51  ;;  %v5226_v8 = vpop.eup %5225 }
 0xf4b   :  { %v2487_v48 = vmul.f32 %v5226_v8, %v5210_v42  ;;  %v5098_v42 = vld [vmem:[%s6763_s5 + $0xb0] sm:$0xff]  }
 0xf4c   :  { %v2493_v11 = vpack.c.bf16 %v2486_v52, %v2485_v15 }
 0xf4d   :  { %v5228_v10 = vpop.eup %5227 }
 0xf4e   :  { %v2488_v47 = vmul.f32 %v5228_v10, %v5212_v28  ;;  %4913 = vmatprep.mubr.msk.bf16.mxu1 %vm576_vm5, %v2493_v11  ;;  %v5230_v39 = vpop.eup %5229 }
 0xf4f   :  { %v2489_v22 = vmul.f32 %v5230_v39, %v5214_v32 }
 0xf50   :  { %v2494_v34 = vpack.c.bf16 %v2488_v47, %v2487_v48 }
 0xf51   :  { %v5232_v49 = vpop.eup %5231 }
 0xf52   :  { %4914 = vmatmul.mubr.msk.bf16.vlgmr.msra.gmra.mxu1 %vm576_vm5, %v2494_v34  ;;  %v2490_v57 = vmul.f32 %v5232_v49, %v5216_v45  ;;  %v5234_v13 = vpop.eup %5233 }
 0xf53   :  { %4922 = vmatpush3.bf16.msra.mxu1 %v5095_v12  ;;  %v2491_v58 = vmul.f32 %v5234_v13, %v5218_v23 }
 0xf54   :  { %v2495_v7 = vpack.c.bf16 %v2490_v57, %v2489_v22  ;;  %4923 = vmatprep.subr.bf16.mxu1 %v5096_v36 }
 0xf55   :  { %v5236_v9 = vpop.eup %5235 }
 0xf56   :  { %4917 = vmatprep.mubr.msk.bf16.mxu1 %vm576_vm5, %v2495_v7  ;;  %v2492_v59 = vmul.f32 %v5236_v9, %v5220_v38 }
 0xf57   :  { %4924 = vmatpush3.bf16.msra.mxu1 %v5096_v36 }
 0xf58   :  { %v2496_v51 = vpack.c.bf16 %v2492_v59, %v2491_v58  ;;  %4945 = vmatprep.subr.bf16.mxu1 %v5097_v14 }
 0xf5a   :  { %4918 = vmatmul.mubr.msk.bf16.gmra.mxu1 %vm576_vm5, %v2496_v51  ;;  %v4390_v51 = vld [vmem:[%s6766_s6 + $0xb] ss:$0 sm:$0xff] }
 0xf5b   :  { %4925 = vmatprep.mubr.msk.bf16.mxu1 %vm212_vm3, %v6043_v35 }
 0xf62   :  { %4926 = vmatmul.mubr.msk.bf16.vlgmr.msra.gmra.mxu1 %vm212_vm3, %v6057_v31 }
 0xf63   :  { %4929 = vmatprep.mubr.msk.bf16.mxu1 %vm212_vm3, %v6074_v2  ;;  %4946 = vmatpush3.bf16.msra.mxu1 %v5097_v14 }
 0xf64   :  { %4947 = vmatprep.subr.bf16.mxu1 %v5098_v42 }
 0xf67   :  { %4948 = vmatpush3.bf16.msra.mxu1 %v5098_v42 }
 0xf6a   :  { %4930 = vmatmul.mubr.msk.bf16.gmra.mxu1 %vm212_vm3, %v6086_v44 }
 0xf6b   :  { %4949 = vmatprep.mubr.msk.bf16.mxu1 %vm212_vm3, %v6043_v35 }
 0xf72   :  { %4950 = vmatmul.mubr.msk.bf16.vlgmr.msra.gmra.mxu1 %vm212_vm3, %v6057_v31 }
 0xf73   :  { %4953 = vmatprep.mubr.msk.bf16.mxu1 %vm212_vm3, %v6074_v2 }
 0xf7a   :  { %4954 = vmatmul.mubr.msk.bf16.gmra.mxu1 %vm212_vm3, %v6086_v44  ;;  %v4366_v44 = vld [vmem:[%s6766_s6 + $0x7] ss:$0 sm:$0xff] }
0x1012   :  { %v4915_v30 = vpop.f32.mrf.mxu1 }
0x1014   :  { %v2547_v28 = vpop.f32.mrf.mxu1 }
0x1016   :  { %v4916_v32 = vpop.f32.mrf.mxu1 }
0x1017   :  { %v2579_v59 = vpack.c.bf16 %v4916_v32, %v4915_v30 }
0x1018   :  { %v2550_v27 = vpop.f32.mrf.mxu1 }
0x1019   :  { %v2578_v7 = vpack.c.bf16 %v2550_v27, %v2547_v28 }
0x101a   :  { %v6302_v33 = vpop.f32.mrf.mxu1 }
0x101c   :  { %v2563_v35 = vpop.f32.mrf.mxu1 }
0x101e   :  { %v6304_v45 = vpop.f32.mrf.mxu1 }
0x101f   :  { %v2581_v32 = vpack.c.bf16 %v6304_v45, %v6302_v33 }
0x1020   :  { %v2566_v31 = vpop.f32.mrf.mxu1 }
0x1022   :  { %v4927_v23 = vpop.f32.mrf.mxu1 }
0x1023   :  { %v2653_v56 = vadd.f32 %v4927_v23, %v4366_v44 }
0x1024   :  { %v2644_v2 = vpop.f32.mrf.mxu1 }
0x1025   :  { %v2645_v6 = vadd.f32 %v4366_v44, %v2644_v2  ;;  %v2857_v26 = vmul.f32 0.25, %v2653_v56 }
0x1026   :  { %v4928_v16 = vpop.f32.mrf.mxu1 }
0x1027   :  { %v2656_v38 = vadd.f32 %v4928_v16, %v4366_v44  ;;  %v2855_v53 = vmul.f32 0.25, %v2645_v6 }
0x1028   :  { %v2647_v12 = vpop.f32.mrf.mxu1 }
0x1029   :  { %v2648_v18 = vadd.f32 %v4366_v44, %v2647_v12  ;;  %v2858_v20 = vmul.f32 0.25, %v2656_v38 }
0x102a   :  { %v4931_v40 = vpop.f32.mrf.mxu1 }
0x102b   :  { %v2856_v25 = vmul.f32 0.25, %v2648_v18  ;;  %v2864_v19 = vpack.c.bf16 %v2858_v20, %v2857_v26  ;;  %v2669_v8 = vadd.f32 %v4931_v40, %v4366_v44 }
0x102c   :  { %v2660_v17 = vpop.f32.mrf.mxu1 }
0x102d   :  { %v2863_v4 = vpack.c.bf16 %v2856_v25, %v2855_v53  ;;  %v2661_v15 = vadd.f32 %v4366_v44, %v2660_v17  ;;  %v2861_v36 = vmul.f32 0.25, %v2669_v8 }
0x102e   :  { %v4932_v50 = vpop.f32.mrf.mxu1 }
0x102f   :  { %v2672_v52 = vadd.f32 %v4932_v50, %v4366_v44  ;;  %4965 = vmatprep.mubr.msk.bf16.mxu0 %vm486_vm4, %v2863_v4  ;;  %v2859_v39 = vmul.f32 0.25, %v2661_v15 }
0x1030   :  { %v2663_v11 = vpop.f32.mrf.mxu1  ;;  %4966 = vmatmul.mubr.msk.bf16.vlgmr.msra.gmra.mxu0 %vm486_vm4, %v2864_v19 }
0x1031   :  { %v2664_v10 = vadd.f32 %v4366_v44, %v2663_v11  ;;  %5000 = vmatpush3.bf16.msra.mxu0 %v5099_v3  ;;  %v2862_v48 = vmul.f32 0.25, %v2672_v52  ;;  %v2580_v3 = vpack.c.bf16 %v2566_v31, %v2563_v35 }
0x1032   :  { %v4951_v47 = vpop.f32.mrf.mxu1 }
0x1033   :  { %v2860_v34 = vmul.f32 0.25, %v2664_v10  ;;  %v2866_v57 = vpack.c.bf16 %v2862_v48, %v2861_v36  ;;  %v2833_v30 = vadd.f32 %v4951_v47, %v4390_v51 }
0x1034   :  { %v2824_v49 = vpop.f32.mrf.mxu1 }
0x1035   :  { %v2865_v22 = vpack.c.bf16 %v2860_v34, %v2859_v39  ;;  %v2825_v56 = vadd.f32 %v4390_v51, %v2824_v49 }
0x1036   :  { %v4952_v13 = vpop.f32.mrf.mxu1 }
0x1037   :  { %4969 = vmatprep.mubr.msk.bf16.mxu0 %vm486_vm4, %v2865_v22  ;;  %v2836_v6 = vadd.f32 %v4952_v13, %v4390_v51 }
0x1038   :  { %v2827_v14 = vpop.f32.mrf.mxu1  ;;  %4970 = vmatmul.mubr.msk.bf16.gmra.mxu0 %vm486_vm4, %v2866_v57 }
0x1039   :  { %5001 = vmatprep.mubr.msk.bf16.mxu0 %vm486_vm4, %v2578_v7  ;;  %v3053_v35 = vpack.c.bf16 %v2836_v6, %v2833_v30  ;;  %v2828_v31 = vadd.f32 %v4390_v51, %v2827_v14 }
0x103a   :  { %v4955_v9 = vpop.f32.mrf.mxu1 }
0x103b   :  { %v2849_v23 = vadd.f32 %v4955_v9, %v4390_v51  ;;  %v3052_v12 = vpack.c.bf16 %v2828_v31, %v2825_v56 }
0x103c   :  { %v2840_v58 = vpop.f32.mrf.mxu1 }
0x103d   :  { %v2841_v28 = vadd.f32 %v4390_v51, %v2840_v58 }
0x103e   :  { %v4956_v42 = vpop.f32.mrf.mxu1 }
0x103f   :  { %v2852_v2 = vadd.f32 %v4956_v42, %v4390_v51 }
0x1040   :  { %v2843_v44 = vpop.f32.mrf.mxu1  ;;  %5002 = vmatmul.mubr.msk.bf16.vlgmr.msra.gmra.mxu0 %vm486_vm4, %v2579_v59 }
0x1041   :  { %v3055_v27 = vpack.c.bf16 %v2852_v2, %v2849_v23  ;;  %v2844_v16 = vadd.f32 %v4390_v51, %v2843_v44  ;;  %5005 = vmatprep.mubr.msk.bf16.mxu0 %vm486_vm4, %v2580_v3 }
0x1043   :  { %v3054_v38 = vpack.c.bf16 %v2844_v16, %v2841_v28  ;;  %4973 = vmatprep.subr.bf16.mxu1 %v3055_v27 }
0x1044   :  { %4974 = vmatpush3.bf16.msra.mxu1 %v3055_v27 }
0x1045   :  { %4975 = vmatprep.subr.bf16.mxu1 %v3054_v38 }
0x1048   :  { %4976 = vmatpush3.bf16.msra.mxu1 %v3054_v38  ;;  %5006 = vmatmul.mubr.msk.bf16.gmra.mxu0 %vm486_vm4, %v2581_v32 }
0x1049   :  { %4977 = vmatprep.subr.bf16.mxu1 %v3053_v35 }
0x104c   :  { %4978 = vmatpush3.bf16.msra.mxu1 %v3053_v35 }
0x104d   :  { %4979 = vmatprep.subr.bf16.mxu1 %v3052_v12 }
0x1050   :  { %4980 = vmatpush3.bf16.msra.mxu1 %v3052_v12 }
0x10f0   :  { %v4967_v18 = vpop.f32.mrf.mxu0 }
0x10f1   :  { %v2938_v25 = vadd.f32 %v6171_v43, %v4967_v18 }
0x10f2   :  { %v2929_v20 = vpop.f32.mrf.mxu0 }
0x10f3   :  { %v2930_v40 = vadd.f32 %v6163_v61, %v2929_v20  ;;  %v2966_v50 = vsel %vm576_vm5, %v2938_v25, -inf }
0x10f4   :  { %v4968_v53 = vpop.f32.mrf.mxu0 }
0x10f5   :  { %v2960_v33 = vsel %vm576_vm5, %v2930_v40, -inf  ;;  %v2941_v4 = vadd.f32 %v6189_v63, %v4968_v53 }
0x10f6   :  { %v2932_v45 = vpop.f32.mrf.mxu0  ;;  %2961 = vmax.xlane.f32.xlu0 %v2960_v33 }
0x10f7   :  { %v2933_v26 = vadd.f32 %v6181_v46, %v2932_v45  ;;  %v2969_v8 = vsel %vm576_vm5, %v2941_v4, -inf }
0x10f8   :  { %v4971_v17 = vpop.f32.mrf.mxu0 }
0x10f9   :  { %v2963_v19 = vsel %vm576_vm5, %v2933_v26, -inf  ;;  %v2954_v43 = vadd.f32 %v6209_v21, %v4971_v17  ;;  %v5100_v17 = vld [vmem:[%s6768_s7 + $0x18] sm:$0xff]  }
0x10fa   :  { %v2945_v15 = vpop.f32.mrf.mxu0  ;;  %2964 = vmax.xlane.f32.xlu1 %v2963_v19  ;;  %2967 = vmax.xlane.f32.xlu0 %v2966_v50 }
0x10fb   :  { %v2946_v61 = vadd.f32 %v6201_v62, %v2945_v15  ;;  %v2978_v47 = vsel %vm576_vm5, %v2954_v43, -inf  ;;  %4989 = vmatprep.subr.bf16.mxu1 %v5100_v17 }
0x10fc   :  { %v4972_v52 = vpop.f32.mrf.mxu0 }
0x10fd   :  { %v2972_v11 = vsel %vm576_vm5, %v2946_v61, -inf  ;;  %v2957_v10 = vadd.f32 %v6229_v54, %v4972_v52 }
0x10fe   :  { %v2948_v46 = vpop.f32.mrf.mxu0  ;;  %2970 = vmax.xlane.f32.xlu1 %v2969_v8  ;;  %2973 = vmax.xlane.f32.xlu0 %v2972_v11 }
0x10ff   :  { %v2949_v63 = vadd.f32 %v6221_v37, %v2948_v46  ;;  %v2981_v62 = vsel %vm576_vm5, %v2957_v10, -inf }
0x1101   :  { %v2975_v48 = vsel %vm576_vm5, %v2949_v63, -inf }
0x1102   :  { %2976 = vmax.xlane.f32.xlu1 %v2975_v48  ;;  %2979 = vmax.xlane.f32.xlu0 %v2978_v47 }
0x1106   :  { %2982 = vmax.xlane.f32.xlu1 %v2981_v62 }
0x117f   :  { %v2962_v21 = vpop.xlane.xlu0 %2961 }
0x1180   :  { %v2984_v39 = vsub.f32 %v2930_v40, %v2962_v21 }
0x1182   :  { %v2992_v34 = vmul.f32 1.442695, %v2984_v39 }
0x1183   :  { %v2965_v36 = vpop.xlane.xlu1 %2964  ;;  %v2968_v49 = vpop.xlane.xlu0 %2967 }
0x1184   :  { %5237 = vpow2.f32 %v2992_v34  ;;  %v2985_v22 = vsub.f32 %v2933_v26, %v2965_v36  ;;  %v2986_v57 = vsub.f32 %v2938_v25, %v2968_v49 }
0x1186   :  { %v2994_v37 = vmul.f32 1.442695, %v2985_v22  ;;  %v2996_v13 = vmul.f32 1.442695, %v2986_v57 }
0x1187   :  { %v2971_v54 = vpop.xlane.xlu1 %2970  ;;  %v2974_v7 = vpop.xlane.xlu0 %2973 }
0x1188   :  { %5239 = vpow2.f32 %v2994_v37  ;;  %v2987_v14 = vsub.f32 %v2941_v4, %v2971_v54  ;;  %v2988_v9 = vsub.f32 %v2946_v61, %v2974_v7 }
0x1189   :  { %5241 = vpow2.f32 %v2996_v13 }
0x118a   :  { %v2998_v58 = vmul.f32 1.442695, %v2987_v14  ;;  %v3000_v59 = vmul.f32 1.442695, %v2988_v9 }
0x118b   :  { %v2977_v51 = vpop.xlane.xlu1 %2976  ;;  %v2980_v42 = vpop.xlane.xlu0 %2979 }
0x118c   :  { %5243 = vpow2.f32 %v2998_v58  ;;  %v2989_v3 = vsub.f32 %v2949_v63, %v2977_v51  ;;  %v2990_v23 = vsub.f32 %v2954_v43, %v2980_v42 }
0x118d   :  { %5245 = vpow2.f32 %v3000_v59 }
0x118e   :  { %v3002_v2 = vmul.f32 1.442695, %v2989_v3  ;;  %v3004_v44 = vmul.f32 1.442695, %v2990_v23 }
0x118f   :  { %v2983_v28 = vpop.xlane.xlu1 %2982 }
0x1190   :  { %5247 = vpow2.f32 %v3002_v2  ;;  %v2991_v27 = vsub.f32 %v2957_v10, %v2983_v28 }
0x1191   :  { %v5238_v16 = vpop.eup %5237  ;;  %5249 = vpow2.f32 %v3004_v44 }
0x1192   :  { %v3006_v6 = vmul.f32 1.442695, %v2991_v27  ;;  %v3008_v38 = vsel %vm576_vm5, %v5238_v16, 0.0 }
0x1193   :  { %3009 = vadd.xlane.f32.xlu0 %v3008_v38  ;;  %v5003_v38 = vpop.f32.mrf.mxu0 }
0x1194   :  { %5251 = vpow2.f32 %v3006_v6 }
0x1195   :  { %v5240_v30 = vpop.eup %5239 }
0x1196   :  { %v5242_v32 = vpop.eup %5241  ;;  %v3011_v35 = vsel %vm576_vm5, %v5240_v30, 0.0 }
0x1197   :  { %3012 = vadd.xlane.f32.xlu1 %v3011_v35  ;;  %v3014_v31 = vsel %vm576_vm5, %v5242_v32, 0.0 }
0x1198   :  { %3015 = vadd.xlane.f32.xlu0 %v3014_v31 }
0x1199   :  { %v5244_v56 = vpop.eup %5243 }
0x119a   :  { %v5246_v12 = vpop.eup %5245  ;;  %v3017_v18 = vsel %vm576_vm5, %v5244_v56, 0.0 }
0x119b   :  { %3018 = vadd.xlane.f32.xlu1 %v3017_v18  ;;  %v3020_v20 = vsel %vm576_vm5, %v5246_v12, 0.0 }
0x119c   :  { %3021 = vadd.xlane.f32.xlu0 %v3020_v20 }
0x119d   :  { %v5248_v40 = vpop.eup %5247 }
0x119e   :  { %v5250_v53 = vpop.eup %5249  ;;  %v3023_v25 = vsel %vm576_vm5, %v5248_v40, 0.0 }
0x119f   :  { %3024 = vadd.xlane.f32.xlu1 %v3023_v25  ;;  %v3026_v33 = vsel %vm576_vm5, %v5250_v53, 0.0 }
0x11a0   :  { %3027 = vadd.xlane.f32.xlu0 %v3026_v33 }
0x11a1   :  { %v5252_v45 = vpop.eup %5251 }
0x11a2   :  { %v3029_v26 = vsel %vm576_vm5, %v5252_v45, 0.0 }
0x11a3   :  { %3030 = vadd.xlane.f32.xlu1 %v3029_v26 }
0x121c   :  { %v3010_v4 = vpop.xlane.xlu0 %3009 }
0x121d   :  { %5253 = vrcp.f32 %v3010_v4 }
0x1220   :  { %v3013_v19 = vpop.xlane.xlu1 %3012 }
0x1221   :  { %5255 = vrcp.f32 %v3013_v19  ;;  %v3016_v50 = vpop.xlane.xlu0 %3015 }
0x1222   :  { %5257 = vrcp.f32 %v3016_v50 }
0x1224   :  { %v3019_v15 = vpop.xlane.xlu1 %3018 }
0x1225   :  { %5259 = vrcp.f32 %v3019_v15  ;;  %v3022_v61 = vpop.xlane.xlu0 %3021 }
0x1226   :  { %5261 = vrcp.f32 %v3022_v61 }
0x1228   :  { %v3025_v52 = vpop.xlane.xlu1 %3024 }
0x1229   :  { %5263 = vrcp.f32 %v3025_v52  ;;  %v3028_v43 = vpop.xlane.xlu0 %3027 }
0x122a   :  { %5265 = vrcp.f32 %v3028_v43  ;;  %v5254_v8 = vpop.eup %5253 }
0x122b   :  { %v3040_v63 = vmul.f32 %v5254_v8, %v5238_v16 }
0x122c   :  { %v3031_v11 = vpop.xlane.xlu1 %3030 }
0x122d   :  { %5267 = vrcp.f32 %v3031_v11 }
0x122e   :  { %v5256_v46 = vpop.eup %5255 }
0x122f   :  { %v3041_v10 = vmul.f32 %v5256_v46, %v5240_v30  ;;  %v5258_v48 = vpop.eup %5257  ;;  %v3275_v30 = vpop.f32.mrf.mxu0 }
0x1230   :  { %v3042_v21 = vmul.f32 %v5258_v48, %v5242_v32 }
0x1231   :  { %v3048_v47 = vpack.c.bf16 %v3041_v10, %v3040_v63  ;;  %v5004_v32 = vpop.f32.mrf.mxu0 }
0x1232   :  { %v5260_v62 = vpop.eup %5259 }
0x1233   :  { %v3043_v39 = vmul.f32 %v5260_v62, %v5244_v56  ;;  %4981 = vmatprep.mubr.msk.bf16.mxu1 %vm576_vm5, %v3048_v47  ;;  %v5262_v34 = vpop.eup %5261  ;;  %v3278_v35 = vpop.f32.mrf.mxu0 }
0x1234   :  { %v3044_v22 = vmul.f32 %v5262_v34, %v5246_v12  ;;  %v4418_v12 = vld [vmem:[%s6769_s8 + $0x6] ss:$0 sm:$0xff] }
0x1235   :  { %v3049_v36 = vpack.c.bf16 %v3043_v39, %v3042_v21  ;;  %v5007_v18 = vpop.f32.mrf.mxu0 }
0x1236   :  { %v5264_v49 = vpop.eup %5263 }
0x1237   :  { %4982 = vmatmul.mubr.msk.bf16.vlgmr.msra.gmra.mxu1 %vm576_vm5, %v3049_v36  ;;  %v3045_v57 = vmul.f32 %v5264_v49, %v5248_v40  ;;  %v5266_v37 = vpop.eup %5265  ;;  %v3291_v26 = vpop.f32.mrf.mxu0 }
0x1238   :  { %4990 = vmatpush3.bf16.msra.mxu1 %v5100_v17  ;;  %v3046_v7 = vmul.f32 %v5266_v37, %v5250_v53 }
0x1239   :  { %v3050_v13 = vpack.c.bf16 %v3045_v57, %v3044_v22  ;;  %v5008_v11 = vpop.f32.mrf.mxu0 }
0x123a   :  { %v5268_v54 = vpop.eup %5267 }
0x123b   :  { %4985 = vmatprep.mubr.msk.bf16.mxu1 %vm576_vm5, %v3050_v13  ;;  %v3047_v14 = vmul.f32 %v5268_v54, %v5252_v45  ;;  %v3294_v34 = vpop.f32.mrf.mxu0 }
0x123d   :  { %v3051_v9 = vpack.c.bf16 %v3047_v14, %v3046_v7 }
0x123f   :  { %4986 = vmatmul.mubr.msk.bf16.gmra.mxu1 %vm576_vm5, %v3051_v9 }
0x12f7   :  { %v4983_v58 = vpop.f32.mrf.mxu1 }
0x12f9   :  { %v3102_v59 = vpop.f32.mrf.mxu1 }
0x12fb   :  { %v4984_v51 = vpop.f32.mrf.mxu1 }
0x12fc   :  { %v3134_v23 = vpack.c.bf16 %v4984_v51, %v4983_v58 }
0x12fd   :  { %v3105_v42 = vpop.f32.mrf.mxu1 }
0x12fe   :  { %v3133_v3 = vpack.c.bf16 %v3105_v42, %v3102_v59 }
0x12ff   :  { %v4987_v2 = vpop.f32.mrf.mxu1 }
0x1300   :  { %4991 = vmatprep.mubr.msk.bf16.mxu1 %vm486_vm4, %v3133_v3 }
0x1301   :  { %v3118_v44 = vpop.f32.mrf.mxu1  ;;  %4992 = vmatmul.mubr.msk.bf16.vlgmr.msra.gmra.mxu1 %vm486_vm4, %v3134_v23 }
0x1303   :  { %v4988_v28 = vpop.f32.mrf.mxu1 }
0x1304   :  { %v3136_v6 = vpack.c.bf16 %v4988_v28, %v4987_v2 }
0x1305   :  { %v3121_v27 = vpop.f32.mrf.mxu1 }
0x1306   :  { %v3135_v16 = vpack.c.bf16 %v3121_v27, %v3118_v44 }
0x1308   :  { %4995 = vmatprep.mubr.msk.bf16.mxu1 %vm486_vm4, %v3135_v16 }
0x1309   :  { %4996 = vmatmul.mubr.msk.bf16.gmra.mxu1 %vm486_vm4, %v3136_v6 }
0x13c1   :  { %v4993_v31 = vpop.f32.mrf.mxu1 }
0x13c2   :  { %v3284_v56 = vadd.f32 %v5003_v38, %v4993_v31 }
0x13c3   :  { %v3192_v20 = vpop.f32.mrf.mxu1 }
0x13c4   :  { %v3276_v40 = vadd.f32 %v3275_v30, %v3192_v20  ;;  %v3316_v53 = vadd.f32 %v4418_v12, %v3284_v56 }
0x13c5   :  { %v4994_v25 = vpop.f32.mrf.mxu1 }
0x13c6   :  { %v3314_v33 = vadd.f32 %v4418_v12, %v3276_v40  ;;  %v3287_v45 = vadd.f32 %v5004_v32, %v4994_v25  ;;  %v3324_v61 = vadd.f32 %v3316_v53, %v6050_v60 }
0x13c7   :  { %v3195_v17 = vpop.f32.mrf.mxu1 }
0x13c8   :  { %v3279_v4 = vadd.f32 %v3278_v35, %v3195_v17  ;;  %v3322_v19 = vadd.f32 %v3314_v33, %v6036_v55  ;;  %v3317_v50 = vadd.f32 %v4418_v12, %v3287_v45  ;;  %v3340_v47 = vsel %vm212_vm3, %v3324_v61, 0.0 }
0x13c9   :  { %v4997_v15 = vpop.f32.mrf.mxu1 }
0x13ca   :  { %v3315_v52 = vadd.f32 %v4418_v12, %v3279_v4  ;;  %v3300_v43 = vadd.f32 %v5007_v18, %v4997_v15  ;;  %v3334_v8 = vsel %vm212_vm3, %v3322_v19, 0.0  ;;  %v3325_v62 = vadd.f32 %v3317_v50, %v6052_v29 }
0x13cb   :  { %3335 = vadd.xlane.f32.xlu0 %v3334_v8  ;;  %v3208_v46 = vpop.f32.mrf.mxu1 }
0x13cc   :  { %v3292_v63 = vadd.f32 %v3291_v26, %v3208_v46  ;;  %v3323_v10 = vadd.f32 %v3315_v52, %v6038_v1  ;;  %v3320_v55 = vadd.f32 %v4418_v12, %v3300_v43  ;;  %v3343_v57 = vsel %vm212_vm3, %v3325_v62, 0.0  ;;  %v5101_v46 = vld [vmem:[%s6770_s9 + $0x18] sm:$0xff]  }
0x13cd   :  { %v4998_v48 = vpop.f32.mrf.mxu1  ;;  %5009 = vmatprep.subr.bf16.mxu1 %v5101_v46 }
0x13ce   :  { %v3318_v21 = vadd.f32 %v4418_v12, %v3292_v63  ;;  %v3303_v39 = vadd.f32 %v5008_v11, %v4998_v48  ;;  %v3337_v60 = vsel %vm212_vm3, %v3323_v10, 0.0  ;;  %v3328_v29 = vadd.f32 %v3320_v55, %v6080_v5  ;;  %5010 = vmatpush3.bf16.msra.mxu1 %v5101_v46  ;;  %v5102_v63 = vld [vmem:[%s6770_s9 + $0x10] sm:$0xff]  }
0x13cf   :  { %3341 = vadd.xlane.f32.xlu0 %v3340_v47  ;;  %3338 = vadd.xlane.f32.xlu1 %v3337_v60  ;;  %v3211_v36 = vpop.f32.mrf.mxu1 }
0x13d0   :  { %v3295_v49 = vadd.f32 %v3294_v34, %v3211_v36  ;;  %v3326_v22 = vadd.f32 %v3318_v21, %v6062_v24  ;;  %v3321_v1 = vadd.f32 %v4418_v12, %v3303_v39  ;;  %v3352_v14 = vsel %vm212_vm3, %v3328_v29, 0.0  ;;  %5011 = vmatprep.subr.bf16.mxu1 %v5102_v63 }
0x13d2   :  { %v3319_v37 = vadd.f32 %v4418_v12, %v3295_v49  ;;  %v3346_v13 = vsel %vm212_vm3, %v3326_v22, 0.0  ;;  %v3329_v9 = vadd.f32 %v3321_v1, %v6082_v41  ;;  %5012 = vmatpush3.bf16.msra.mxu1 %v5102_v63  ;;  %v5104_v63 = vld [vmem:[%s6771_s11 + $0x30] sm:$0xff]  }
0x13d3   :  { %3344 = vadd.xlane.f32.xlu1 %v3343_v57  ;;  %3347 = vadd.xlane.f32.xlu0 %v3346_v13 }
0x13d4   :  { %v3327_v54 = vadd.f32 %v3319_v37, %v6069_v0  ;;  %v3355_v24 = vsel %vm212_vm3, %v3329_v9, 0.0 }
0x13d6   :  { %v3349_v7 = vsel %vm212_vm3, %v3327_v54, 0.0 }
0x13d7   :  { %3350 = vadd.xlane.f32.xlu1 %v3349_v7  ;;  %3353 = vadd.xlane.f32.xlu0 %v3352_v14 }
0x13db   :  { %3356 = vadd.xlane.f32.xlu1 %v3355_v24 }
0x1454   :  { %v3336_v58 = vpop.xlane.xlu0 %3335 }
0x1455   :  { %v3358_v59 = vmul.f32 0.03125, %v3336_v58 }
0x1457   :  { %v6376_v51 = vsub.f32 %v3322_v19, %v3358_v59 }
0x1458   :  { %v3342_v5 = vpop.xlane.xlu0 %3341  ;;  %v3339_v42 = vpop.xlane.xlu1 %3338 }
0x1459   :  { %v3360_v3 = vmul.f32 0.03125, %v3342_v5  ;;  %v3359_v23 = vmul.f32 0.03125, %v3339_v42  ;;  %v3374_v0 = vmul.f32 %v6376_v51, %v6376_v51 }
0x145b   :  { %v6380_v2 = vsub.f32 %v3324_v61, %v3360_v3  ;;  %v6382_v44 = vsub.f32 %v3323_v10, %v3359_v23  ;;  %v3382_v41 = vsel %vm212_vm3, %v3374_v0, 0.0  ;;  %v5103_v10 = vld [vmem:[%s6771_s11 + $0x38] sm:$0xff]   ;;  %v4421_v23 = vld [vmem:[%s6769_s8 + $0x7] ss:$0 sm:$0xff] }
0x145c   :  { %v3345_v28 = vpop.xlane.xlu1 %3344  ;;  %3383 = vadd.xlane.f32.xlu0 %v3382_v41  ;;  %v3348_v27 = vpop.xlane.xlu0 %3347  ;;  %5021 = vmatprep.subr.bf16.mxu0 %v5103_v10 }
0x145d   :  { %v3361_v16 = vmul.f32 0.03125, %v3345_v28  ;;  %v3362_v6 = vmul.f32 0.03125, %v3348_v27  ;;  %v3375_v38 = vmul.f32 %v6382_v44, %v6382_v44  ;;  %v3376_v30 = vmul.f32 %v6380_v2, %v6380_v2  ;;  %5022 = vmatpush3.bf16.msra.mxu0 %v5103_v10  ;;  %v5105_v10 = vld [vmem:[%s6771_s11 + $0x28] sm:$0xff]  }
0x145e   :  { %5023 = vmatprep.subr.bf16.mxu0 %v5104_v63 }
0x145f   :  { %v6389_v32 = vsub.f32 %v3325_v62, %v3361_v16  ;;  %v6391_v35 = vsub.f32 %v3326_v22, %v3362_v6  ;;  %v3385_v31 = vsel %vm212_vm3, %v3375_v38, 0.0  ;;  %v3388_v56 = vsel %vm212_vm3, %v3376_v30, 0.0  ;;  %v4422_v16 = vld [vmem:[%s6769_s8 + $0x8] ss:$0 sm:$0xff] }
0x1460   :  { %3386 = vadd.xlane.f32.xlu1 %v3385_v31  ;;  %v3351_v12 = vpop.xlane.xlu1 %3350  ;;  %3389 = vadd.xlane.f32.xlu0 %v3388_v56  ;;  %v3354_v18 = vpop.xlane.xlu0 %3353 }
0x1461   :  { %v3363_v20 = vmul.f32 0.03125, %v3351_v12  ;;  %v3364_v40 = vmul.f32 0.03125, %v3354_v18  ;;  %v3377_v53 = vmul.f32 %v6389_v32, %v6389_v32  ;;  %v3378_v25 = vmul.f32 %v6391_v35, %v6391_v35  ;;  %5024 = vmatpush3.bf16.msra.mxu0 %v5104_v63 }
0x1462   :  { %5025 = vmatprep.subr.bf16.mxu0 %v5105_v10 }
0x1463   :  { %v6399_v33 = vsub.f32 %v3327_v54, %v3363_v20  ;;  %v6401_v45 = vsub.f32 %v3328_v29, %v3364_v40  ;;  %v3391_v26 = vsel %vm212_vm3, %v3377_v53, 0.0  ;;  %v3394_v17 = vsel %vm212_vm3, %v3378_v25, 0.0 }
0x1464   :  { %3392 = vadd.xlane.f32.xlu1 %v3391_v26  ;;  %v3357_v4 = vpop.xlane.xlu1 %3356  ;;  %3395 = vadd.xlane.f32.xlu0 %v3394_v17 }
0x1465   :  { %v3365_v19 = vmul.f32 0.03125, %v3357_v4  ;;  %v3379_v50 = vmul.f32 %v6399_v33, %v6399_v33  ;;  %v3380_v15 = vmul.f32 %v6401_v45, %v6401_v45  ;;  %5026 = vmatpush3.bf16.msra.mxu0 %v5105_v10 }
0x1467   :  { %v6409_v61 = vsub.f32 %v3329_v9, %v3365_v19  ;;  %v3397_v52 = vsel %vm212_vm3, %v3379_v50, 0.0  ;;  %v3400_v43 = vsel %vm212_vm3, %v3380_v15, 0.0 }
0x1468   :  { %3398 = vadd.xlane.f32.xlu1 %v3397_v52  ;;  %3401 = vadd.xlane.f32.xlu0 %v3400_v43 }
0x1469   :  { %v3381_v8 = vmul.f32 %v6409_v61, %v6409_v61 }
0x146b   :  { %v3403_v11 = vsel %vm212_vm3, %v3381_v8, 0.0 }
0x146c   :  { %3404 = vadd.xlane.f32.xlu1 %v3403_v11 }
0x14e5   :  { %v3384_v48 = vpop.xlane.xlu0 %3383 }
0x14e6   :  { %v3406_v47 = vmul.f32 0.03125, %v3384_v48  ;;  %v5106_v48 = vld [vmem:[%s6771_s11 + $0x20] sm:$0xff]  }
0x14e7   :  { %5027 = vmatprep.subr.bf16.mxu0 %v5106_v48 }
0x14e8   :  { %v3414_v62 = vadd.f32 1e-05, %v3406_v47  ;;  %5028 = vmatpush3.bf16.msra.mxu0 %v5106_v48 }
0x14e9   :  { %v3387_v55 = vpop.xlane.xlu1 %3386  ;;  %v3390_v21 = vpop.xlane.xlu0 %3389 }
0x14ea   :  { %5269 = vrsqrt.f32 %v3414_v62  ;;  %v3407_v39 = vmul.f32 0.03125, %v3387_v55  ;;  %v3408_v60 = vmul.f32 0.03125, %v3390_v21  ;;  %v4428_v55 = vld [vmem:[%s6772_s10 + $0x1] ss:$0 sm:$0xff] }
0x14ec   :  { %v3415_v34 = vadd.f32 1e-05, %v3407_v39  ;;  %v3416_v36 = vadd.f32 1e-05, %v3408_v60 }
0x14ed   :  { %v3393_v49 = vpop.xlane.xlu1 %3392  ;;  %v3396_v22 = vpop.xlane.xlu0 %3395 }
0x14ee   :  { %5271 = vrsqrt.f32 %v3415_v34  ;;  %v3409_v57 = vmul.f32 0.03125, %v3393_v49  ;;  %v3410_v1 = vmul.f32 0.03125, %v3396_v22 }
0x14ef   :  { %5273 = vrsqrt.f32 %v3416_v36 }
0x14f0   :  { %v3417_v37 = vadd.f32 1e-05, %v3409_v57  ;;  %v3418_v13 = vadd.f32 1e-05, %v3410_v1 }
0x14f1   :  { %v3399_v29 = vpop.xlane.xlu1 %3398  ;;  %v3402_v54 = vpop.xlane.xlu0 %3401 }
0x14f2   :  { %5275 = vrsqrt.f32 %v3417_v37  ;;  %v3411_v7 = vmul.f32 0.03125, %v3399_v29  ;;  %v3412_v14 = vmul.f32 0.03125, %v3402_v54 }
0x14f3   :  { %5277 = vrsqrt.f32 %v3418_v13 }
0x14f4   :  { %v3419_v9 = vadd.f32 1e-05, %v3411_v7  ;;  %v3420_v24 = vadd.f32 1e-05, %v3412_v14 }
0x14f5   :  { %v3405_v58 = vpop.xlane.xlu1 %3404 }
0x14f6   :  { %5279 = vrsqrt.f32 %v3419_v9  ;;  %v3413_v59 = vmul.f32 0.03125, %v3405_v58 }
0x14f7   :  { %v5270_v5 = vpop.eup %5269  ;;  %5281 = vrsqrt.f32 %v3420_v24 }
0x14f8   :  { %v3421_v42 = vadd.f32 1e-05, %v3413_v59  ;;  %v3430_v3 = vmul.f32 %v5270_v5, %v6376_v51 }
0x14fa   :  { %5283 = vrsqrt.f32 %v3421_v42  ;;  %v3444_v27 = vmul.f32 %v4421_v23, %v3430_v3 }
0x14fb   :  { %v5272_v0 = vpop.eup %5271 }
0x14fc   :  { %v5274_v41 = vpop.eup %5273  ;;  %v3431_v28 = vmul.f32 %v5272_v0, %v6382_v44  ;;  %v6435_v12 = vadd.f32 %v4422_v16, %v3444_v27 }
0x14fd   :  { %v3432_v6 = vmul.f32 %v5274_v41, %v6380_v2 }
0x14fe   :  { %v3445_v38 = vmul.f32 %v4421_v23, %v3431_v28 }
0x14ff   :  { %v5276_v30 = vpop.eup %5275  ;;  %v3446_v51 = vmul.f32 %v4421_v23, %v3432_v6 }
0x1500   :  { %v5278_v31 = vpop.eup %5277  ;;  %v3433_v56 = vmul.f32 %v5276_v30, %v6389_v32  ;;  %v6437_v18 = vadd.f32 %v4422_v16, %v3445_v38 }
0x1501   :  { %v3434_v20 = vmul.f32 %v5278_v31, %v6391_v35  ;;  %v6442_v26 = vadd.f32 %v4422_v16, %v3446_v51 }
0x1502   :  { %v3447_v44 = vmul.f32 %v4421_v23, %v3433_v56  ;;  %v3466_v40 = vpack.c.bf16 %v6437_v18, %v6435_v12 }
0x1503   :  { %v5280_v53 = vpop.eup %5279  ;;  %v3448_v17 = vmul.f32 %v4421_v23, %v3434_v20 }
0x1504   :  { %v5282_v25 = vpop.eup %5281  ;;  %v6444_v2 = vadd.f32 %v4422_v16, %v3447_v44  ;;  %5013 = vmatprep.mubr.msk.bf16.mxu1 %vm212_vm3, %v3466_v40  ;;  %v3435_v32 = vmul.f32 %v5280_v53, %v6399_v33 }
0x1505   :  { %v3436_v4 = vmul.f32 %v5282_v25, %v6401_v45  ;;  %v6453_v52 = vadd.f32 %v4422_v16, %v3448_v17 }
0x1506   :  { %v3467_v35 = vpack.c.bf16 %v6444_v2, %v6442_v26  ;;  %v3449_v19 = vmul.f32 %v4421_v23, %v3435_v32 }
0x1507   :  { %v5284_v50 = vpop.eup %5283  ;;  %v3450_v8 = vmul.f32 %v4421_v23, %v3436_v4 }
0x1508   :  { %v3437_v15 = vmul.f32 %v5284_v50, %v6409_v61  ;;  %5014 = vmatmul.mubr.msk.bf16.vlgmr.msra.gmra.mxu1 %vm212_vm3, %v3467_v35  ;;  %v6455_v43 = vadd.f32 %v4422_v16, %v3449_v19 }
0x1509   :  { %v6460_v45 = vadd.f32 %v4422_v16, %v3450_v8 }
0x150a   :  { %v3468_v33 = vpack.c.bf16 %v6455_v43, %v6453_v52  ;;  %v3451_v11 = vmul.f32 %v4421_v23, %v3437_v15 }
0x150c   :  { %5017 = vmatprep.mubr.msk.bf16.mxu1 %vm212_vm3, %v3468_v33  ;;  %v6462_v46 = vadd.f32 %v4422_v16, %v3451_v11  ;;  %v4444_v16 = vld [vmem:[%s6769_s8 + $0x9] ss:$0 sm:$0xff] }
0x150e   :  { %v3469_v61 = vpack.c.bf16 %v6462_v46, %v6460_v45 }
0x1510   :  { %5018 = vmatmul.mubr.msk.bf16.gmra.mxu1 %vm212_vm3, %v3469_v61 }
0x15c8   :  { %v5015_v47 = vpop.f32.mrf.mxu1 }
0x15c9   :  { %v3550_v34 = vadd.f32 %v5015_v47, %v4428_v55 }
0x15ca   :  { %v3541_v62 = vpop.f32.mrf.mxu1 }
0x15cb   :  { %v3542_v39 = vadd.f32 %v4428_v55, %v3541_v62  ;;  %v3574_v13 = vmax.f32 %v3550_v34, 0.0 }
0x15cc   :  { %v5016_v21 = vpop.f32.mrf.mxu1 }
0x15cd   :  { %v3553_v60 = vadd.f32 %v5016_v21, %v4428_v55  ;;  %v3572_v1 = vmax.f32 %v3542_v39, 0.0 }
0x15ce   :  { %v3544_v36 = vpop.f32.mrf.mxu1 }
0x15cf   :  { %v3545_v49 = vadd.f32 %v4428_v55, %v3544_v36  ;;  %v3575_v22 = vmax.f32 %v3553_v60, 0.0 }
0x15d0   :  { %v5019_v57 = vpop.f32.mrf.mxu1 }
0x15d1   :  { %v3573_v37 = vmax.f32 %v3545_v49, 0.0  ;;  %v3581_v7 = vpack.c.bf16 %v3575_v22, %v3574_v13  ;;  %v3566_v58 = vadd.f32 %v5019_v57, %v4428_v55 }
0x15d2   :  { %v3557_v29 = vpop.f32.mrf.mxu1 }
0x15d3   :  { %v3580_v54 = vpack.c.bf16 %v3573_v37, %v3572_v1  ;;  %v3558_v9 = vadd.f32 %v4428_v55, %v3557_v29  ;;  %v3578_v0 = vmax.f32 %v3566_v58, 0.0 }
0x15d4   :  { %v5020_v14 = vpop.f32.mrf.mxu1 }
0x15d5   :  { %v3569_v24 = vadd.f32 %v5020_v14, %v4428_v55  ;;  %5029 = vmatprep.mubr.msk.bf16.mxu0 %vm576_vm5, %v3580_v54  ;;  %v3576_v3 = vmax.f32 %v3558_v9, 0.0 }
0x15d6   :  { %v3560_v59 = vpop.f32.mrf.mxu1  ;;  %5030 = vmatmul.mubr.msk.bf16.vlgmr.msra.gmra.mxu0 %vm576_vm5, %v3581_v7 }
0x15d7   :  { %v3561_v5 = vadd.f32 %v4428_v55, %v3560_v59  ;;  %v3579_v42 = vmax.f32 %v3569_v24, 0.0 }
0x15d9   :  { %v3577_v23 = vmax.f32 %v3561_v5, 0.0  ;;  %v3583_v28 = vpack.c.bf16 %v3579_v42, %v3578_v0 }
0x15db   :  { %v3582_v41 = vpack.c.bf16 %v3577_v23, %v3576_v3 }
0x15dd   :  { %5033 = vmatprep.mubr.msk.bf16.mxu0 %vm576_vm5, %v3582_v41 }
0x15de   :  { %5034 = vmatmul.mubr.msk.bf16.gmra.mxu0 %vm576_vm5, %v3583_v28 }
0x1696   :  { %v5031_v27 = vpop.f32.mrf.mxu0 }
0x1697   :  { %v3680_v38 = vadd.f32 %v5031_v27, %v4444_v16 }
0x1698   :  { %v3671_v6 = vpop.f32.mrf.mxu0 }
0x1699   :  { %v3672_v30 = vadd.f32 %v4444_v16, %v3671_v6  ;;  %v3704_v44 = vadd.f32 %v3680_v38, %v6442_v26 }
0x169a   :  { %v5032_v31 = vpop.f32.mrf.mxu0 }
0x169b   :  { %v3702_v51 = vadd.f32 %v3672_v30, %v6435_v12  ;;  %v3683_v56 = vadd.f32 %v5032_v31, %v4444_v16  ;;  %v3720_v12 = vsel %vm212_vm3, %v3704_v44, 0.0 }
0x169c   :  { %v3674_v20 = vpop.f32.mrf.mxu0 }
0x169d   :  { %v3675_v40 = vadd.f32 %v4444_v16, %v3674_v20  ;;  %v3714_v53 = vsel %vm212_vm3, %v3702_v51, 0.0  ;;  %v3705_v17 = vadd.f32 %v3683_v56, %v6444_v2 }
0x169e   :  { %3715 = vadd.xlane.f32.xlu0 %v3714_v53  ;;  %v5035_v25 = vpop.f32.mrf.mxu0 }
0x169f   :  { %v3703_v32 = vadd.f32 %v3675_v40, %v6437_v18  ;;  %v3696_v35 = vadd.f32 %v5035_v25, %v4444_v16  ;;  %v3723_v33 = vsel %vm212_vm3, %v3705_v17, 0.0  ;;  %v5108_v40 = vld [vmem:[%s6773_s12] sm:$0xff]  }
0x16a0   :  { %v3687_v4 = vpop.f32.mrf.mxu0 }
0x16a1   :  { %v3688_v19 = vadd.f32 %v4444_v16, %v3687_v4  ;;  %v3717_v50 = vsel %vm212_vm3, %v3703_v32, 0.0  ;;  %v3708_v11 = vadd.f32 %v3696_v35, %v6460_v45 }
0x16a2   :  { %3718 = vadd.xlane.f32.xlu1 %v3717_v50  ;;  %3721 = vadd.xlane.f32.xlu0 %v3720_v12  ;;  %v5036_v15 = vpop.f32.mrf.mxu0 }
0x16a3   :  { %v3706_v26 = vadd.f32 %v3688_v19, %v6453_v52  ;;  %v3699_v18 = vadd.f32 %v5036_v15, %v4444_v16  ;;  %v3732_v47 = vsel %vm212_vm3, %v3708_v11, 0.0 }
0x16a4   :  { %v3690_v8 = vpop.f32.mrf.mxu0 }
0x16a5   :  { %v3691_v61 = vadd.f32 %v4444_v16, %v3690_v8  ;;  %v3726_v2 = vsel %vm212_vm3, %v3706_v26, 0.0  ;;  %v3709_v10 = vadd.f32 %v3699_v18, %v6462_v46 }
0x16a6   :  { %3724 = vadd.xlane.f32.xlu1 %v3723_v33  ;;  %3727 = vadd.xlane.f32.xlu0 %v3726_v2 }
0x16a7   :  { %v3707_v63 = vadd.f32 %v3691_v61, %v6455_v43  ;;  %v3735_v52 = vsel %vm212_vm3, %v3709_v10, 0.0 }
0x16a9   :  { %v3729_v48 = vsel %vm212_vm3, %v3707_v63, 0.0 }
0x16aa   :  { %3730 = vadd.xlane.f32.xlu1 %v3729_v48  ;;  %3733 = vadd.xlane.f32.xlu0 %v3732_v47 }
0x16ae   :  { %3736 = vadd.xlane.f32.xlu1 %v3735_v52 }
0x1727   :  { %v3716_v45 = vpop.xlane.xlu0 %3715 }
0x1728   :  { %v3738_v62 = vmul.f32 0.03125, %v3716_v45 }
0x172a   :  { %v6502_v55 = vsub.f32 %v3702_v51, %v3738_v62 }
0x172b   :  { %v3719_v21 = vpop.xlane.xlu1 %3718  ;;  %v3722_v39 = vpop.xlane.xlu0 %3721 }
0x172c   :  { %v3739_v60 = vmul.f32 0.03125, %v3719_v21  ;;  %v3740_v34 = vmul.f32 0.03125, %v3722_v39  ;;  %v3754_v43 = vmul.f32 %v6502_v55, %v6502_v55 }
0x172e   :  { %v6506_v46 = vsub.f32 %v3703_v32, %v3739_v60  ;;  %v6508_v36 = vsub.f32 %v3704_v44, %v3740_v34  ;;  %v3762_v49 = vsel %vm212_vm3, %v3754_v43, 0.0  ;;  %v5107_v44 = vld [vmem:[%s6773_s12 + $0x8] sm:$0xff]  }
0x172f   :  { %v3725_v22 = vpop.xlane.xlu1 %3724  ;;  %3763 = vadd.xlane.f32.xlu0 %v3762_v49  ;;  %v3728_v57 = vpop.xlane.xlu0 %3727  ;;  %5037 = vmatprep.subr.bf16.mxu1 %v5107_v44  ;;  %v4455_v60 = vld [vmem:[%s6769_s8 + $0xa] ss:$0 sm:$0xff] }
0x1730   :  { %v3741_v1 = vmul.f32 0.03125, %v3725_v22  ;;  %v3742_v37 = vmul.f32 0.03125, %v3728_v57  ;;  %v3755_v13 = vmul.f32 %v6506_v46, %v6506_v46  ;;  %v3756_v29 = vmul.f32 %v6508_v36, %v6508_v36  ;;  %5038 = vmatpush3.bf16.msra.mxu1 %v5107_v44  ;;  %v4456_v57 = vld [vmem:[%s6769_s8 + $0xb] ss:$0 sm:$0xff]  ;;  %v4457_v44 = vld [vmem:[%s6774_s13] ss:$0 sm:$0xff] }
0x1731   :  { %5039 = vmatprep.subr.bf16.mxu1 %v5108_v40  ;;  %s5358_s13 = smov 32  }
0x1732   :  { %v6515_v54 = vsub.f32 %v3705_v17, %v3741_v1  ;;  %v6517_v7 = vsub.f32 %v3706_v26, %v3742_v37  ;;  %v3765_v14 = vsel %vm212_vm3, %v3755_v13, 0.0  ;;  %v3768_v9 = vsel %vm212_vm3, %v3756_v29, 0.0 }
0x1733   :  { %3766 = vadd.xlane.f32.xlu1 %v3765_v14  ;;  %v3731_v24 = vpop.xlane.xlu1 %3730  ;;  %3769 = vadd.xlane.f32.xlu0 %v3768_v9  ;;  %v3734_v58 = vpop.xlane.xlu0 %3733 }
0x1734   :  { %v3743_v59 = vmul.f32 0.03125, %v3731_v24  ;;  %v3744_v5 = vmul.f32 0.03125, %v3734_v58  ;;  %v3757_v42 = vmul.f32 %v6515_v54, %v6515_v54  ;;  %v3758_v3 = vmul.f32 %v6517_v7, %v6517_v7  ;;  %5040 = vmatpush3.bf16.msra.mxu1 %v5108_v40 }
0x1736   :  { %v6525_v23 = vsub.f32 %v3707_v63, %v3743_v59  ;;  %v6527_v0 = vsub.f32 %v3708_v11, %v3744_v5  ;;  %v3771_v41 = vsel %vm212_vm3, %v3757_v42, 0.0  ;;  %v3774_v28 = vsel %vm212_vm3, %v3758_v3, 0.0 }
0x1737   :  { %3772 = vadd.xlane.f32.xlu1 %v3771_v41  ;;  %v3737_v27 = vpop.xlane.xlu1 %3736  ;;  %3775 = vadd.xlane.f32.xlu0 %v3774_v28 }
0x1738   :  { %v3745_v16 = vmul.f32 0.03125, %v3737_v27  ;;  %v3759_v6 = vmul.f32 %v6525_v23, %v6525_v23  ;;  %v3760_v38 = vmul.f32 %v6527_v0, %v6527_v0 }
0x173a   :  { %v6535_v30 = vsub.f32 %v3709_v10, %v3745_v16  ;;  %v3777_v31 = vsel %vm212_vm3, %v3759_v6, 0.0  ;;  %v3780_v51 = vsel %vm212_vm3, %v3760_v38, 0.0 }
0x173b   :  { %3778 = vadd.xlane.f32.xlu1 %v3777_v31  ;;  %3781 = vadd.xlane.f32.xlu0 %v3780_v51 }
0x173c   :  { %v3761_v56 = vmul.f32 %v6535_v30, %v6535_v30 }
0x173e   :  { %v3783_v20 = vsel %vm212_vm3, %v3761_v56, 0.0 }
0x173f   :  { %3784 = vadd.xlane.f32.xlu1 %v3783_v20 }
0x17b8   :  { %v3764_v53 = vpop.xlane.xlu0 %3763 }
0x17b9   :  { %v3786_v25 = vmul.f32 0.03125, %v3764_v53 }
0x17bb   :  { %v3794_v32 = vadd.f32 1e-05, %v3786_v25 }
0x17bc   :  { %v3767_v17 = vpop.xlane.xlu1 %3766  ;;  %v3770_v4 = vpop.xlane.xlu0 %3769 }
0x17bd   :  { %5285 = vrsqrt.f32 %v3794_v32  ;;  %v3787_v35 = vmul.f32 0.03125, %v3767_v17  ;;  %v3788_v19 = vmul.f32 0.03125, %v3770_v4 }
0x17bf   :  { %v3795_v50 = vadd.f32 1e-05, %v3787_v35  ;;  %v3796_v12 = vadd.f32 1e-05, %v3788_v19 }
0x17c0   :  { %v3773_v15 = vpop.xlane.xlu1 %3772  ;;  %v3776_v26 = vpop.xlane.xlu0 %3775 }
0x17c1   :  { %5287 = vrsqrt.f32 %v3795_v50  ;;  %v3789_v8 = vmul.f32 0.03125, %v3773_v15  ;;  %v3790_v33 = vmul.f32 0.03125, %v3776_v26 }
0x17c2   :  { %5289 = vrsqrt.f32 %v3796_v12 }
0x17c3   :  { %v3797_v11 = vadd.f32 1e-05, %v3789_v8  ;;  %v3798_v18 = vadd.f32 1e-05, %v3790_v33 }
0x17c4   :  { %v3779_v61 = vpop.xlane.xlu1 %3778  ;;  %v3782_v2 = vpop.xlane.xlu0 %3781 }
0x17c5   :  { %5291 = vrsqrt.f32 %v3797_v11  ;;  %v3791_v63 = vmul.f32 0.03125, %v3779_v61  ;;  %v3792_v10 = vmul.f32 0.03125, %v3782_v2 }
0x17c6   :  { %5293 = vrsqrt.f32 %v3798_v18 }
0x17c7   :  { %v3799_v48 = vadd.f32 1e-05, %v3791_v63  ;;  %v3800_v47 = vadd.f32 1e-05, %v3792_v10 }
0x17c8   :  { %v3785_v52 = vpop.xlane.xlu1 %3784 }
0x17c9   :  { %5295 = vrsqrt.f32 %v3799_v48  ;;  %v3793_v45 = vmul.f32 0.03125, %v3785_v52 }
0x17ca   :  { %v5286_v62 = vpop.eup %5285  ;;  %5297 = vrsqrt.f32 %v3800_v47 }
0x17cb   :  { %v3801_v21 = vadd.f32 1e-05, %v3793_v45  ;;  %v3810_v39 = vmul.f32 %v5286_v62, %v6502_v55 }
0x17cd   :  { %5299 = vrsqrt.f32 %v3801_v21  ;;  %v3824_v22 = vmul.f32 %v4455_v60, %v3810_v39 }
0x17ce   :  { %v5288_v34 = vpop.eup %5287 }
0x17cf   :  { %v5290_v43 = vpop.eup %5289  ;;  %v3811_v49 = vmul.f32 %v5288_v34, %v6506_v46  ;;  %v6558_v9 = vadd.f32 %v4456_v57, %v3824_v22 }
0x17d0   :  { %v3812_v1 = vmul.f32 %v5290_v43, %v6508_v36 }
0x17d1   :  { %v3825_v37 = vmul.f32 %v4455_v60, %v3811_v49 }
0x17d2   :  { %v5292_v13 = vpop.eup %5291  ;;  %v3826_v55 = vmul.f32 %v4455_v60, %v3812_v1 }
0x17d3   :  { %v5294_v29 = vpop.eup %5293  ;;  %v3813_v14 = vmul.f32 %v5292_v13, %v6515_v54  ;;  %v6560_v24 = vadd.f32 %v4456_v57, %v3825_v37 }
0x17d4   :  { %v3814_v58 = vmul.f32 %v5294_v29, %v6517_v7  ;;  %v6565_v3 = vadd.f32 %v4456_v57, %v3826_v55 }
0x17d5   :  { %v3827_v46 = vmul.f32 %v4455_v60, %v3813_v14  ;;  %v3846_v59 = vpack.c.bf16 %v6560_v24, %v6558_v9 }
0x17d6   :  { %v5296_v5 = vpop.eup %5295  ;;  %v3828_v41 = vmul.f32 %v4455_v60, %v3814_v58 }
0x17d7   :  { %v5298_v42 = vpop.eup %5297  ;;  %v6567_v36 = vadd.f32 %v4456_v57, %v3827_v46  ;;  %5041 = vmatprep.mubr.msk.bf16.mxu1 %vm212_vm3, %v3846_v59  ;;  %v3815_v54 = vmul.f32 %v5296_v5, %v6525_v23 }
0x17d8   :  { %v3816_v28 = vmul.f32 %v5298_v42, %v6527_v0  ;;  %v6576_v38 = vadd.f32 %v4456_v57, %v3828_v41 }
0x17d9   :  { %v3847_v7 = vpack.c.bf16 %v6567_v36, %v6565_v3  ;;  %v3829_v27 = vmul.f32 %v4455_v60, %v3815_v54 }
0x17da   :  { %v5300_v16 = vpop.eup %5299  ;;  %v3830_v51 = vmul.f32 %v4455_v60, %v3816_v28 }
0x17db   :  { %v3817_v6 = vmul.f32 %v5300_v16, %v6535_v30  ;;  %5042 = vmatmul.mubr.msk.bf16.vlgmr.msra.gmra.mxu1 %vm212_vm3, %v3847_v7  ;;  %v6578_v31 = vadd.f32 %v4456_v57, %v3829_v27 }
0x17dc   :  { %v6583_v0 = vadd.f32 %v4456_v57, %v3830_v51 }
0x17dd   :  { %v3848_v23 = vpack.c.bf16 %v6578_v31, %v6576_v38  ;;  %v3831_v56 = vmul.f32 %v4455_v60, %v3817_v6 }
0x17df   :  { %5045 = vmatprep.mubr.msk.bf16.mxu1 %vm212_vm3, %v3848_v23  ;;  %v6585_v20 = vadd.f32 %v4456_v57, %v3831_v56 }
0x17e1   :  { %v3849_v30 = vpack.c.bf16 %v6585_v20, %v6583_v0 }
0x17e3   :  { %5046 = vmatmul.mubr.msk.bf16.gmra.mxu1 %vm212_vm3, %v3849_v30 }
0x189b   :  { %v5043_v40 = vpop.f32.mrf.mxu1 }
0x189c   :  { %v6593_v53 = vadd.f32 %v5043_v40, %v4457_v44 }
0x189d   :  { %v3919_v25 = vpop.f32.mrf.mxu1 }
0x189e   :  { %v6595_v32 = vadd.f32 %v4457_v44, %v3919_v25  ;;  %v3957_v17 = vsel %vm3950_vm6, %v6593_v53, -inf }
0x189f   :  { %3958 = vmax.xlane.f32.xlu0 %v3957_v17  ;;  %v5044_v4 = vpop.f32.mrf.mxu1 }
0x18a0   :  { %v6599_v35 = vadd.f32 %v5044_v4, %v4457_v44  ;;  %v3951_v50 = vsel %vm3950_vm6, %v6595_v32, -inf  ;;  %v4047_v56 = vand.u32 2147483647, %v6595_v32  ;;  %v4049_v4 = vand.u32 2147483647, %v6593_v53 }
0x18a1   :  { %v3922_v19 = vpop.f32.mrf.mxu1 }
0x18a2   :  { %v6603_v12 = vadd.f32 %v4457_v44, %v3922_v19  ;;  %v3960_v15 = vsel %vm3950_vm6, %v6599_v35, -inf  ;;  %v4050_v40 = vand.u32 2147483647, %v6599_v35  ;;  %v4055_v19 = vadd.f32 1.0, %v4047_v56 }
0x18a3   :  { %3952 = vmax.xlane.f32.xlu0 %v3951_v50  ;;  %v5047_v26 = vpop.f32.mrf.mxu1  ;;  %3961 = vmax.xlane.f32.xlu1 %v3960_v15 }
0x18a4   :  { %v3954_v11 = vsel %vm3950_vm6, %v6603_v12, -inf  ;;  %v6611_v61 = vadd.f32 %v5047_v26, %v4457_v44  ;;  %v4048_v16 = vand.u32 2147483647, %v6603_v12  ;;  %v4058_v26 = vadd.f32 1.0, %v4050_v40 }
0x18a5   :  { %v3935_v8 = vpop.f32.mrf.mxu1 }
0x18a6   :  { %v6607_v33 = vadd.f32 %v4457_v44, %v3935_v8  ;;  %v3969_v52 = vsel %vm3950_vm6, %v6611_v61, -inf  ;;  %v4056_v25 = vadd.f32 1.0, %v4048_v16 }
0x18a7   :  { %v5048_v18 = vpop.f32.mrf.mxu1  ;;  %3955 = vmax.xlane.f32.xlu1 %v3954_v11 }
0x18a8   :  { %v3963_v63 = vsel %vm3950_vm6, %v6607_v33, -inf  ;;  %v6617_v48 = vadd.f32 %v5048_v18, %v4457_v44  ;;  %v4057_v18 = vadd.f32 1.0, %v4049_v4 }
0x18a9   :  { %v3938_v2 = vpop.f32.mrf.mxu1  ;;  %3964 = vmax.xlane.f32.xlu0 %v3963_v63 }
0x18aa   :  { %v6615_v10 = vadd.f32 %v4457_v44, %v3938_v2  ;;  %v3972_v45 = vsel %vm3950_vm6, %v6617_v48, -inf  ;;  %v4051_v2 = vand.u32 2147483647, %v6607_v33 }
0x18ac   :  { %v3966_v47 = vsel %vm3950_vm6, %v6615_v10, -inf  ;;  %v4052_v8 = vand.u32 2147483647, %v6615_v10 }
0x18ad   :  { %3967 = vmax.xlane.f32.xlu1 %v3966_v47  ;;  %3970 = vmax.xlane.f32.xlu0 %v3969_v52 }
0x18ae   :  { %v4060_v52 = vadd.f32 1.0, %v4052_v8 }
0x18b1   :  { %3973 = vmax.xlane.f32.xlu1 %v3972_v45 }
0x1928   :  { %v3959_v62 = vpop.xlane.xlu0 %3958 }
0x1929   :  { %v6626_v21 = vsub.f32 %v6593_v53, %v3959_v62 }
0x192b   :  { %v3987_v39 = vmul.f32 1.442695, %v6626_v21 }
0x192c   :  { %v3953_v60 = vpop.xlane.xlu0 %3952  ;;  %v3962_v34 = vpop.xlane.xlu1 %3961 }
0x192d   :  { %5301 = vpow2.f32 %v3987_v39  ;;  %v6630_v43 = vsub.f32 %v6595_v32, %v3953_v60  ;;  %v6633_v49 = vsub.f32 %v6599_v35, %v3962_v34  ;;  %v4059_v39 = vadd.f32 1.0, %v4051_v2 }
0x192f   :  { %v3983_v22 = vmul.f32 1.442695, %v6630_v43  ;;  %v3989_v57 = vmul.f32 1.442695, %v6633_v49 }
0x1930   :  { %v3956_v1 = vpop.xlane.xlu1 %3955 }
0x1931   :  { %5303 = vpow2.f32 %v3983_v22  ;;  %v6638_v37 = vsub.f32 %v6603_v12, %v3956_v1 }
0x1932   :  { %5305 = vpow2.f32 %v3989_v57  ;;  %v3965_v13 = vpop.xlane.xlu0 %3964 }
0x1933   :  { %v3985_v29 = vmul.f32 1.442695, %v6638_v37  ;;  %v6642_v55 = vsub.f32 %v6607_v33, %v3965_v13 }
0x1935   :  { %5307 = vpow2.f32 %v3985_v29  ;;  %v3991_v14 = vmul.f32 1.442695, %v6642_v55 }
0x1936   :  { %v3968_v58 = vpop.xlane.xlu1 %3967  ;;  %v3971_v59 = vpop.xlane.xlu0 %3970 }
0x1937   :  { %v6646_v46 = vsub.f32 %v6615_v10, %v3968_v58  ;;  %5309 = vpow2.f32 %v3991_v14  ;;  %v6649_v5 = vsub.f32 %v6611_v61, %v3971_v59 }
0x1939   :  { %v3993_v42 = vmul.f32 1.442695, %v6646_v46  ;;  %v3995_v41 = vmul.f32 1.442695, %v6649_v5 }
0x193a   :  { %v5302_v54 = vpop.eup %5301  ;;  %v3974_v28 = vpop.xlane.xlu1 %3973 }
0x193b   :  { %5311 = vpow2.f32 %v3993_v42  ;;  %v6654_v7 = vsub.f32 %v6617_v48, %v3974_v28  ;;  %v4005_v27 = vsel %vm3950_vm6, %v5302_v54, 0.0 }
0x193c   :  { %5313 = vpow2.f32 %v3995_v41  ;;  %4006 = vadd.xlane.f32.xlu0 %v4005_v27 }
0x193d   :  { %v3997_v6 = vmul.f32 1.442695, %v6654_v7 }
0x193e   :  { %v5304_v51 = vpop.eup %5303 }
0x193f   :  { %v5306_v23 = vpop.eup %5305  ;;  %5315 = vpow2.f32 %v3997_v6  ;;  %v3999_v30 = vsel %vm3950_vm6, %v5304_v51, 0.0 }
0x1940   :  { %v4008_v44 = vsel %vm3950_vm6, %v5306_v23, 0.0  ;;  %4000 = vadd.xlane.f32.xlu0 %v3999_v30  ;;  %5317 = vrcp.f32 %v4056_v25  ;;  %v4053_v25 = vand.u32 2147483647, %v6611_v61 }
0x1941   :  { %4009 = vadd.xlane.f32.xlu1 %v4008_v44  ;;  %5319 = vrcp.f32 %v4055_v19 }
0x1942   :  { %v5308_v17 = vpop.eup %5307  ;;  %5321 = vrcp.f32 %v4058_v26  ;;  %v4061_v19 = vadd.f32 1.0, %v4053_v25 }
0x1943   :  { %v4002_v50 = vsel %vm3950_vm6, %v5308_v17, 0.0  ;;  %5323 = vrcp.f32 %v4057_v18  ;;  %v4054_v17 = vand.u32 2147483647, %v6617_v48 }
0x1944   :  { %v5310_v15 = vpop.eup %5309  ;;  %5325 = vrcp.f32 %v4060_v52 }
0x1945   :  { %4003 = vadd.xlane.f32.xlu1 %v4002_v50  ;;  %v4011_v11 = vsel %vm3950_vm6, %v5310_v15, 0.0  ;;  %5327 = vrcp.f32 %v4059_v39  ;;  %v4062_v15 = vadd.f32 1.0, %v4054_v17 }
0x1946   :  { %4012 = vadd.xlane.f32.xlu0 %v4011_v11 }
0x1948   :  { %v5312_v63 = vpop.eup %5311 }
0x1949   :  { %v5314_v47 = vpop.eup %5313  ;;  %v4014_v45 = vsel %vm3950_vm6, %v5312_v63, 0.0 }
0x194a   :  { %4015 = vadd.xlane.f32.xlu1 %v4014_v45  ;;  %v4017_v62 = vsel %vm3950_vm6, %v5314_v47, 0.0 }
0x194b   :  { %4018 = vadd.xlane.f32.xlu0 %v4017_v62 }
0x194c   :  { %v5316_v60 = vpop.eup %5315 }
0x194d   :  { %v4020_v34 = vsel %vm3950_vm6, %v5316_v60, 0.0  ;;  %v5318_v22 = vpop.eup %5317 }
0x194e   :  { %4021 = vadd.xlane.f32.xlu1 %v4020_v34  ;;  %v5320_v57 = vpop.eup %5319  ;;  %v4066_v1 = vmul.f32 %v5318_v22, %v6603_v12 }
0x194f   :  { %v5322_v13 = vpop.eup %5321  ;;  %v4064_v29 = vmul.f32 %v5320_v57, %v6595_v32 }
0x1950   :  { %v5324_v14 = vpop.eup %5323  ;;  %v4080_v58 = vadd.f32 1.0, %v4066_v1  ;;  %v4070_v59 = vmul.f32 %v5322_v13, %v6599_v35 }
0x1951   :  { %v5326_v42 = vpop.eup %5325  ;;  %v4079_v54 = vadd.f32 1.0, %v4064_v29  ;;  %v4068_v41 = vmul.f32 %v5324_v14, %v6593_v53 }
0x1952   :  { %v5328_v28 = vpop.eup %5327  ;;  %v4088_v27 = vmul.f32 6.2831855, %v4080_v58  ;;  %v4082_v16 = vadd.f32 1.0, %v4070_v59  ;;  %v4074_v6 = vmul.f32 %v5326_v42, %v6615_v10 }
0x1953   :  { %v4087_v12 = vmul.f32 6.2831855, %v4079_v54  ;;  %v4081_v51 = vadd.f32 1.0, %v4068_v41  ;;  %v4072_v32 = vmul.f32 %v5328_v28, %v6607_v33 }
0x1954   :  { %v4090_v23 = vmul.f32 6.2831855, %v4082_v16  ;;  %v4084_v35 = vadd.f32 1.0, %v4074_v6 }
0x1955   :  { %v4089_v56 = vmul.f32 6.2831855, %v4081_v51  ;;  %v4083_v53 = vadd.f32 1.0, %v4072_v32 }
0x1956   :  { %v4092_v30 = vmul.f32 6.2831855, %v4084_v35 }
0x1957   :  { %v4091_v10 = vmul.f32 6.2831855, %v4083_v53 }
0x195f   :  { %4137 = vrot.lane.b32.xlu1 %v4088_v27, %s5358_s13 }
0x1961   :  { %4135 = vrot.lane.b32.xlu0 %v4087_v12, %s5358_s13 }
0x1963   :  { %4141 = vrot.lane.b32.xlu1 %v4090_v23, %s5358_s13 }
0x1965   :  { %4139 = vrot.lane.b32.xlu0 %v4089_v56, %s5358_s13 }
0x1967   :  { %4145 = vrot.lane.b32.xlu1 %v4092_v30, %s5358_s13 }
0x1969   :  { %4143 = vrot.lane.b32.xlu0 %v4091_v10, %s5358_s13 }
0x19c5   :  { %v4007_v44 = vpop.xlane.xlu0 %4006 }
0x19c6   :  { %5329 = vlog2.f32 %v4007_v44 }
0x19c9   :  { %v4001_v40 = vpop.xlane.xlu0 %4000 }
0x19ca   :  { %v4010_v33 = vpop.xlane.xlu1 %4009  ;;  %5331 = vlog2.f32 %v4001_v40 }
0x19cb   :  { %5333 = vlog2.f32 %v4010_v33 }
0x19ce   :  { %v4004_v4 = vpop.xlane.xlu1 %4003 }
0x19cf   :  { %5335 = vlog2.f32 %v4004_v4  ;;  %v4013_v50 = vpop.xlane.xlu0 %4012 }
0x19d0   :  { %5337 = vrcp.f32 %v4061_v19 }
0x19d1   :  { %5339 = vlog2.f32 %v4013_v50 }
0x19d3   :  { %v5330_v26 = vpop.eup %5329  ;;  %v4016_v8 = vpop.xlane.xlu1 %4015 }
0x19d4   :  { %v4028_v11 = vmul.f32 0.6931472, %v5330_v26  ;;  %v4019_v18 = vpop.xlane.xlu0 %4018 }
0x19d5   :  { %5341 = vlog2.f32 %v4019_v18 }
0x19d6   :  { %5343 = vrcp.f32 %v4062_v15  ;;  %v4041_v2 = vsub.f32 %v6626_v21, %v4028_v11 }
0x19d7   :  { %v5332_v63 = vpop.eup %5331  ;;  %5345 = vlog2.f32 %v4016_v8  ;;  %v4022_v47 = vpop.xlane.xlu1 %4021 }
0x19d8   :  { %v5334_v52 = vpop.eup %5333  ;;  %v4024_v45 = vmul.f32 0.6931472, %v5332_v63  ;;  %5347 = vlog2.f32 %v4022_v47  ;;  %4107 = vrot.lane.b32.xlu1 %v4041_v2, %s5358_s13 }
0x19d9   :  { %v4030_v62 = vmul.f32 0.6931472, %v5334_v52 }
0x19da   :  { %v4039_v39 = vsub.f32 %v6630_v43, %v4024_v45 }
0x19db   :  { %v4042_v60 = vsub.f32 %v6633_v49, %v4030_v62 }
0x19dc   :  { %v5336_v34 = vpop.eup %5335  ;;  %4103 = vrot.lane.b32.xlu0 %v4039_v39, %s5358_s13 }
0x19dd   :  { %v4026_v22 = vmul.f32 0.6931472, %v5336_v34  ;;  %4109 = vrot.lane.b32.xlu1 %v4042_v60, %s5358_s13  ;;  %v5338_v57 = vpop.eup %5337 }
0x19de   :  { %v5340_v1 = vpop.eup %5339  ;;  %v4076_v42 = vmul.f32 %v5338_v57, %v6611_v61 }
0x19df   :  { %v4040_v21 = vsub.f32 %v6638_v37, %v4026_v22  ;;  %v4032_v43 = vmul.f32 0.6931472, %v5340_v1 }
0x19e0   :  { %v4085_v16 = vadd.f32 1.0, %v4076_v42 }
0x19e1   :  { %4105 = vrot.lane.b32.xlu1 %v4040_v21, %s5358_s13  ;;  %v4043_v27 = vsub.f32 %v6642_v55, %v4032_v43 }
0x19e2   :  { %v5342_v13 = vpop.eup %5341  ;;  %v4093_v12 = vmul.f32 6.2831855, %v4085_v16 }
0x19e3   :  { %v5344_v29 = vpop.eup %5343  ;;  %v4036_v14 = vmul.f32 0.6931472, %v5342_v13 }
0x19e4   :  { %v5346_v58 = vpop.eup %5345  ;;  %v4078_v28 = vmul.f32 %v5344_v29, %v6617_v48  ;;  %v4136_v48 = vpop.permute.xlu0 %4135 }
0x19e5   :  { %v5348_v59 = vpop.eup %5347  ;;  %v4045_v49 = vsub.f32 %v6649_v5, %v4036_v14  ;;  %v4034_v41 = vmul.f32 0.6931472, %v5346_v58 }
0x19e6   :  { %v4038_v54 = vmul.f32 0.6931472, %v5348_v59  ;;  %v4086_v5 = vadd.f32 1.0, %v4078_v28 }
0x19e7   :  { %4115 = vrot.lane.b32.xlu0 %v4045_v49, %s5358_s13  ;;  %v4044_v6 = vsub.f32 %v6646_v46, %v4034_v41 }
0x19e8   :  { %v4046_v37 = vsub.f32 %v6654_v7, %v4038_v54  ;;  %v4094_v61 = vmul.f32 6.2831855, %v4086_v5  ;;  %v4138_v7 = vpop.permute.xlu1 %4137  ;;  %v4140_v55 = vpop.permute.xlu0 %4139 }
0x19ea   :  { %4117 = vrot.lane.b32.xlu1 %v4046_v37, %s5358_s13 }
0x19eb   :  { %4111 = vrot.lane.b32.xlu0 %v4043_v27, %s5358_s13 }
0x19ec   :  { %v4142_v51 = vpop.permute.xlu1 %4141  ;;  %v4144_v23 = vpop.permute.xlu0 %4143 }
0x19ee   :  { %4113 = vrot.lane.b32.xlu1 %v4044_v6, %s5358_s13 }
0x19ef   :  { %4147 = vrot.lane.b32.xlu0 %v4093_v12, %s5358_s13 }
0x19f0   :  { %v4146_v32 = vpop.permute.xlu1 %4145 }
0x19f2   :  { %4149 = vrot.lane.b32.xlu1 %v4094_v61, %s5358_s13 }
0x1a4a   :  { %v4108_v35 = vpop.permute.xlu1 %4107 }
0x1a4b   :  { %v4161_v46 = vsel %vm212_vm3, %v6565_v3, %v4108_v35 }
0x1a4c   :  { %v4170_v56 = vsel %vm4167_vm7, %v4161_v46, %v4140_v55 }
0x1a4d   :  { %4179 = vst.msk [vmem:[%s6775_s14 + $0x10] sm:$0xff] %vm4176_vm8, %v4170_v56 }
0x1a4e   :  { %v4104_v53 = vpop.permute.xlu0 %4103 }
0x1a4f   :  { %v4110_v30 = vpop.permute.xlu1 %4109  ;;  %v4159_v10 = vsel %vm212_vm3, %v6558_v9, %v4104_v53 }
0x1a50   :  { %v4162_v44 = vsel %vm212_vm3, %v6567_v36, %v4110_v30  ;;  %v4168_v40 = vsel %vm4167_vm7, %v4159_v10, %v4136_v48 }
0x1a51   :  { %v4171_v33 = vsel %vm4167_vm7, %v4162_v44, %v4142_v51  ;;  %4177 = vst.msk [vmem:[%s6775_s14] sm:$0xff] %vm4176_vm8, %v4168_v40 }
0x1a52   :  { %4180 = vst.msk [vmem:[%s6775_s14 + $0x18] sm:$0xff] %vm4176_vm8, %v4171_v33 }
0x1a53   :  { %v4106_v3 = vpop.permute.xlu1 %4105 }
0x1a54   :  { %v4160_v9 = vsel %vm212_vm3, %v6560_v24, %v4106_v3 }
0x1a55   :  { %v4169_v36 = vsel %vm4167_vm7, %v4160_v9, %v4138_v7 }
0x1a56   :  { %4178 = vst.msk [vmem:[%s6775_s14 + $0x8] sm:$0xff] %vm4176_vm8, %v4169_v36 }
0x1a59   :  { %v4116_v25 = vpop.permute.xlu0 %4115 }
0x1a5a   :  { %v4165_v15 = vsel %vm212_vm3, %v6583_v0, %v4116_v25 }
0x1a5c   :  { %v4118_v17 = vpop.permute.xlu1 %4117 }
0x1a5d   :  { %v4112_v4 = vpop.permute.xlu0 %4111 }
0x1a5e   :  { %v4163_v19 = vsel %vm212_vm3, %v6576_v38, %v4112_v4  ;;  %v4166_v38 = vsel %vm212_vm3, %v6585_v20, %v4118_v17 }
0x1a5f   :  { %v4172_v50 = vsel %vm4167_vm7, %v4163_v19, %v4144_v23 }
0x1a60   :  { %4181 = vst.msk [vmem:[%s6775_s14 + $0x20] sm:$0xff] %vm4176_vm8, %v4172_v50  ;;  %v4114_v24 = vpop.permute.xlu1 %4113 }
0x1a61   :  { %v4164_v26 = vsel %vm212_vm3, %v6578_v31, %v4114_v24  ;;  %v4148_v8 = vpop.permute.xlu0 %4147 }
0x1a62   :  { %v4173_v11 = vsel %vm4167_vm7, %v4164_v26, %v4146_v32  ;;  %v4174_v18 = vsel %vm4167_vm7, %v4165_v15, %v4148_v8 }
0x1a63   :  { %4182 = vst.msk [vmem:[%s6775_s14 + $0x28] sm:$0xff] %vm4176_vm8, %v4173_v11  ;;  %4183 = vst.msk [vmem:[%s6775_s14 + $0x30] sm:$0xff] %vm4176_vm8, %v4174_v18 }
0x1a64   :  { %v4150_v0 = vpop.permute.xlu1 %4149 }
0x1a65   :  { %v4175_v31 = vsel %vm4167_vm7, %v4166_v38, %v4150_v0 }
0x1a66   :  { %4184 = vst.msk [vmem:[%s6775_s14 + $0x38] sm:$0xff] %vm4176_vm8, %v4175_v31 }

</bundles_post_ra>
